<compile_context>
chip_gen: v7x
topology: tpu7x:2x2x1
jax: 0.10.0
libtpu: 0.0.40
codegen_flags: <defaults>
</compile_context>

<pallas_src>
import functools

import jax
import jax.numpy as jnp
from jax import lax
from jax.experimental import pallas as pl
from jax.experimental.pallas import tpu as pltpu


# ----------------------------------------------------------------------------
# Fused kernel: one grid step == one sample's full MSAtten forward.
# ----------------------------------------------------------------------------
def _msatten_kernel(x_ref, wsq_ref, wq_ref, wk_ref, wv_ref, wout_ref, psh_ref,
                    gnsq_ref, gnq_ref, gnk_ref, gnv_ref, gnout_ref, o_ref,
                    *, c, heads, hs, ws, eps):
    hw = hs * ws
    x = x_ref[0]                                   # (Cin, HW) f32
    xb = x.astype(jnp.bfloat16)

    def gnorm(y, gn_ref):
        # GroupNorm(2, C).  gn_ref = [gamma, beta, mask1], each (C, 1).
        # mask1 marks the channels belonging to the SECOND statistics group in
        # whatever channel order `y` uses (head-major for q/k/v, natural else).
        gamma, beta, m1 = gn_ref[0], gn_ref[1], gn_ref[2]
        m0 = 1.0 - m1
        cnt = float((y.shape[0] // 2) * y.shape[1])
        mu0 = jnp.sum(y * m0, axis=(0, 1), keepdims=True) / cnt
        mu1 = jnp.sum(y * m1, axis=(0, 1), keepdims=True) / cnt
        d = y - (m0 * mu0 + m1 * mu1)
        v0 = jnp.sum(d * d * m0, axis=(0, 1), keepdims=True) / cnt
        v1 = jnp.sum(d * d * m1, axis=(0, 1), keepdims=True) / cnt
        inv = m0 * lax.rsqrt(v0 + eps) + m1 * lax.rsqrt(v1 + eps)
        return d * inv * gamma + beta

    # --- squeeze: Conv2d(Cin, c, 1, groups=c) as dense block-diag matmul + GN
    x1 = gnorm(jnp.dot(wsq_ref[...], xb, preferred_element_type=jnp.float32),
               gnsq_ref)                           # (c, HW) f32
    x1b = x1.astype(jnp.bfloat16)

    # --- k projection: 1x1 grouped conv (dense, head-major rows) + GN
    kx = gnorm(jnp.dot(wk_ref[...], x1b, preferred_element_type=jnp.float32),
               gnk_ref)                            # (c*H, HW)

    # --- q / v projections: 3x3 'same' grouped convs.  Tap (dh, dw) of the
    #     im2col is x1 @ psh_ref[t]  (shift + zero-pad-boundary-mask matrix on
    #     the lane axis, built once at init); taps accumulate in f32.
    yq = yv = None
    for t in range(9):
        xs = jnp.dot(x1b, psh_ref[t],
                     preferred_element_type=jnp.float32).astype(jnp.bfloat16)
        dq = jnp.dot(wq_ref[t], xs, preferred_element_type=jnp.float32)
        dv = jnp.dot(wv_ref[t], xs, preferred_element_type=jnp.float32)
        yq = dq if yq is None else yq + dq
        yv = dv if yv is None else yv + dv
    qx = gnorm(yq, gnq_ref)                        # (c*H, HW) f32, head-major
    vx = gnorm(yv, gnv_ref)

    # --- CSA per head.  Weights are head-major, so each head is a contiguous
    #     8-aligned row block: no transposes, no gathers.
    scale = float(c) ** -0.5
    zs = []
    for hi in range(heads):
        qh = qx[hi * c:(hi + 1) * c].astype(jnp.bfloat16)
        kh = kx[hi * c:(hi + 1) * c].astype(jnp.bfloat16)
        vh = vx[hi * c:(hi + 1) * c].astype(jnp.bfloat16)
        s = lax.dot_general(qh, kh, (((1,), (1,)), ((), ())),
                            preferred_element_type=jnp.float32) * scale  # (c, c)
        s = s - jnp.max(s, axis=-1, keepdims=True)
        e = jnp.exp(s)
        att = e / jnp.sum(e, axis=-1, keepdims=True)       # dropout = identity
        zs.append(jnp.dot(att.astype(jnp.bfloat16), vh,
                          preferred_element_type=jnp.float32))            # (c, HW)
    x1a = jnp.concatenate(zs, axis=0)              # CSA output, head-major (c*H, HW)

    # --- x2 = Mamba(x1) + OBA(x1) with aa=False (mamba = obatten = Identity):
    #     x2 = 2 * x1 * softmax_w(x1);  fused, never touches HBM.  The width
    #     softmax is per (channel, h) row, so the head-major order is fine.
    a3 = x1a.reshape(c * heads, hs, ws)
    mrow = jnp.max(a3, axis=-1, keepdims=True)
    e2 = jnp.exp(a3 - mrow)
    sm = e2 / jnp.sum(e2, axis=-1, keepdims=True)          # dropout = identity
    z = (a3 + 2.0 * a3 * sm).reshape(c * heads, hw)        # = x1 + x2

    # --- out: 1x1 grouped conv (dense weight, columns permuted to accept
    #     head-major z) + GN, then the module's final  x * out(x1 + x2).
    yo = jnp.dot(wout_ref[...], z.astype(jnp.bfloat16),
                 preferred_element_type=jnp.float32)        # (Cin, HW)
    o_ref[0] = x * gnorm(yo, gnout_ref)


# ----------------------------------------------------------------------------
# Wrapper
# ----------------------------------------------------------------------------
def msatten_fwd(p, x):
    n, cin, hs, ws = x.shape
    hw = hs * ws
    c, heads = p["c"], p["H"]
    ch = c * heads
    xf = x.reshape(n, cin, hw)

    def c2(shape):
        return pl.BlockSpec(shape, lambda i: (0, 0))

    def c3(shape):
        return pl.BlockSpec(shape, lambda i: (0, 0, 0))

    out = pl.pallas_call(
        functools.partial(_msatten_kernel, c=c, heads=heads, hs=hs, ws=ws,
                          eps=1e-5),
        out_shape=jax.ShapeDtypeStruct((n, cin, hw), jnp.float32),
        grid=(n,),
        in_specs=[
            pl.BlockSpec((1, cin, hw), lambda i: (i, 0, 0)),   # x
            c2((c, cin)),                                       # w_sq
            c3((9, ch, c)),                                     # w_q (per-tap)
            c2((ch, c)),                                        # w_k
            c3((9, ch, c)),                                     # w_v (per-tap)
            c2((cin, ch)),                                      # w_out
            c3((9, hw, hw)),                                    # shift matrices
            c3((3, c, 1)),                                      # GN squeeze
            c3((3, ch, 1)),                                     # GN q
            c3((3, ch, 1)),                                     # GN k
            c3((3, ch, 1)),                                     # GN v
            c3((3, cin, 1)),                                    # GN out
        ],
        out_specs=pl.BlockSpec((1, cin, hw), lambda i: (i, 0, 0)),
        compiler_params=pltpu.CompilerParams(
            dimension_semantics=("parallel",)),
    )(xf, p["w_sq"], p["w_q"], p["w_k"], p["w_v"], p["w_out"], p["pshift"],
      p["gn_sq"], p["gn_q"], p["gn_k"], p["gn_v"], p["gn_out"])
    return out.reshape(n, cin, hs, ws)


# ----------------------------------------------------------------------------
# Parameters (deterministic, synthetic) — dense / permuted weights built once.
# ----------------------------------------------------------------------------
class KeyGen:
    def __init__(self, key):
        self.key = key

    def __call__(self):
        self.key, k = jax.random.split(self.key)
        return k


def _conv_weight(kg, cin, cout, k, groups):
    cig = cin // groups
    fan_in = cig * k * k
    return jax.random.normal(kg(), (cout, cig, k, k), jnp.float32) * fan_in ** -0.5


def _dense_taps(w, cin, groups):
    """(Cout, Cin/groups, k, k) grouped weight -> (k*k, Cout, Cin) block-diag dense."""
    cout, cig, k, _ = w.shape
    og = cout // groups
    dense = jnp.zeros((cout, cin, k, k), w.dtype)
    for g in range(groups):
        dense = dense.at[g * og:(g + 1) * og, g * cig:(g + 1) * cig].set(
            w[g * og:(g + 1) * og])
    return dense.transpose(2, 3, 0, 1).reshape(k * k, cout, cin)   # t = kh*k + kw


def _gn_pack(cout, perm=None):
    """[gamma, beta, group-1 mask] stacked as (3, Cout, 1); optionally permuted
    into the channel order the kernel uses (head-major for q/k/v)."""
    gamma = jnp.ones((cout,), jnp.float32)
    beta = jnp.zeros((cout,), jnp.float32)
    mask1 = (jnp.arange(cout) >= cout // 2).astype(jnp.float32)
    if perm is not None:
        gamma, beta, mask1 = gamma[perm], beta[perm], mask1[perm]
    return jnp.stack([gamma, beta, mask1]).reshape(3, cout, 1)


def _shift_matrices(hs, ws):
    """(9, HW, HW) 0/1 matrices: P_t[j, i] = 1 iff spatial source (h+dh, w+dw)
    of output i exists and equals flattened index j ('same' padding taps)."""
    hw = hs * ws
    ii = jnp.arange(hw)
    hh, ww = ii // ws, ii % ws
    taps = []
    for kh in range(3):
        for kw in range(3):
            dh, dw = kh - 1, kw - 1
            valid = ((hh + dh >= 0) & (hh + dh < hs) &
                     (ww + dw >= 0) & (ww + dw < ws))
            src = jnp.clip((hh + dh) * ws + (ww + dw), 0, hw - 1)
            taps.append((jnp.arange(hw)[:, None] == src[None, :]) & valid[None, :])
    return jnp.stack(taps).astype(jnp.bfloat16)


def init_msatten(kg, ch_in, head, rr, hs, ws):
    c = ch_in // rr
    ch = c * head
    # head-major channel j = hi*c + ci  <->  PyTorch channel  ci*head + hi
    perm = jnp.asarray([ci * head + hi for hi in range(head) for ci in range(c)],
                       dtype=jnp.int32)

    w_sq = _dense_taps(_conv_weight(kg, ch_in, c, 1, c), ch_in, c)[0]
    w_q = _dense_taps(_conv_weight(kg, c, ch, 3, c // 4), c, c // 4)[:, perm, :]
    w_k = _dense_taps(_conv_weight(kg, c, ch, 1, c // 2), c, c // 2)[0][perm, :]
    w_v = _dense_taps(_conv_weight(kg, c, ch, 3, c // 2), c, c // 2)[:, perm, :]
    w_out = _dense_taps(_conv_weight(kg, ch, ch_in, 1, ch // 2), ch, ch // 2)[0][:, perm]

    return {
        "c": c, "H": head, "ch_in": ch_in,
        "w_sq": w_sq.astype(jnp.bfloat16),
        "w_q": w_q.astype(jnp.bfloat16),
        "w_k": w_k.astype(jnp.bfloat16),
        "w_v": w_v.astype(jnp.bfloat16),
        "w_out": w_out.astype(jnp.bfloat16),
        "pshift": _shift_matrices(hs, ws),
        "gn_sq": _gn_pack(c),
        "gn_q": _gn_pack(ch, perm),
        "gn_k": _gn_pack(ch, perm),
        "gn_v": _gn_pack(ch, perm),
        "gn_out": _gn_pack(ch_in),
        # TODO(synk): Mamba / OBAtten (FeatureExtraction) sources were not
        # provided; the aa=True branch falls back to nn.Identity, identical to
        # the aa=False configuration implemented here.
    }


if __name__ == "__main__":
    kg = KeyGen(jax.random.PRNGKey(0))
    # MSAtten(ch_in=64, head=2, ps=8, rr=8, reduction=16, aa=False, dropout=0.1)
    ch_in, head, rr = 64, 2, 8
    hs = ws = 16
    params = init_msatten(kg, ch_in, head, rr, hs, ws)

    x = jax.random.normal(jax.random.PRNGKey(0), (2, ch_in, hs, ws), jnp.float32)

    fwd = jax.jit(lambda inp: msatten_fwd(params, inp))
    out = jax.block_until_ready(fwd(x))

    assert out.shape == x.shape, out.shape
    assert bool(jnp.all(jnp.isfinite(out)))
    print("KERNEL_OK")
</pallas_src>

<mosaic_0001>
module attributes {stable_mosaic.version = 11 : i64} {
  func.func @_msatten_kernel(%arg0: i32, %arg1: memref<1x64x256xf32, #tpu.memory_space<vmem>>, %arg2: memref<8x64xbf16, #tpu.memory_space<vmem>>, %arg3: memref<9x16x8xbf16, #tpu.memory_space<vmem>>, %arg4: memref<16x8xbf16, #tpu.memory_space<vmem>>, %arg5: memref<9x16x8xbf16, #tpu.memory_space<vmem>>, %arg6: memref<64x16xbf16, #tpu.memory_space<vmem>>, %arg7: memref<9x256x256xbf16, #tpu.memory_space<vmem>>, %arg8: memref<3x8x1xf32, #tpu.memory_space<vmem>>, %arg9: memref<3x16x1xf32, #tpu.memory_space<vmem>>, %arg10: memref<3x16x1xf32, #tpu.memory_space<vmem>>, %arg11: memref<3x16x1xf32, #tpu.memory_space<vmem>>, %arg12: memref<3x64x1xf32, #tpu.memory_space<vmem>>, %arg13: memref<1x64x256xf32, #tpu.memory_space<vmem>>) attributes {dimension_semantics = [#tpu.dimension_semantics<parallel>], iteration_bounds = array<i64: 2>, scalar_prefetch = 0 : i64, scratch_operands = 0 : i64, tpu.core_type = #tpu.core_type<tc>, window_params = [{transform_indices = @transform_0, window_bounds = array<i64: 1, 64, 256>}, {pipeline_mode = #tpu.pipeline_mode<synchronous>, transform_indices = @transform_1, window_bounds = array<i64: 8, 64>}, {pipeline_mode = #tpu.pipeline_mode<synchronous>, transform_indices = @transform_2, window_bounds = array<i64: 9, 16, 8>}, {pipeline_mode = #tpu.pipeline_mode<synchronous>, transform_indices = @transform_3, window_bounds = array<i64: 16, 8>}, {pipeline_mode = #tpu.pipeline_mode<synchronous>, transform_indices = @transform_4, window_bounds = array<i64: 9, 16, 8>}, {pipeline_mode = #tpu.pipeline_mode<synchronous>, transform_indices = @transform_5, window_bounds = array<i64: 64, 16>}, {pipeline_mode = #tpu.pipeline_mode<synchronous>, transform_indices = @transform_6, window_bounds = array<i64: 9, 256, 256>}, {pipeline_mode = #tpu.pipeline_mode<synchronous>, transform_indices = @transform_7, window_bounds = array<i64: 3, 8, 1>}, {pipeline_mode = #tpu.pipeline_mode<synchronous>, transform_indices = @transform_8, window_bounds = array<i64: 3, 16, 1>}, {pipeline_mode = #tpu.pipeline_mode<synchronous>, transform_indices = @transform_9, window_bounds = array<i64: 3, 16, 1>}, {pipeline_mode = #tpu.pipeline_mode<synchronous>, transform_indices = @transform_10, window_bounds = array<i64: 3, 16, 1>}, {pipeline_mode = #tpu.pipeline_mode<synchronous>, transform_indices = @transform_11, window_bounds = array<i64: 3, 64, 1>}, {transform_indices = @transform_12, window_bounds = array<i64: 1, 64, 256>}]} {
    %c0 = arith.constant 0 : index
    %c0_0 = arith.constant 0 : index
    %c0_1 = arith.constant 0 : index
    %0 = vector.load %arg1[%c0, %c0_0, %c0_1] : memref<1x64x256xf32, #tpu.memory_space<vmem>>, vector<1x64x256xf32>
    %1 = vector.shape_cast %0 : vector<1x64x256xf32> to vector<64x256xf32>
    %2 = arith.truncf %1 : vector<64x256xf32> to vector<64x256xbf16>
    %c0_2 = arith.constant 0 : index
    %c0_3 = arith.constant 0 : index
    %3 = vector.load %arg2[%c0_2, %c0_3] : memref<8x64xbf16, #tpu.memory_space<vmem>>, vector<8x64xbf16>
    %cst = arith.constant dense<0.000000e+00> : vector<8x256xf32>
    %4 = tpu.matmul %3, %2, %cst {dimension_numbers = #tpu.dot_dimension_numbers<[1], [0], [0], [1], [0, 0, 1, 1], [], []>} : vector<8x64xbf16>, vector<64x256xbf16>, vector<8x256xf32> -> vector<8x256xf32>
    %c0_4 = arith.constant 0 : index
    %c0_5 = arith.constant 0 : index
    %c0_6 = arith.constant 0 : index
    %5 = vector.load %arg8[%c0_4, %c0_5, %c0_6] : memref<3x8x1xf32, #tpu.memory_space<vmem>>, vector<1x8x1xf32>
    %6 = vector.shape_cast %5 : vector<1x8x1xf32> to vector<8x1xf32>
    %c1 = arith.constant 1 : index
    %c0_7 = arith.constant 0 : index
    %c0_8 = arith.constant 0 : index
    %7 = vector.load %arg8[%c1, %c0_7, %c0_8] : memref<3x8x1xf32, #tpu.memory_space<vmem>>, vector<1x8x1xf32>
    %8 = vector.shape_cast %7 : vector<1x8x1xf32> to vector<8x1xf32>
    %c2 = arith.constant 2 : index
    %c0_9 = arith.constant 0 : index
    %c0_10 = arith.constant 0 : index
    %9 = vector.load %arg8[%c2, %c0_9, %c0_10] : memref<3x8x1xf32, #tpu.memory_space<vmem>>, vector<1x8x1xf32>
    %10 = vector.shape_cast %9 : vector<1x8x1xf32> to vector<8x1xf32>
    %cst_11 = arith.constant 1.000000e+00 : f32
    %11 = vector.broadcast %cst_11 : f32 to vector<8x1xf32>
    %12 = arith.subf %11, %10 : vector<8x1xf32>
    %13 = vector.broadcast %12 : vector<8x1xf32> to vector<8x256xf32>
    %14 = arith.mulf %4, %13 : vector<8x256xf32>
    %15 = vector.shape_cast %14 : vector<8x256xf32> to vector<1x8x256xf32>
    %cst_12 = arith.constant dense<0.000000e+00> : vector<1xf32>
    %16 = vector.multi_reduction <add>, %15, %cst_12 [1, 2] : vector<1x8x256xf32> to vector<1xf32>
    %17 = vector.shape_cast %16 : vector<1xf32> to vector<1x1x1xf32>
    %18 = vector.extract %17[0, 0, 0] : f32 from vector<1x1x1xf32>
    %19 = vector.broadcast %18 : f32 to vector<1x1xf32>
    %cst_13 = arith.constant 1.024000e+03 : f32
    %20 = vector.broadcast %cst_13 : f32 to vector<1x1xf32>
    %21 = arith.divf %19, %20 : vector<1x1xf32>
    %22 = vector.broadcast %10 : vector<8x1xf32> to vector<8x256xf32>
    %23 = arith.mulf %4, %22 : vector<8x256xf32>
    %24 = vector.shape_cast %23 : vector<8x256xf32> to vector<1x8x256xf32>
    %cst_14 = arith.constant dense<0.000000e+00> : vector<1xf32>
    %25 = vector.multi_reduction <add>, %24, %cst_14 [1, 2] : vector<1x8x256xf32> to vector<1xf32>
    %26 = vector.shape_cast %25 : vector<1xf32> to vector<1x1x1xf32>
    %27 = vector.extract %26[0, 0, 0] : f32 from vector<1x1x1xf32>
    %28 = vector.broadcast %27 : f32 to vector<1x1xf32>
    %cst_15 = arith.constant 1.024000e+03 : f32
    %29 = vector.broadcast %cst_15 : f32 to vector<1x1xf32>
    %30 = arith.divf %28, %29 : vector<1x1xf32>
    %31 = vector.broadcast %21 : vector<1x1xf32> to vector<8x1xf32>
    %32 = arith.mulf %12, %31 : vector<8x1xf32>
    %33 = vector.broadcast %30 : vector<1x1xf32> to vector<8x1xf32>
    %34 = arith.mulf %10, %33 : vector<8x1xf32>
    %35 = arith.addf %32, %34 : vector<8x1xf32>
    %36 = vector.broadcast %35 : vector<8x1xf32> to vector<8x256xf32>
    %37 = arith.subf %4, %36 : vector<8x256xf32>
    %38 = arith.mulf %37, %37 : vector<8x256xf32>
    %39 = vector.broadcast %12 : vector<8x1xf32> to vector<8x256xf32>
    %40 = arith.mulf %38, %39 : vector<8x256xf32>
    %41 = vector.shape_cast %40 : vector<8x256xf32> to vector<1x8x256xf32>
    %cst_16 = arith.constant dense<0.000000e+00> : vector<1xf32>
    %42 = vector.multi_reduction <add>, %41, %cst_16 [1, 2] : vector<1x8x256xf32> to vector<1xf32>
    %43 = vector.shape_cast %42 : vector<1xf32> to vector<1x1x1xf32>
    %44 = vector.extract %43[0, 0, 0] : f32 from vector<1x1x1xf32>
    %45 = vector.broadcast %44 : f32 to vector<1x1xf32>
    %cst_17 = arith.constant 1.024000e+03 : f32
    %46 = vector.broadcast %cst_17 : f32 to vector<1x1xf32>
    %47 = arith.divf %45, %46 : vector<1x1xf32>
    %48 = arith.mulf %37, %37 : vector<8x256xf32>
    %49 = vector.broadcast %10 : vector<8x1xf32> to vector<8x256xf32>
    %50 = arith.mulf %48, %49 : vector<8x256xf32>
    %51 = vector.shape_cast %50 : vector<8x256xf32> to vector<1x8x256xf32>
    %cst_18 = arith.constant dense<0.000000e+00> : vector<1xf32>
    %52 = vector.multi_reduction <add>, %51, %cst_18 [1, 2] : vector<1x8x256xf32> to vector<1xf32>
    %53 = vector.shape_cast %52 : vector<1xf32> to vector<1x1x1xf32>
    %54 = vector.extract %53[0, 0, 0] : f32 from vector<1x1x1xf32>
    %55 = vector.broadcast %54 : f32 to vector<1x1xf32>
    %cst_19 = arith.constant 1.024000e+03 : f32
    %56 = vector.broadcast %cst_19 : f32 to vector<1x1xf32>
    %57 = arith.divf %55, %56 : vector<1x1xf32>
    %cst_20 = arith.constant 9.99999974E-6 : f32
    %58 = vector.broadcast %cst_20 : f32 to vector<1x1xf32>
    %59 = arith.addf %47, %58 : vector<1x1xf32>
    %60 = math.rsqrt %59 : vector<1x1xf32>
    %61 = vector.broadcast %60 : vector<1x1xf32> to vector<8x1xf32>
    %62 = arith.mulf %12, %61 : vector<8x1xf32>
    %cst_21 = arith.constant 9.99999974E-6 : f32
    %63 = vector.broadcast %cst_21 : f32 to vector<1x1xf32>
    %64 = arith.addf %57, %63 : vector<1x1xf32>
    %65 = math.rsqrt %64 : vector<1x1xf32>
    %66 = vector.broadcast %65 : vector<1x1xf32> to vector<8x1xf32>
    %67 = arith.mulf %10, %66 : vector<8x1xf32>
    %68 = arith.addf %62, %67 : vector<8x1xf32>
    %69 = vector.broadcast %68 : vector<8x1xf32> to vector<8x256xf32>
    %70 = arith.mulf %37, %69 : vector<8x256xf32>
    %71 = vector.broadcast %6 : vector<8x1xf32> to vector<8x256xf32>
    %72 = arith.mulf %70, %71 : vector<8x256xf32>
    %73 = vector.broadcast %8 : vector<8x1xf32> to vector<8x256xf32>
    %74 = arith.addf %72, %73 : vector<8x256xf32>
    %75 = arith.truncf %74 : vector<8x256xf32> to vector<8x256xbf16>
    %c0_22 = arith.constant 0 : index
    %c0_23 = arith.constant 0 : index
    %76 = vector.load %arg4[%c0_22, %c0_23] : memref<16x8xbf16, #tpu.memory_space<vmem>>, vector<16x8xbf16>
    %cst_24 = arith.constant dense<0.000000e+00> : vector<16x256xf32>
    %77 = tpu.matmul %76, %75, %cst_24 {dimension_numbers = #tpu.dot_dimension_numbers<[1], [0], [0], [1], [0, 0, 1, 1], [], []>} : vector<16x8xbf16>, vector<8x256xbf16>, vector<16x256xf32> -> vector<16x256xf32>
    %c0_25 = arith.constant 0 : index
    %c0_26 = arith.constant 0 : index
    %c0_27 = arith.constant 0 : index
    %78 = vector.load %arg10[%c0_25, %c0_26, %c0_27] : memref<3x16x1xf32, #tpu.memory_space<vmem>>, vector<1x16x1xf32>
    %79 = vector.shape_cast %78 : vector<1x16x1xf32> to vector<16x1xf32>
    %c1_28 = arith.constant 1 : index
    %c0_29 = arith.constant 0 : index
    %c0_30 = arith.constant 0 : index
    %80 = vector.load %arg10[%c1_28, %c0_29, %c0_30] : memref<3x16x1xf32, #tpu.memory_space<vmem>>, vector<1x16x1xf32>
    %81 = vector.shape_cast %80 : vector<1x16x1xf32> to vector<16x1xf32>
    %c2_31 = arith.constant 2 : index
    %c0_32 = arith.constant 0 : index
    %c0_33 = arith.constant 0 : index
    %82 = vector.load %arg10[%c2_31, %c0_32, %c0_33] : memref<3x16x1xf32, #tpu.memory_space<vmem>>, vector<1x16x1xf32>
    %83 = vector.shape_cast %82 : vector<1x16x1xf32> to vector<16x1xf32>
    %cst_34 = arith.constant 1.000000e+00 : f32
    %84 = vector.broadcast %cst_34 : f32 to vector<16x1xf32>
    %85 = arith.subf %84, %83 : vector<16x1xf32>
    %86 = vector.broadcast %85 : vector<16x1xf32> to vector<16x256xf32>
    %87 = arith.mulf %77, %86 : vector<16x256xf32>
    %88 = vector.shape_cast %87 : vector<16x256xf32> to vector<1x16x256xf32>
    %cst_35 = arith.constant dense<0.000000e+00> : vector<1xf32>
    %89 = vector.multi_reduction <add>, %88, %cst_35 [1, 2] : vector<1x16x256xf32> to vector<1xf32>
    %90 = vector.shape_cast %89 : vector<1xf32> to vector<1x1x1xf32>
    %91 = vector.extract %90[0, 0, 0] : f32 from vector<1x1x1xf32>
    %92 = vector.broadcast %91 : f32 to vector<1x1xf32>
    %cst_36 = arith.constant 2.048000e+03 : f32
    %93 = vector.broadcast %cst_36 : f32 to vector<1x1xf32>
    %94 = arith.divf %92, %93 : vector<1x1xf32>
    %95 = vector.broadcast %83 : vector<16x1xf32> to vector<16x256xf32>
    %96 = arith.mulf %77, %95 : vector<16x256xf32>
    %97 = vector.shape_cast %96 : vector<16x256xf32> to vector<1x16x256xf32>
    %cst_37 = arith.constant dense<0.000000e+00> : vector<1xf32>
    %98 = vector.multi_reduction <add>, %97, %cst_37 [1, 2] : vector<1x16x256xf32> to vector<1xf32>
    %99 = vector.shape_cast %98 : vector<1xf32> to vector<1x1x1xf32>
    %100 = vector.extract %99[0, 0, 0] : f32 from vector<1x1x1xf32>
    %101 = vector.broadcast %100 : f32 to vector<1x1xf32>
    %cst_38 = arith.constant 2.048000e+03 : f32
    %102 = vector.broadcast %cst_38 : f32 to vector<1x1xf32>
    %103 = arith.divf %101, %102 : vector<1x1xf32>
    %104 = vector.broadcast %94 : vector<1x1xf32> to vector<16x1xf32>
    %105 = arith.mulf %85, %104 : vector<16x1xf32>
    %106 = vector.broadcast %103 : vector<1x1xf32> to vector<16x1xf32>
    %107 = arith.mulf %83, %106 : vector<16x1xf32>
    %108 = arith.addf %105, %107 : vector<16x1xf32>
    %109 = vector.broadcast %108 : vector<16x1xf32> to vector<16x256xf32>
    %110 = arith.subf %77, %109 : vector<16x256xf32>
    %111 = arith.mulf %110, %110 : vector<16x256xf32>
    %112 = vector.broadcast %85 : vector<16x1xf32> to vector<16x256xf32>
    %113 = arith.mulf %111, %112 : vector<16x256xf32>
    %114 = vector.shape_cast %113 : vector<16x256xf32> to vector<1x16x256xf32>
    %cst_39 = arith.constant dense<0.000000e+00> : vector<1xf32>
    %115 = vector.multi_reduction <add>, %114, %cst_39 [1, 2] : vector<1x16x256xf32> to vector<1xf32>
    %116 = vector.shape_cast %115 : vector<1xf32> to vector<1x1x1xf32>
    %117 = vector.extract %116[0, 0, 0] : f32 from vector<1x1x1xf32>
    %118 = vector.broadcast %117 : f32 to vector<1x1xf32>
    %cst_40 = arith.constant 2.048000e+03 : f32
    %119 = vector.broadcast %cst_40 : f32 to vector<1x1xf32>
    %120 = arith.divf %118, %119 : vector<1x1xf32>
    %121 = arith.mulf %110, %110 : vector<16x256xf32>
    %122 = vector.broadcast %83 : vector<16x1xf32> to vector<16x256xf32>
    %123 = arith.mulf %121, %122 : vector<16x256xf32>
    %124 = vector.shape_cast %123 : vector<16x256xf32> to vector<1x16x256xf32>
    %cst_41 = arith.constant dense<0.000000e+00> : vector<1xf32>
    %125 = vector.multi_reduction <add>, %124, %cst_41 [1, 2] : vector<1x16x256xf32> to vector<1xf32>
    %126 = vector.shape_cast %125 : vector<1xf32> to vector<1x1x1xf32>
    %127 = vector.extract %126[0, 0, 0] : f32 from vector<1x1x1xf32>
    %128 = vector.broadcast %127 : f32 to vector<1x1xf32>
    %cst_42 = arith.constant 2.048000e+03 : f32
    %129 = vector.broadcast %cst_42 : f32 to vector<1x1xf32>
    %130 = arith.divf %128, %129 : vector<1x1xf32>
    %cst_43 = arith.constant 9.99999974E-6 : f32
    %131 = vector.broadcast %cst_43 : f32 to vector<1x1xf32>
    %132 = arith.addf %120, %131 : vector<1x1xf32>
    %133 = math.rsqrt %132 : vector<1x1xf32>
    %134 = vector.broadcast %133 : vector<1x1xf32> to vector<16x1xf32>
    %135 = arith.mulf %85, %134 : vector<16x1xf32>
    %cst_44 = arith.constant 9.99999974E-6 : f32
    %136 = vector.broadcast %cst_44 : f32 to vector<1x1xf32>
    %137 = arith.addf %130, %136 : vector<1x1xf32>
    %138 = math.rsqrt %137 : vector<1x1xf32>
    %139 = vector.broadcast %138 : vector<1x1xf32> to vector<16x1xf32>
    %140 = arith.mulf %83, %139 : vector<16x1xf32>
    %141 = arith.addf %135, %140 : vector<16x1xf32>
    %142 = vector.broadcast %141 : vector<16x1xf32> to vector<16x256xf32>
    %143 = arith.mulf %110, %142 : vector<16x256xf32>
    %144 = vector.broadcast %79 : vector<16x1xf32> to vector<16x256xf32>
    %145 = arith.mulf %143, %144 : vector<16x256xf32>
    %146 = vector.broadcast %81 : vector<16x1xf32> to vector<16x256xf32>
    %147 = arith.addf %145, %146 : vector<16x256xf32>
    %c0_45 = arith.constant 0 : index
    %c0_46 = arith.constant 0 : index
    %c0_47 = arith.constant 0 : index
    %148 = vector.load %arg7[%c0_45, %c0_46, %c0_47] : memref<9x256x256xbf16, #tpu.memory_space<vmem>>, vector<1x256x256xbf16>
    %149 = vector.shape_cast %148 : vector<1x256x256xbf16> to vector<256x256xbf16>
    %cst_48 = arith.constant dense<0.000000e+00> : vector<8x256xf32>
    %150 = tpu.matmul %75, %149, %cst_48 {dimension_numbers = #tpu.dot_dimension_numbers<[1], [0], [0], [1], [0, 0, 1, 1], [], []>} : vector<8x256xbf16>, vector<256x256xbf16>, vector<8x256xf32> -> vector<8x256xf32>
    %151 = arith.truncf %150 : vector<8x256xf32> to vector<8x256xbf16>
    %c0_49 = arith.constant 0 : index
    %c0_50 = arith.constant 0 : index
    %c0_51 = arith.constant 0 : index
    %152 = vector.load %arg3[%c0_49, %c0_50, %c0_51] : memref<9x16x8xbf16, #tpu.memory_space<vmem>>, vector<1x16x8xbf16>
    %153 = vector.shape_cast %152 : vector<1x16x8xbf16> to vector<16x8xbf16>
    %cst_52 = arith.constant dense<0.000000e+00> : vector<16x256xf32>
    %154 = tpu.matmul %153, %151, %cst_52 {dimension_numbers = #tpu.dot_dimension_numbers<[1], [0], [0], [1], [0, 0, 1, 1], [], []>} : vector<16x8xbf16>, vector<8x256xbf16>, vector<16x256xf32> -> vector<16x256xf32>
    %c0_53 = arith.constant 0 : index
    %c0_54 = arith.constant 0 : index
    %c0_55 = arith.constant 0 : index
    %155 = vector.load %arg5[%c0_53, %c0_54, %c0_55] : memref<9x16x8xbf16, #tpu.memory_space<vmem>>, vector<1x16x8xbf16>
    %156 = vector.shape_cast %155 : vector<1x16x8xbf16> to vector<16x8xbf16>
    %cst_56 = arith.constant dense<0.000000e+00> : vector<16x256xf32>
    %157 = tpu.matmul %156, %151, %cst_56 {dimension_numbers = #tpu.dot_dimension_numbers<[1], [0], [0], [1], [0, 0, 1, 1], [], []>} : vector<16x8xbf16>, vector<8x256xbf16>, vector<16x256xf32> -> vector<16x256xf32>
    %c1_57 = arith.constant 1 : index
    %c0_58 = arith.constant 0 : index
    %c0_59 = arith.constant 0 : index
    %158 = vector.load %arg7[%c1_57, %c0_58, %c0_59] : memref<9x256x256xbf16, #tpu.memory_space<vmem>>, vector<1x256x256xbf16>
    %159 = vector.shape_cast %158 : vector<1x256x256xbf16> to vector<256x256xbf16>
    %cst_60 = arith.constant dense<0.000000e+00> : vector<8x256xf32>
    %160 = tpu.matmul %75, %159, %cst_60 {dimension_numbers = #tpu.dot_dimension_numbers<[1], [0], [0], [1], [0, 0, 1, 1], [], []>} : vector<8x256xbf16>, vector<256x256xbf16>, vector<8x256xf32> -> vector<8x256xf32>
    %161 = arith.truncf %160 : vector<8x256xf32> to vector<8x256xbf16>
    %c1_61 = arith.constant 1 : index
    %c0_62 = arith.constant 0 : index
    %c0_63 = arith.constant 0 : index
    %162 = vector.load %arg3[%c1_61, %c0_62, %c0_63] : memref<9x16x8xbf16, #tpu.memory_space<vmem>>, vector<1x16x8xbf16>
    %163 = vector.shape_cast %162 : vector<1x16x8xbf16> to vector<16x8xbf16>
    %cst_64 = arith.constant dense<0.000000e+00> : vector<16x256xf32>
    %164 = tpu.matmul %163, %161, %cst_64 {dimension_numbers = #tpu.dot_dimension_numbers<[1], [0], [0], [1], [0, 0, 1, 1], [], []>} : vector<16x8xbf16>, vector<8x256xbf16>, vector<16x256xf32> -> vector<16x256xf32>
    %c1_65 = arith.constant 1 : index
    %c0_66 = arith.constant 0 : index
    %c0_67 = arith.constant 0 : index
    %165 = vector.load %arg5[%c1_65, %c0_66, %c0_67] : memref<9x16x8xbf16, #tpu.memory_space<vmem>>, vector<1x16x8xbf16>
    %166 = vector.shape_cast %165 : vector<1x16x8xbf16> to vector<16x8xbf16>
    %cst_68 = arith.constant dense<0.000000e+00> : vector<16x256xf32>
    %167 = tpu.matmul %166, %161, %cst_68 {dimension_numbers = #tpu.dot_dimension_numbers<[1], [0], [0], [1], [0, 0, 1, 1], [], []>} : vector<16x8xbf16>, vector<8x256xbf16>, vector<16x256xf32> -> vector<16x256xf32>
    %168 = arith.addf %154, %164 : vector<16x256xf32>
    %169 = arith.addf %157, %167 : vector<16x256xf32>
    %c2_69 = arith.constant 2 : index
    %c0_70 = arith.constant 0 : index
    %c0_71 = arith.constant 0 : index
    %170 = vector.load %arg7[%c2_69, %c0_70, %c0_71] : memref<9x256x256xbf16, #tpu.memory_space<vmem>>, vector<1x256x256xbf16>
    %171 = vector.shape_cast %170 : vector<1x256x256xbf16> to vector<256x256xbf16>
    %cst_72 = arith.constant dense<0.000000e+00> : vector<8x256xf32>
    %172 = tpu.matmul %75, %171, %cst_72 {dimension_numbers = #tpu.dot_dimension_numbers<[1], [0], [0], [1], [0, 0, 1, 1], [], []>} : vector<8x256xbf16>, vector<256x256xbf16>, vector<8x256xf32> -> vector<8x256xf32>
    %173 = arith.truncf %172 : vector<8x256xf32> to vector<8x256xbf16>
    %c2_73 = arith.constant 2 : index
    %c0_74 = arith.constant 0 : index
    %c0_75 = arith.constant 0 : index
    %174 = vector.load %arg3[%c2_73, %c0_74, %c0_75] : memref<9x16x8xbf16, #tpu.memory_space<vmem>>, vector<1x16x8xbf16>
    %175 = vector.shape_cast %174 : vector<1x16x8xbf16> to vector<16x8xbf16>
    %cst_76 = arith.constant dense<0.000000e+00> : vector<16x256xf32>
    %176 = tpu.matmul %175, %173, %cst_76 {dimension_numbers = #tpu.dot_dimension_numbers<[1], [0], [0], [1], [0, 0, 1, 1], [], []>} : vector<16x8xbf16>, vector<8x256xbf16>, vector<16x256xf32> -> vector<16x256xf32>
    %c2_77 = arith.constant 2 : index
    %c0_78 = arith.constant 0 : index
    %c0_79 = arith.constant 0 : index
    %177 = vector.load %arg5[%c2_77, %c0_78, %c0_79] : memref<9x16x8xbf16, #tpu.memory_space<vmem>>, vector<1x16x8xbf16>
    %178 = vector.shape_cast %177 : vector<1x16x8xbf16> to vector<16x8xbf16>
    %cst_80 = arith.constant dense<0.000000e+00> : vector<16x256xf32>
    %179 = tpu.matmul %178, %173, %cst_80 {dimension_numbers = #tpu.dot_dimension_numbers<[1], [0], [0], [1], [0, 0, 1, 1], [], []>} : vector<16x8xbf16>, vector<8x256xbf16>, vector<16x256xf32> -> vector<16x256xf32>
    %180 = arith.addf %168, %176 : vector<16x256xf32>
    %181 = arith.addf %169, %179 : vector<16x256xf32>
    %c3 = arith.constant 3 : index
    %c0_81 = arith.constant 0 : index
    %c0_82 = arith.constant 0 : index
    %182 = vector.load %arg7[%c3, %c0_81, %c0_82] : memref<9x256x256xbf16, #tpu.memory_space<vmem>>, vector<1x256x256xbf16>
    %183 = vector.shape_cast %182 : vector<1x256x256xbf16> to vector<256x256xbf16>
    %cst_83 = arith.constant dense<0.000000e+00> : vector<8x256xf32>
    %184 = tpu.matmul %75, %183, %cst_83 {dimension_numbers = #tpu.dot_dimension_numbers<[1], [0], [0], [1], [0, 0, 1, 1], [], []>} : vector<8x256xbf16>, vector<256x256xbf16>, vector<8x256xf32> -> vector<8x256xf32>
    %185 = arith.truncf %184 : vector<8x256xf32> to vector<8x256xbf16>
    %c3_84 = arith.constant 3 : index
    %c0_85 = arith.constant 0 : index
    %c0_86 = arith.constant 0 : index
    %186 = vector.load %arg3[%c3_84, %c0_85, %c0_86] : memref<9x16x8xbf16, #tpu.memory_space<vmem>>, vector<1x16x8xbf16>
    %187 = vector.shape_cast %186 : vector<1x16x8xbf16> to vector<16x8xbf16>
    %cst_87 = arith.constant dense<0.000000e+00> : vector<16x256xf32>
    %188 = tpu.matmul %187, %185, %cst_87 {dimension_numbers = #tpu.dot_dimension_numbers<[1], [0], [0], [1], [0, 0, 1, 1], [], []>} : vector<16x8xbf16>, vector<8x256xbf16>, vector<16x256xf32> -> vector<16x256xf32>
    %c3_88 = arith.constant 3 : index
    %c0_89 = arith.constant 0 : index
    %c0_90 = arith.constant 0 : index
    %189 = vector.load %arg5[%c3_88, %c0_89, %c0_90] : memref<9x16x8xbf16, #tpu.memory_space<vmem>>, vector<1x16x8xbf16>
    %190 = vector.shape_cast %189 : vector<1x16x8xbf16> to vector<16x8xbf16>
    %cst_91 = arith.constant dense<0.000000e+00> : vector<16x256xf32>
    %191 = tpu.matmul %190, %185, %cst_91 {dimension_numbers = #tpu.dot_dimension_numbers<[1], [0], [0], [1], [0, 0, 1, 1], [], []>} : vector<16x8xbf16>, vector<8x256xbf16>, vector<16x256xf32> -> vector<16x256xf32>
    %192 = arith.addf %180, %188 : vector<16x256xf32>
    %193 = arith.addf %181, %191 : vector<16x256xf32>
    %c4 = arith.constant 4 : index
    %c0_92 = arith.constant 0 : index
    %c0_93 = arith.constant 0 : index
    %194 = vector.load %arg7[%c4, %c0_92, %c0_93] : memref<9x256x256xbf16, #tpu.memory_space<vmem>>, vector<1x256x256xbf16>
    %195 = vector.shape_cast %194 : vector<1x256x256xbf16> to vector<256x256xbf16>
    %cst_94 = arith.constant dense<0.000000e+00> : vector<8x256xf32>
    %196 = tpu.matmul %75, %195, %cst_94 {dimension_numbers = #tpu.dot_dimension_numbers<[1], [0], [0], [1], [0, 0, 1, 1], [], []>} : vector<8x256xbf16>, vector<256x256xbf16>, vector<8x256xf32> -> vector<8x256xf32>
    %197 = arith.truncf %196 : vector<8x256xf32> to vector<8x256xbf16>
    %c4_95 = arith.constant 4 : index
    %c0_96 = arith.constant 0 : index
    %c0_97 = arith.constant 0 : index
    %198 = vector.load %arg3[%c4_95, %c0_96, %c0_97] : memref<9x16x8xbf16, #tpu.memory_space<vmem>>, vector<1x16x8xbf16>
    %199 = vector.shape_cast %198 : vector<1x16x8xbf16> to vector<16x8xbf16>
    %cst_98 = arith.constant dense<0.000000e+00> : vector<16x256xf32>
    %200 = tpu.matmul %199, %197, %cst_98 {dimension_numbers = #tpu.dot_dimension_numbers<[1], [0], [0], [1], [0, 0, 1, 1], [], []>} : vector<16x8xbf16>, vector<8x256xbf16>, vector<16x256xf32> -> vector<16x256xf32>
    %c4_99 = arith.constant 4 : index
    %c0_100 = arith.constant 0 : index
    %c0_101 = arith.constant 0 : index
    %201 = vector.load %arg5[%c4_99, %c0_100, %c0_101] : memref<9x16x8xbf16, #tpu.memory_space<vmem>>, vector<1x16x8xbf16>
    %202 = vector.shape_cast %201 : vector<1x16x8xbf16> to vector<16x8xbf16>
    %cst_102 = arith.constant dense<0.000000e+00> : vector<16x256xf32>
    %203 = tpu.matmul %202, %197, %cst_102 {dimension_numbers = #tpu.dot_dimension_numbers<[1], [0], [0], [1], [0, 0, 1, 1], [], []>} : vector<16x8xbf16>, vector<8x256xbf16>, vector<16x256xf32> -> vector<16x256xf32>
    %204 = arith.addf %192, %200 : vector<16x256xf32>
    %205 = arith.addf %193, %203 : vector<16x256xf32>
    %c5 = arith.constant 5 : index
    %c0_103 = arith.constant 0 : index
    %c0_104 = arith.constant 0 : index
    %206 = vector.load %arg7[%c5, %c0_103, %c0_104] : memref<9x256x256xbf16, #tpu.memory_space<vmem>>, vector<1x256x256xbf16>
    %207 = vector.shape_cast %206 : vector<1x256x256xbf16> to vector<256x256xbf16>
    %cst_105 = arith.constant dense<0.000000e+00> : vector<8x256xf32>
    %208 = tpu.matmul %75, %207, %cst_105 {dimension_numbers = #tpu.dot_dimension_numbers<[1], [0], [0], [1], [0, 0, 1, 1], [], []>} : vector<8x256xbf16>, vector<256x256xbf16>, vector<8x256xf32> -> vector<8x256xf32>
    %209 = arith.truncf %208 : vector<8x256xf32> to vector<8x256xbf16>
    %c5_106 = arith.constant 5 : index
    %c0_107 = arith.constant 0 : index
    %c0_108 = arith.constant 0 : index
    %210 = vector.load %arg3[%c5_106, %c0_107, %c0_108] : memref<9x16x8xbf16, #tpu.memory_space<vmem>>, vector<1x16x8xbf16>
    %211 = vector.shape_cast %210 : vector<1x16x8xbf16> to vector<16x8xbf16>
    %cst_109 = arith.constant dense<0.000000e+00> : vector<16x256xf32>
    %212 = tpu.matmul %211, %209, %cst_109 {dimension_numbers = #tpu.dot_dimension_numbers<[1], [0], [0], [1], [0, 0, 1, 1], [], []>} : vector<16x8xbf16>, vector<8x256xbf16>, vector<16x256xf32> -> vector<16x256xf32>
    %c5_110 = arith.constant 5 : index
    %c0_111 = arith.constant 0 : index
    %c0_112 = arith.constant 0 : index
    %213 = vector.load %arg5[%c5_110, %c0_111, %c0_112] : memref<9x16x8xbf16, #tpu.memory_space<vmem>>, vector<1x16x8xbf16>
    %214 = vector.shape_cast %213 : vector<1x16x8xbf16> to vector<16x8xbf16>
    %cst_113 = arith.constant dense<0.000000e+00> : vector<16x256xf32>
    %215 = tpu.matmul %214, %209, %cst_113 {dimension_numbers = #tpu.dot_dimension_numbers<[1], [0], [0], [1], [0, 0, 1, 1], [], []>} : vector<16x8xbf16>, vector<8x256xbf16>, vector<16x256xf32> -> vector<16x256xf32>
    %216 = arith.addf %204, %212 : vector<16x256xf32>
    %217 = arith.addf %205, %215 : vector<16x256xf32>
    %c6 = arith.constant 6 : index
    %c0_114 = arith.constant 0 : index
    %c0_115 = arith.constant 0 : index
    %218 = vector.load %arg7[%c6, %c0_114, %c0_115] : memref<9x256x256xbf16, #tpu.memory_space<vmem>>, vector<1x256x256xbf16>
    %219 = vector.shape_cast %218 : vector<1x256x256xbf16> to vector<256x256xbf16>
    %cst_116 = arith.constant dense<0.000000e+00> : vector<8x256xf32>
    %220 = tpu.matmul %75, %219, %cst_116 {dimension_numbers = #tpu.dot_dimension_numbers<[1], [0], [0], [1], [0, 0, 1, 1], [], []>} : vector<8x256xbf16>, vector<256x256xbf16>, vector<8x256xf32> -> vector<8x256xf32>
    %221 = arith.truncf %220 : vector<8x256xf32> to vector<8x256xbf16>
    %c6_117 = arith.constant 6 : index
    %c0_118 = arith.constant 0 : index
    %c0_119 = arith.constant 0 : index
    %222 = vector.load %arg3[%c6_117, %c0_118, %c0_119] : memref<9x16x8xbf16, #tpu.memory_space<vmem>>, vector<1x16x8xbf16>
    %223 = vector.shape_cast %222 : vector<1x16x8xbf16> to vector<16x8xbf16>
    %cst_120 = arith.constant dense<0.000000e+00> : vector<16x256xf32>
    %224 = tpu.matmul %223, %221, %cst_120 {dimension_numbers = #tpu.dot_dimension_numbers<[1], [0], [0], [1], [0, 0, 1, 1], [], []>} : vector<16x8xbf16>, vector<8x256xbf16>, vector<16x256xf32> -> vector<16x256xf32>
    %c6_121 = arith.constant 6 : index
    %c0_122 = arith.constant 0 : index
    %c0_123 = arith.constant 0 : index
    %225 = vector.load %arg5[%c6_121, %c0_122, %c0_123] : memref<9x16x8xbf16, #tpu.memory_space<vmem>>, vector<1x16x8xbf16>
    %226 = vector.shape_cast %225 : vector<1x16x8xbf16> to vector<16x8xbf16>
    %cst_124 = arith.constant dense<0.000000e+00> : vector<16x256xf32>
    %227 = tpu.matmul %226, %221, %cst_124 {dimension_numbers = #tpu.dot_dimension_numbers<[1], [0], [0], [1], [0, 0, 1, 1], [], []>} : vector<16x8xbf16>, vector<8x256xbf16>, vector<16x256xf32> -> vector<16x256xf32>
    %228 = arith.addf %216, %224 : vector<16x256xf32>
    %229 = arith.addf %217, %227 : vector<16x256xf32>
    %c7 = arith.constant 7 : index
    %c0_125 = arith.constant 0 : index
    %c0_126 = arith.constant 0 : index
    %230 = vector.load %arg7[%c7, %c0_125, %c0_126] : memref<9x256x256xbf16, #tpu.memory_space<vmem>>, vector<1x256x256xbf16>
    %231 = vector.shape_cast %230 : vector<1x256x256xbf16> to vector<256x256xbf16>
    %cst_127 = arith.constant dense<0.000000e+00> : vector<8x256xf32>
    %232 = tpu.matmul %75, %231, %cst_127 {dimension_numbers = #tpu.dot_dimension_numbers<[1], [0], [0], [1], [0, 0, 1, 1], [], []>} : vector<8x256xbf16>, vector<256x256xbf16>, vector<8x256xf32> -> vector<8x256xf32>
    %233 = arith.truncf %232 : vector<8x256xf32> to vector<8x256xbf16>
    %c7_128 = arith.constant 7 : index
    %c0_129 = arith.constant 0 : index
    %c0_130 = arith.constant 0 : index
    %234 = vector.load %arg3[%c7_128, %c0_129, %c0_130] : memref<9x16x8xbf16, #tpu.memory_space<vmem>>, vector<1x16x8xbf16>
    %235 = vector.shape_cast %234 : vector<1x16x8xbf16> to vector<16x8xbf16>
    %cst_131 = arith.constant dense<0.000000e+00> : vector<16x256xf32>
    %236 = tpu.matmul %235, %233, %cst_131 {dimension_numbers = #tpu.dot_dimension_numbers<[1], [0], [0], [1], [0, 0, 1, 1], [], []>} : vector<16x8xbf16>, vector<8x256xbf16>, vector<16x256xf32> -> vector<16x256xf32>
    %c7_132 = arith.constant 7 : index
    %c0_133 = arith.constant 0 : index
    %c0_134 = arith.constant 0 : index
    %237 = vector.load %arg5[%c7_132, %c0_133, %c0_134] : memref<9x16x8xbf16, #tpu.memory_space<vmem>>, vector<1x16x8xbf16>
    %238 = vector.shape_cast %237 : vector<1x16x8xbf16> to vector<16x8xbf16>
    %cst_135 = arith.constant dense<0.000000e+00> : vector<16x256xf32>
    %239 = tpu.matmul %238, %233, %cst_135 {dimension_numbers = #tpu.dot_dimension_numbers<[1], [0], [0], [1], [0, 0, 1, 1], [], []>} : vector<16x8xbf16>, vector<8x256xbf16>, vector<16x256xf32> -> vector<16x256xf32>
    %240 = arith.addf %228, %236 : vector<16x256xf32>
    %241 = arith.addf %229, %239 : vector<16x256xf32>
    %c8 = arith.constant 8 : index
    %c0_136 = arith.constant 0 : index
    %c0_137 = arith.constant 0 : index
    %242 = vector.load %arg7[%c8, %c0_136, %c0_137] : memref<9x256x256xbf16, #tpu.memory_space<vmem>>, vector<1x256x256xbf16>
    %243 = vector.shape_cast %242 : vector<1x256x256xbf16> to vector<256x256xbf16>
    %cst_138 = arith.constant dense<0.000000e+00> : vector<8x256xf32>
    %244 = tpu.matmul %75, %243, %cst_138 {dimension_numbers = #tpu.dot_dimension_numbers<[1], [0], [0], [1], [0, 0, 1, 1], [], []>} : vector<8x256xbf16>, vector<256x256xbf16>, vector<8x256xf32> -> vector<8x256xf32>
    %245 = arith.truncf %244 : vector<8x256xf32> to vector<8x256xbf16>
    %c8_139 = arith.constant 8 : index
    %c0_140 = arith.constant 0 : index
    %c0_141 = arith.constant 0 : index
    %246 = vector.load %arg3[%c8_139, %c0_140, %c0_141] : memref<9x16x8xbf16, #tpu.memory_space<vmem>>, vector<1x16x8xbf16>
    %247 = vector.shape_cast %246 : vector<1x16x8xbf16> to vector<16x8xbf16>
    %cst_142 = arith.constant dense<0.000000e+00> : vector<16x256xf32>
    %248 = tpu.matmul %247, %245, %cst_142 {dimension_numbers = #tpu.dot_dimension_numbers<[1], [0], [0], [1], [0, 0, 1, 1], [], []>} : vector<16x8xbf16>, vector<8x256xbf16>, vector<16x256xf32> -> vector<16x256xf32>
    %c8_143 = arith.constant 8 : index
    %c0_144 = arith.constant 0 : index
    %c0_145 = arith.constant 0 : index
    %249 = vector.load %arg5[%c8_143, %c0_144, %c0_145] : memref<9x16x8xbf16, #tpu.memory_space<vmem>>, vector<1x16x8xbf16>
    %250 = vector.shape_cast %249 : vector<1x16x8xbf16> to vector<16x8xbf16>
    %cst_146 = arith.constant dense<0.000000e+00> : vector<16x256xf32>
    %251 = tpu.matmul %250, %245, %cst_146 {dimension_numbers = #tpu.dot_dimension_numbers<[1], [0], [0], [1], [0, 0, 1, 1], [], []>} : vector<16x8xbf16>, vector<8x256xbf16>, vector<16x256xf32> -> vector<16x256xf32>
    %252 = arith.addf %240, %248 : vector<16x256xf32>
    %253 = arith.addf %241, %251 : vector<16x256xf32>
    %c0_147 = arith.constant 0 : index
    %c0_148 = arith.constant 0 : index
    %c0_149 = arith.constant 0 : index
    %254 = vector.load %arg9[%c0_147, %c0_148, %c0_149] : memref<3x16x1xf32, #tpu.memory_space<vmem>>, vector<1x16x1xf32>
    %255 = vector.shape_cast %254 : vector<1x16x1xf32> to vector<16x1xf32>
    %c1_150 = arith.constant 1 : index
    %c0_151 = arith.constant 0 : index
    %c0_152 = arith.constant 0 : index
    %256 = vector.load %arg9[%c1_150, %c0_151, %c0_152] : memref<3x16x1xf32, #tpu.memory_space<vmem>>, vector<1x16x1xf32>
    %257 = vector.shape_cast %256 : vector<1x16x1xf32> to vector<16x1xf32>
    %c2_153 = arith.constant 2 : index
    %c0_154 = arith.constant 0 : index
    %c0_155 = arith.constant 0 : index
    %258 = vector.load %arg9[%c2_153, %c0_154, %c0_155] : memref<3x16x1xf32, #tpu.memory_space<vmem>>, vector<1x16x1xf32>
    %259 = vector.shape_cast %258 : vector<1x16x1xf32> to vector<16x1xf32>
    %cst_156 = arith.constant 1.000000e+00 : f32
    %260 = vector.broadcast %cst_156 : f32 to vector<16x1xf32>
    %261 = arith.subf %260, %259 : vector<16x1xf32>
    %262 = vector.broadcast %261 : vector<16x1xf32> to vector<16x256xf32>
    %263 = arith.mulf %252, %262 : vector<16x256xf32>
    %264 = vector.shape_cast %263 : vector<16x256xf32> to vector<1x16x256xf32>
    %cst_157 = arith.constant dense<0.000000e+00> : vector<1xf32>
    %265 = vector.multi_reduction <add>, %264, %cst_157 [1, 2] : vector<1x16x256xf32> to vector<1xf32>
    %266 = vector.shape_cast %265 : vector<1xf32> to vector<1x1x1xf32>
    %267 = vector.extract %266[0, 0, 0] : f32 from vector<1x1x1xf32>
    %268 = vector.broadcast %267 : f32 to vector<1x1xf32>
    %cst_158 = arith.constant 2.048000e+03 : f32
    %269 = vector.broadcast %cst_158 : f32 to vector<1x1xf32>
    %270 = arith.divf %268, %269 : vector<1x1xf32>
    %271 = vector.broadcast %259 : vector<16x1xf32> to vector<16x256xf32>
    %272 = arith.mulf %252, %271 : vector<16x256xf32>
    %273 = vector.shape_cast %272 : vector<16x256xf32> to vector<1x16x256xf32>
    %cst_159 = arith.constant dense<0.000000e+00> : vector<1xf32>
    %274 = vector.multi_reduction <add>, %273, %cst_159 [1, 2] : vector<1x16x256xf32> to vector<1xf32>
    %275 = vector.shape_cast %274 : vector<1xf32> to vector<1x1x1xf32>
    %276 = vector.extract %275[0, 0, 0] : f32 from vector<1x1x1xf32>
    %277 = vector.broadcast %276 : f32 to vector<1x1xf32>
    %cst_160 = arith.constant 2.048000e+03 : f32
    %278 = vector.broadcast %cst_160 : f32 to vector<1x1xf32>
    %279 = arith.divf %277, %278 : vector<1x1xf32>
    %280 = vector.broadcast %270 : vector<1x1xf32> to vector<16x1xf32>
    %281 = arith.mulf %261, %280 : vector<16x1xf32>
    %282 = vector.broadcast %279 : vector<1x1xf32> to vector<16x1xf32>
    %283 = arith.mulf %259, %282 : vector<16x1xf32>
    %284 = arith.addf %281, %283 : vector<16x1xf32>
    %285 = vector.broadcast %284 : vector<16x1xf32> to vector<16x256xf32>
    %286 = arith.subf %252, %285 : vector<16x256xf32>
    %287 = arith.mulf %286, %286 : vector<16x256xf32>
    %288 = vector.broadcast %261 : vector<16x1xf32> to vector<16x256xf32>
    %289 = arith.mulf %287, %288 : vector<16x256xf32>
    %290 = vector.shape_cast %289 : vector<16x256xf32> to vector<1x16x256xf32>
    %cst_161 = arith.constant dense<0.000000e+00> : vector<1xf32>
    %291 = vector.multi_reduction <add>, %290, %cst_161 [1, 2] : vector<1x16x256xf32> to vector<1xf32>
    %292 = vector.shape_cast %291 : vector<1xf32> to vector<1x1x1xf32>
    %293 = vector.extract %292[0, 0, 0] : f32 from vector<1x1x1xf32>
    %294 = vector.broadcast %293 : f32 to vector<1x1xf32>
    %cst_162 = arith.constant 2.048000e+03 : f32
    %295 = vector.broadcast %cst_162 : f32 to vector<1x1xf32>
    %296 = arith.divf %294, %295 : vector<1x1xf32>
    %297 = arith.mulf %286, %286 : vector<16x256xf32>
    %298 = vector.broadcast %259 : vector<16x1xf32> to vector<16x256xf32>
    %299 = arith.mulf %297, %298 : vector<16x256xf32>
    %300 = vector.shape_cast %299 : vector<16x256xf32> to vector<1x16x256xf32>
    %cst_163 = arith.constant dense<0.000000e+00> : vector<1xf32>
    %301 = vector.multi_reduction <add>, %300, %cst_163 [1, 2] : vector<1x16x256xf32> to vector<1xf32>
    %302 = vector.shape_cast %301 : vector<1xf32> to vector<1x1x1xf32>
    %303 = vector.extract %302[0, 0, 0] : f32 from vector<1x1x1xf32>
    %304 = vector.broadcast %303 : f32 to vector<1x1xf32>
    %cst_164 = arith.constant 2.048000e+03 : f32
    %305 = vector.broadcast %cst_164 : f32 to vector<1x1xf32>
    %306 = arith.divf %304, %305 : vector<1x1xf32>
    %cst_165 = arith.constant 9.99999974E-6 : f32
    %307 = vector.broadcast %cst_165 : f32 to vector<1x1xf32>
    %308 = arith.addf %296, %307 : vector<1x1xf32>
    %309 = math.rsqrt %308 : vector<1x1xf32>
    %310 = vector.broadcast %309 : vector<1x1xf32> to vector<16x1xf32>
    %311 = arith.mulf %261, %310 : vector<16x1xf32>
    %cst_166 = arith.constant 9.99999974E-6 : f32
    %312 = vector.broadcast %cst_166 : f32 to vector<1x1xf32>
    %313 = arith.addf %306, %312 : vector<1x1xf32>
    %314 = math.rsqrt %313 : vector<1x1xf32>
    %315 = vector.broadcast %314 : vector<1x1xf32> to vector<16x1xf32>
    %316 = arith.mulf %259, %315 : vector<16x1xf32>
    %317 = arith.addf %311, %316 : vector<16x1xf32>
    %318 = vector.broadcast %317 : vector<16x1xf32> to vector<16x256xf32>
    %319 = arith.mulf %286, %318 : vector<16x256xf32>
    %320 = vector.broadcast %255 : vector<16x1xf32> to vector<16x256xf32>
    %321 = arith.mulf %319, %320 : vector<16x256xf32>
    %322 = vector.broadcast %257 : vector<16x1xf32> to vector<16x256xf32>
    %323 = arith.addf %321, %322 : vector<16x256xf32>
    %c0_167 = arith.constant 0 : index
    %c0_168 = arith.constant 0 : index
    %c0_169 = arith.constant 0 : index
    %324 = vector.load %arg11[%c0_167, %c0_168, %c0_169] : memref<3x16x1xf32, #tpu.memory_space<vmem>>, vector<1x16x1xf32>
    %325 = vector.shape_cast %324 : vector<1x16x1xf32> to vector<16x1xf32>
    %c1_170 = arith.constant 1 : index
    %c0_171 = arith.constant 0 : index
    %c0_172 = arith.constant 0 : index
    %326 = vector.load %arg11[%c1_170, %c0_171, %c0_172] : memref<3x16x1xf32, #tpu.memory_space<vmem>>, vector<1x16x1xf32>
    %327 = vector.shape_cast %326 : vector<1x16x1xf32> to vector<16x1xf32>
    %c2_173 = arith.constant 2 : index
    %c0_174 = arith.constant 0 : index
    %c0_175 = arith.constant 0 : index
    %328 = vector.load %arg11[%c2_173, %c0_174, %c0_175] : memref<3x16x1xf32, #tpu.memory_space<vmem>>, vector<1x16x1xf32>
    %329 = vector.shape_cast %328 : vector<1x16x1xf32> to vector<16x1xf32>
    %cst_176 = arith.constant 1.000000e+00 : f32
    %330 = vector.broadcast %cst_176 : f32 to vector<16x1xf32>
    %331 = arith.subf %330, %329 : vector<16x1xf32>
    %332 = vector.broadcast %331 : vector<16x1xf32> to vector<16x256xf32>
    %333 = arith.mulf %253, %332 : vector<16x256xf32>
    %334 = vector.shape_cast %333 : vector<16x256xf32> to vector<1x16x256xf32>
    %cst_177 = arith.constant dense<0.000000e+00> : vector<1xf32>
    %335 = vector.multi_reduction <add>, %334, %cst_177 [1, 2] : vector<1x16x256xf32> to vector<1xf32>
    %336 = vector.shape_cast %335 : vector<1xf32> to vector<1x1x1xf32>
    %337 = vector.extract %336[0, 0, 0] : f32 from vector<1x1x1xf32>
    %338 = vector.broadcast %337 : f32 to vector<1x1xf32>
    %cst_178 = arith.constant 2.048000e+03 : f32
    %339 = vector.broadcast %cst_178 : f32 to vector<1x1xf32>
    %340 = arith.divf %338, %339 : vector<1x1xf32>
    %341 = vector.broadcast %329 : vector<16x1xf32> to vector<16x256xf32>
    %342 = arith.mulf %253, %341 : vector<16x256xf32>
    %343 = vector.shape_cast %342 : vector<16x256xf32> to vector<1x16x256xf32>
    %cst_179 = arith.constant dense<0.000000e+00> : vector<1xf32>
    %344 = vector.multi_reduction <add>, %343, %cst_179 [1, 2] : vector<1x16x256xf32> to vector<1xf32>
    %345 = vector.shape_cast %344 : vector<1xf32> to vector<1x1x1xf32>
    %346 = vector.extract %345[0, 0, 0] : f32 from vector<1x1x1xf32>
    %347 = vector.broadcast %346 : f32 to vector<1x1xf32>
    %cst_180 = arith.constant 2.048000e+03 : f32
    %348 = vector.broadcast %cst_180 : f32 to vector<1x1xf32>
    %349 = arith.divf %347, %348 : vector<1x1xf32>
    %350 = vector.broadcast %340 : vector<1x1xf32> to vector<16x1xf32>
    %351 = arith.mulf %331, %350 : vector<16x1xf32>
    %352 = vector.broadcast %349 : vector<1x1xf32> to vector<16x1xf32>
    %353 = arith.mulf %329, %352 : vector<16x1xf32>
    %354 = arith.addf %351, %353 : vector<16x1xf32>
    %355 = vector.broadcast %354 : vector<16x1xf32> to vector<16x256xf32>
    %356 = arith.subf %253, %355 : vector<16x256xf32>
    %357 = arith.mulf %356, %356 : vector<16x256xf32>
    %358 = vector.broadcast %331 : vector<16x1xf32> to vector<16x256xf32>
    %359 = arith.mulf %357, %358 : vector<16x256xf32>
    %360 = vector.shape_cast %359 : vector<16x256xf32> to vector<1x16x256xf32>
    %cst_181 = arith.constant dense<0.000000e+00> : vector<1xf32>
    %361 = vector.multi_reduction <add>, %360, %cst_181 [1, 2] : vector<1x16x256xf32> to vector<1xf32>
    %362 = vector.shape_cast %361 : vector<1xf32> to vector<1x1x1xf32>
    %363 = vector.extract %362[0, 0, 0] : f32 from vector<1x1x1xf32>
    %364 = vector.broadcast %363 : f32 to vector<1x1xf32>
    %cst_182 = arith.constant 2.048000e+03 : f32
    %365 = vector.broadcast %cst_182 : f32 to vector<1x1xf32>
    %366 = arith.divf %364, %365 : vector<1x1xf32>
    %367 = arith.mulf %356, %356 : vector<16x256xf32>
    %368 = vector.broadcast %329 : vector<16x1xf32> to vector<16x256xf32>
    %369 = arith.mulf %367, %368 : vector<16x256xf32>
    %370 = vector.shape_cast %369 : vector<16x256xf32> to vector<1x16x256xf32>
    %cst_183 = arith.constant dense<0.000000e+00> : vector<1xf32>
    %371 = vector.multi_reduction <add>, %370, %cst_183 [1, 2] : vector<1x16x256xf32> to vector<1xf32>
    %372 = vector.shape_cast %371 : vector<1xf32> to vector<1x1x1xf32>
    %373 = vector.extract %372[0, 0, 0] : f32 from vector<1x1x1xf32>
    %374 = vector.broadcast %373 : f32 to vector<1x1xf32>
    %cst_184 = arith.constant 2.048000e+03 : f32
    %375 = vector.broadcast %cst_184 : f32 to vector<1x1xf32>
    %376 = arith.divf %374, %375 : vector<1x1xf32>
    %cst_185 = arith.constant 9.99999974E-6 : f32
    %377 = vector.broadcast %cst_185 : f32 to vector<1x1xf32>
    %378 = arith.addf %366, %377 : vector<1x1xf32>
    %379 = math.rsqrt %378 : vector<1x1xf32>
    %380 = vector.broadcast %379 : vector<1x1xf32> to vector<16x1xf32>
    %381 = arith.mulf %331, %380 : vector<16x1xf32>
    %cst_186 = arith.constant 9.99999974E-6 : f32
    %382 = vector.broadcast %cst_186 : f32 to vector<1x1xf32>
    %383 = arith.addf %376, %382 : vector<1x1xf32>
    %384 = math.rsqrt %383 : vector<1x1xf32>
    %385 = vector.broadcast %384 : vector<1x1xf32> to vector<16x1xf32>
    %386 = arith.mulf %329, %385 : vector<16x1xf32>
    %387 = arith.addf %381, %386 : vector<16x1xf32>
    %388 = vector.broadcast %387 : vector<16x1xf32> to vector<16x256xf32>
    %389 = arith.mulf %356, %388 : vector<16x256xf32>
    %390 = vector.broadcast %325 : vector<16x1xf32> to vector<16x256xf32>
    %391 = arith.mulf %389, %390 : vector<16x256xf32>
    %392 = vector.broadcast %327 : vector<16x1xf32> to vector<16x256xf32>
    %393 = arith.addf %391, %392 : vector<16x256xf32>
    %394 = vector.extract_strided_slice %323 {offsets = [0, 0], sizes = [8, 256], strides = [1, 1]} : vector<16x256xf32> to vector<8x256xf32>
    %395 = arith.truncf %394 : vector<8x256xf32> to vector<8x256xbf16>
    %396 = vector.extract_strided_slice %147 {offsets = [0, 0], sizes = [8, 256], strides = [1, 1]} : vector<16x256xf32> to vector<8x256xf32>
    %397 = arith.truncf %396 : vector<8x256xf32> to vector<8x256xbf16>
    %398 = vector.extract_strided_slice %393 {offsets = [0, 0], sizes = [8, 256], strides = [1, 1]} : vector<16x256xf32> to vector<8x256xf32>
    %399 = arith.truncf %398 : vector<8x256xf32> to vector<8x256xbf16>
    %cst_187 = arith.constant dense<0.000000e+00> : vector<8x8xf32>
    %400 = tpu.matmul %395, %397, %cst_187 {dimension_numbers = #tpu.dot_dimension_numbers<[1], [1], [0], [0], [0, 0, 1, 0], [], []>} : vector<8x256xbf16>, vector<8x256xbf16>, vector<8x8xf32> -> vector<8x8xf32>
    %cst_188 = arith.constant 0.353553385 : f32
    %401 = vector.broadcast %cst_188 : f32 to vector<8x8xf32>
    %402 = arith.mulf %400, %401 : vector<8x8xf32>
    %cst_189 = arith.constant dense<0xFF800000> : vector<8xf32>
    %403 = vector.multi_reduction <maximumf>, %402, %cst_189 [1] : vector<8x8xf32> to vector<8xf32>
    %404 = vector.shape_cast %403 : vector<8xf32> to vector<8x1xf32>
    %405 = vector.broadcast %404 : vector<8x1xf32> to vector<8x8xf32>
    %406 = arith.subf %402, %405 : vector<8x8xf32>
    %407 = math.exp %406 : vector<8x8xf32>
    %cst_190 = arith.constant dense<0.000000e+00> : vector<8xf32>
    %408 = vector.multi_reduction <add>, %407, %cst_190 [1] : vector<8x8xf32> to vector<8xf32>
    %409 = vector.shape_cast %408 : vector<8xf32> to vector<8x1xf32>
    %410 = vector.broadcast %409 : vector<8x1xf32> to vector<8x8xf32>
    %411 = arith.divf %407, %410 : vector<8x8xf32>
    %412 = arith.truncf %411 : vector<8x8xf32> to vector<8x8xbf16>
    %cst_191 = arith.constant dense<0.000000e+00> : vector<8x256xf32>
    %413 = tpu.matmul %412, %399, %cst_191 {dimension_numbers = #tpu.dot_dimension_numbers<[1], [0], [0], [1], [0, 0, 1, 1], [], []>} : vector<8x8xbf16>, vector<8x256xbf16>, vector<8x256xf32> -> vector<8x256xf32>
    %414 = vector.extract_strided_slice %323 {offsets = [8, 0], sizes = [8, 256], strides = [1, 1]} : vector<16x256xf32> to vector<8x256xf32>
    %415 = arith.truncf %414 : vector<8x256xf32> to vector<8x256xbf16>
    %416 = vector.extract_strided_slice %147 {offsets = [8, 0], sizes = [8, 256], strides = [1, 1]} : vector<16x256xf32> to vector<8x256xf32>
    %417 = arith.truncf %416 : vector<8x256xf32> to vector<8x256xbf16>
    %418 = vector.extract_strided_slice %393 {offsets = [8, 0], sizes = [8, 256], strides = [1, 1]} : vector<16x256xf32> to vector<8x256xf32>
    %419 = arith.truncf %418 : vector<8x256xf32> to vector<8x256xbf16>
    %cst_192 = arith.constant dense<0.000000e+00> : vector<8x8xf32>
    %420 = tpu.matmul %415, %417, %cst_192 {dimension_numbers = #tpu.dot_dimension_numbers<[1], [1], [0], [0], [0, 0, 1, 0], [], []>} : vector<8x256xbf16>, vector<8x256xbf16>, vector<8x8xf32> -> vector<8x8xf32>
    %cst_193 = arith.constant 0.353553385 : f32
    %421 = vector.broadcast %cst_193 : f32 to vector<8x8xf32>
    %422 = arith.mulf %420, %421 : vector<8x8xf32>
    %cst_194 = arith.constant dense<0xFF800000> : vector<8xf32>
    %423 = vector.multi_reduction <maximumf>, %422, %cst_194 [1] : vector<8x8xf32> to vector<8xf32>
    %424 = vector.shape_cast %423 : vector<8xf32> to vector<8x1xf32>
    %425 = vector.broadcast %424 : vector<8x1xf32> to vector<8x8xf32>
    %426 = arith.subf %422, %425 : vector<8x8xf32>
    %427 = math.exp %426 : vector<8x8xf32>
    %cst_195 = arith.constant dense<0.000000e+00> : vector<8xf32>
    %428 = vector.multi_reduction <add>, %427, %cst_195 [1] : vector<8x8xf32> to vector<8xf32>
    %429 = vector.shape_cast %428 : vector<8xf32> to vector<8x1xf32>
    %430 = vector.broadcast %429 : vector<8x1xf32> to vector<8x8xf32>
    %431 = arith.divf %427, %430 : vector<8x8xf32>
    %432 = arith.truncf %431 : vector<8x8xf32> to vector<8x8xbf16>
    %cst_196 = arith.constant dense<0.000000e+00> : vector<8x256xf32>
    %433 = tpu.matmul %432, %419, %cst_196 {dimension_numbers = #tpu.dot_dimension_numbers<[1], [0], [0], [1], [0, 0, 1, 1], [], []>} : vector<8x8xbf16>, vector<8x256xbf16>, vector<8x256xf32> -> vector<8x256xf32>
    %434 = tpu.concatenate %413, %433 in 0 : vector<8x256xf32>, vector<8x256xf32> -> vector<16x256xf32>
    %435 = vector.shape_cast %434 : vector<16x256xf32> to vector<16x16x16xf32>
    %cst_197 = arith.constant dense<0xFF800000> : vector<16x16xf32>
    %436 = vector.multi_reduction <maximumf>, %435, %cst_197 [2] : vector<16x16x16xf32> to vector<16x16xf32>
    %437 = vector.shape_cast %436 : vector<16x16xf32> to vector<16x16x1xf32>
    %438 = vector.broadcast %437 : vector<16x16x1xf32> to vector<16x16x16xf32>
    %439 = arith.subf %435, %438 : vector<16x16x16xf32>
    %440 = math.exp %439 : vector<16x16x16xf32>
    %cst_198 = arith.constant dense<0.000000e+00> : vector<16x16xf32>
    %441 = vector.multi_reduction <add>, %440, %cst_198 [2] : vector<16x16x16xf32> to vector<16x16xf32>
    %442 = vector.shape_cast %441 : vector<16x16xf32> to vector<16x16x1xf32>
    %443 = vector.broadcast %442 : vector<16x16x1xf32> to vector<16x16x16xf32>
    %444 = arith.divf %440, %443 : vector<16x16x16xf32>
    %cst_199 = arith.constant 2.000000e+00 : f32
    %445 = vector.broadcast %cst_199 : f32 to vector<16x16x16xf32>
    %446 = arith.mulf %445, %435 : vector<16x16x16xf32>
    %447 = arith.mulf %446, %444 : vector<16x16x16xf32>
    %448 = arith.addf %435, %447 : vector<16x16x16xf32>
    %449 = vector.shape_cast %448 : vector<16x16x16xf32> to vector<16x256xf32>
    %c0_200 = arith.constant 0 : index
    %c0_201 = arith.constant 0 : index
    %450 = vector.load %arg6[%c0_200, %c0_201] : memref<64x16xbf16, #tpu.memory_space<vmem>>, vector<64x16xbf16>
    %451 = arith.truncf %449 : vector<16x256xf32> to vector<16x256xbf16>
    %cst_202 = arith.constant dense<0.000000e+00> : vector<64x256xf32>
    %452 = tpu.matmul %450, %451, %cst_202 {dimension_numbers = #tpu.dot_dimension_numbers<[1], [0], [0], [1], [0, 0, 1, 1], [], []>} : vector<64x16xbf16>, vector<16x256xbf16>, vector<64x256xf32> -> vector<64x256xf32>
    %c0_203 = arith.constant 0 : index
    %c0_204 = arith.constant 0 : index
    %c0_205 = arith.constant 0 : index
    %453 = vector.load %arg12[%c0_203, %c0_204, %c0_205] : memref<3x64x1xf32, #tpu.memory_space<vmem>>, vector<1x64x1xf32>
    %454 = vector.shape_cast %453 : vector<1x64x1xf32> to vector<64x1xf32>
    %c1_206 = arith.constant 1 : index
    %c0_207 = arith.constant 0 : index
    %c0_208 = arith.constant 0 : index
    %455 = vector.load %arg12[%c1_206, %c0_207, %c0_208] : memref<3x64x1xf32, #tpu.memory_space<vmem>>, vector<1x64x1xf32>
    %456 = vector.shape_cast %455 : vector<1x64x1xf32> to vector<64x1xf32>
    %c2_209 = arith.constant 2 : index
    %c0_210 = arith.constant 0 : index
    %c0_211 = arith.constant 0 : index
    %457 = vector.load %arg12[%c2_209, %c0_210, %c0_211] : memref<3x64x1xf32, #tpu.memory_space<vmem>>, vector<1x64x1xf32>
    %458 = vector.shape_cast %457 : vector<1x64x1xf32> to vector<64x1xf32>
    %cst_212 = arith.constant 1.000000e+00 : f32
    %459 = vector.broadcast %cst_212 : f32 to vector<64x1xf32>
    %460 = arith.subf %459, %458 : vector<64x1xf32>
    %461 = vector.broadcast %460 : vector<64x1xf32> to vector<64x256xf32>
    %462 = arith.mulf %452, %461 : vector<64x256xf32>
    %463 = vector.shape_cast %462 : vector<64x256xf32> to vector<1x64x256xf32>
    %cst_213 = arith.constant dense<0.000000e+00> : vector<1xf32>
    %464 = vector.multi_reduction <add>, %463, %cst_213 [1, 2] : vector<1x64x256xf32> to vector<1xf32>
    %465 = vector.shape_cast %464 : vector<1xf32> to vector<1x1x1xf32>
    %466 = vector.extract %465[0, 0, 0] : f32 from vector<1x1x1xf32>
    %467 = vector.broadcast %466 : f32 to vector<1x1xf32>
    %cst_214 = arith.constant 8.192000e+03 : f32
    %468 = vector.broadcast %cst_214 : f32 to vector<1x1xf32>
    %469 = arith.divf %467, %468 : vector<1x1xf32>
    %470 = vector.broadcast %458 : vector<64x1xf32> to vector<64x256xf32>
    %471 = arith.mulf %452, %470 : vector<64x256xf32>
    %472 = vector.shape_cast %471 : vector<64x256xf32> to vector<1x64x256xf32>
    %cst_215 = arith.constant dense<0.000000e+00> : vector<1xf32>
    %473 = vector.multi_reduction <add>, %472, %cst_215 [1, 2] : vector<1x64x256xf32> to vector<1xf32>
    %474 = vector.shape_cast %473 : vector<1xf32> to vector<1x1x1xf32>
    %475 = vector.extract %474[0, 0, 0] : f32 from vector<1x1x1xf32>
    %476 = vector.broadcast %475 : f32 to vector<1x1xf32>
    %cst_216 = arith.constant 8.192000e+03 : f32
    %477 = vector.broadcast %cst_216 : f32 to vector<1x1xf32>
    %478 = arith.divf %476, %477 : vector<1x1xf32>
    %479 = vector.broadcast %469 : vector<1x1xf32> to vector<64x1xf32>
    %480 = arith.mulf %460, %479 : vector<64x1xf32>
    %481 = vector.broadcast %478 : vector<1x1xf32> to vector<64x1xf32>
    %482 = arith.mulf %458, %481 : vector<64x1xf32>
    %483 = arith.addf %480, %482 : vector<64x1xf32>
    %484 = vector.broadcast %483 : vector<64x1xf32> to vector<64x256xf32>
    %485 = arith.subf %452, %484 : vector<64x256xf32>
    %486 = arith.mulf %485, %485 : vector<64x256xf32>
    %487 = vector.broadcast %460 : vector<64x1xf32> to vector<64x256xf32>
    %488 = arith.mulf %486, %487 : vector<64x256xf32>
    %489 = vector.shape_cast %488 : vector<64x256xf32> to vector<1x64x256xf32>
    %cst_217 = arith.constant dense<0.000000e+00> : vector<1xf32>
    %490 = vector.multi_reduction <add>, %489, %cst_217 [1, 2] : vector<1x64x256xf32> to vector<1xf32>
    %491 = vector.shape_cast %490 : vector<1xf32> to vector<1x1x1xf32>
    %492 = vector.extract %491[0, 0, 0] : f32 from vector<1x1x1xf32>
    %493 = vector.broadcast %492 : f32 to vector<1x1xf32>
    %cst_218 = arith.constant 8.192000e+03 : f32
    %494 = vector.broadcast %cst_218 : f32 to vector<1x1xf32>
    %495 = arith.divf %493, %494 : vector<1x1xf32>
    %496 = arith.mulf %485, %485 : vector<64x256xf32>
    %497 = vector.broadcast %458 : vector<64x1xf32> to vector<64x256xf32>
    %498 = arith.mulf %496, %497 : vector<64x256xf32>
    %499 = vector.shape_cast %498 : vector<64x256xf32> to vector<1x64x256xf32>
    %cst_219 = arith.constant dense<0.000000e+00> : vector<1xf32>
    %500 = vector.multi_reduction <add>, %499, %cst_219 [1, 2] : vector<1x64x256xf32> to vector<1xf32>
    %501 = vector.shape_cast %500 : vector<1xf32> to vector<1x1x1xf32>
    %502 = vector.extract %501[0, 0, 0] : f32 from vector<1x1x1xf32>
    %503 = vector.broadcast %502 : f32 to vector<1x1xf32>
    %cst_220 = arith.constant 8.192000e+03 : f32
    %504 = vector.broadcast %cst_220 : f32 to vector<1x1xf32>
    %505 = arith.divf %503, %504 : vector<1x1xf32>
    %cst_221 = arith.constant 9.99999974E-6 : f32
    %506 = vector.broadcast %cst_221 : f32 to vector<1x1xf32>
    %507 = arith.addf %495, %506 : vector<1x1xf32>
    %508 = math.rsqrt %507 : vector<1x1xf32>
    %509 = vector.broadcast %508 : vector<1x1xf32> to vector<64x1xf32>
    %510 = arith.mulf %460, %509 : vector<64x1xf32>
    %cst_222 = arith.constant 9.99999974E-6 : f32
    %511 = vector.broadcast %cst_222 : f32 to vector<1x1xf32>
    %512 = arith.addf %505, %511 : vector<1x1xf32>
    %513 = math.rsqrt %512 : vector<1x1xf32>
    %514 = vector.broadcast %513 : vector<1x1xf32> to vector<64x1xf32>
    %515 = arith.mulf %458, %514 : vector<64x1xf32>
    %516 = arith.addf %510, %515 : vector<64x1xf32>
    %517 = vector.broadcast %516 : vector<64x1xf32> to vector<64x256xf32>
    %518 = arith.mulf %485, %517 : vector<64x256xf32>
    %519 = vector.broadcast %454 : vector<64x1xf32> to vector<64x256xf32>
    %520 = arith.mulf %518, %519 : vector<64x256xf32>
    %521 = vector.broadcast %456 : vector<64x1xf32> to vector<64x256xf32>
    %522 = arith.addf %520, %521 : vector<64x256xf32>
    %523 = arith.mulf %1, %522 : vector<64x256xf32>
    %c0_223 = arith.constant 0 : index
    %c0_224 = arith.constant 0 : index
    %c0_225 = arith.constant 0 : index
    %524 = vector.load %arg13[%c0_223, %c0_224, %c0_225] : memref<1x64x256xf32, #tpu.memory_space<vmem>>, vector<1x64x256xf32>
    %525 = vector.shape_cast %524 : vector<1x64x256xf32> to vector<64x256xf32>
    %526 = vector.shape_cast %523 : vector<64x256xf32> to vector<1x64x256xf32>
    tpu.vector_store %arg13[%c0_223, %c0_224, %c0_225], %526 {strides = array<i32>} : memref<1x64x256xf32, #tpu.memory_space<vmem>>, vector<1x64x256xf32>,
    return
  }
  func.func @transform_0(%arg0: i32) -> (i32, i32, i32) {
    %c0_i32 = arith.constant 0 : i32
    %c0_i32_0 = arith.constant 0 : i32
    %c0_i32_1 = arith.constant 0 : i32
    return %arg0, %c0_i32, %c0_i32_0 : i32, i32, i32
  }
  func.func @transform_1(%arg0: i32) -> (i32, i32) {
    %c0_i32 = arith.constant 0 : i32
    %c0_i32_0 = arith.constant 0 : i32
    %c0_i32_1 = arith.constant 0 : i32
    return %c0_i32, %c0_i32_0 : i32, i32
  }
  func.func @transform_2(%arg0: i32) -> (i32, i32, i32) {
    %c0_i32 = arith.constant 0 : i32
    %c0_i32_0 = arith.constant 0 : i32
    %c0_i32_1 = arith.constant 0 : i32
    %c0_i32_2 = arith.constant 0 : i32
    return %c0_i32, %c0_i32_0, %c0_i32_1 : i32, i32, i32
  }
  func.func @transform_3(%arg0: i32) -> (i32, i32) {
    %c0_i32 = arith.constant 0 : i32
    %c0_i32_0 = arith.constant 0 : i32
    %c0_i32_1 = arith.constant 0 : i32
    return %c0_i32, %c0_i32_0 : i32, i32
  }
  func.func @transform_4(%arg0: i32) -> (i32, i32, i32) {
    %c0_i32 = arith.constant 0 : i32
    %c0_i32_0 = arith.constant 0 : i32
    %c0_i32_1 = arith.constant 0 : i32
    %c0_i32_2 = arith.constant 0 : i32
    return %c0_i32, %c0_i32_0, %c0_i32_1 : i32, i32, i32
  }
  func.func @transform_5(%arg0: i32) -> (i32, i32) {
    %c0_i32 = arith.constant 0 : i32
    %c0_i32_0 = arith.constant 0 : i32
    %c0_i32_1 = arith.constant 0 : i32
    return %c0_i32, %c0_i32_0 : i32, i32
  }
  func.func @transform_6(%arg0: i32) -> (i32, i32, i32) {
    %c0_i32 = arith.constant 0 : i32
    %c0_i32_0 = arith.constant 0 : i32
    %c0_i32_1 = arith.constant 0 : i32
    %c0_i32_2 = arith.constant 0 : i32
    return %c0_i32, %c0_i32_0, %c0_i32_1 : i32, i32, i32
  }
  func.func @transform_7(%arg0: i32) -> (i32, i32, i32) {
    %c0_i32 = arith.constant 0 : i32
    %c0_i32_0 = arith.constant 0 : i32
    %c0_i32_1 = arith.constant 0 : i32
    %c0_i32_2 = arith.constant 0 : i32
    return %c0_i32, %c0_i32_0, %c0_i32_1 : i32, i32, i32
  }
  func.func @transform_8(%arg0: i32) -> (i32, i32, i32) {
    %c0_i32 = arith.constant 0 : i32
    %c0_i32_0 = arith.constant 0 : i32
    %c0_i32_1 = arith.constant 0 : i32
    %c0_i32_2 = arith.constant 0 : i32
    return %c0_i32, %c0_i32_0, %c0_i32_1 : i32, i32, i32
  }
  func.func @transform_9(%arg0: i32) -> (i32, i32, i32) {
    %c0_i32 = arith.constant 0 : i32
    %c0_i32_0 = arith.constant 0 : i32
    %c0_i32_1 = arith.constant 0 : i32
    %c0_i32_2 = arith.constant 0 : i32
    return %c0_i32, %c0_i32_0, %c0_i32_1 : i32, i32, i32
  }
  func.func @transform_10(%arg0: i32) -> (i32, i32, i32) {
    %c0_i32 = arith.constant 0 : i32
    %c0_i32_0 = arith.constant 0 : i32
    %c0_i32_1 = arith.constant 0 : i32
    %c0_i32_2 = arith.constant 0 : i32
    return %c0_i32, %c0_i32_0, %c0_i32_1 : i32, i32, i32
  }
  func.func @transform_11(%arg0: i32) -> (i32, i32, i32) {
    %c0_i32 = arith.constant 0 : i32
    %c0_i32_0 = arith.constant 0 : i32
    %c0_i32_1 = arith.constant 0 : i32
    %c0_i32_2 = arith.constant 0 : i32
    return %c0_i32, %c0_i32_0, %c0_i32_1 : i32, i32, i32
  }
  func.func @transform_12(%arg0: i32) -> (i32, i32, i32) {
    %c0_i32 = arith.constant 0 : i32
    %c0_i32_0 = arith.constant 0 : i32
    %c0_i32_1 = arith.constant 0 : i32
    return %arg0, %c0_i32, %c0_i32_0 : i32, i32, i32
  }
}

</mosaic_0001>

<bundles_post_ra>
// kernel: _lambda_.1
= control target key start
LH: loop header
LB: loop body
LE: loop exit
PB: predicated region body
PF: predicated region fallthrough
CT: control target
= control target key end

     0   :  { %s8760_s21 = smov 0   ;;  %s11609_s0 = inlined_call_operand.vmem [shape: f32[2,64,256], index: 0, kind: input, shape index: {}]   ;;  %s11610_s1 = inlined_call_operand.vmem [shape: bf16[8,64], index: 1, kind: input, shape index: {}]   ;;  %s11611_s2 = inlined_call_operand.vmem [shape: bf16[9,16,8], index: 2, kind: input, shape index: {}]   ;;  %s11612_s3 = inlined_call_operand.vmem [shape: bf16[16,8], index: 3, kind: input, shape index: {}]   ;;  %s11613_s4 = inlined_call_operand.vmem [shape: bf16[9,16,8], index: 4, kind: input, shape index: {}]   ;;  %s11614_s5 = inlined_call_operand.vmem [shape: bf16[64,16], index: 5, kind: input, shape index: {}]   ;;  %s11615_s6 = inlined_call_operand.vmem [shape: bf16[9,256,256], index: 6, kind: input, shape index: {}]   ;;  %s11616_s7 = inlined_call_operand.vmem [shape: f32[3,8,1], index: 7, kind: input, shape index: {}]   ;;  %s11617_s8 = inlined_call_operand.vmem [shape: f32[3,16,1], index: 8, kind: input, shape index: {}, may-alias: {8,9,10}]   ;;  %s11618_s9 = inlined_call_operand.vmem [shape: f32[3,16,1], index: 9, kind: input, shape index: {}, may-alias: {8,9,10}]   ;;  %s11619_s10 = inlined_call_operand.vmem [shape: f32[3,16,1], index: 10, kind: input, shape index: {}, may-alias: {8,9,10}]   ;;  %s11620_s11 = inlined_call_operand.vmem [shape: f32[3,64,1], index: 11, kind: input, shape index: {}]   ;;  %s11621_s12 = inlined_call_operand.vmem [shape: f32[2,64,256], index: 12, kind: output, shape index: {}]  }
   0x1 LB: > { %s7164_s22 = sadd.s32 4294967295, %s8683_s21   ;;  %p7168_p0 = scmp.ge.s32.totalorder %s8683_s21, 1  ;;  %s8683_s21 = sphi %s8760_s21, %s22_s21  }
   0x2   : > { %p362_p1 = scmp.lt.s32.totalorder %s8683_s21, 3 }
   0x4   : > { %p363_p2 = pnand %p7168_p0, %p362_p1 }
   0x6   : > { %366 = sbr.rel (%p363_p2) target bundleno = 6177 (0x1821), region = 68 }
   0xd   : > { %p404_p3 = scmp.lt.s32.totalorder %s7164_s22, 1  ;;  %v8771_v0 = vld [vmem:[%s11616_s7 + $0x10] sm:$0xff]  ;;  %v11622_v1 = vmov 0   ;;  %v439_v27 = vld [vmem:[%s11610_s1] sm:$0xf]  ;;  %vm440_vm0 = vcmask 523264  }
   0xe   : > { %476 = vmatprep.mubr.bf16.mxu0 %v11622_v1  ;;  %7975 = vset.pattern.permute.xlu0 %v11622_v1  ;;  %v8776_v2 = vsub.f32 1.0, %v8771_v0  ;;  %vm611_vm1 = vcmask 1043456   ;;  %vm607_vm2 = vcmask 64512   ;;  %s8686_s17 = smov 112   ;;  %s8687_s18 = smov 96   ;;  %vm5249_vm3 = vcmask 130048  }
   0xf   : > { %s11774_s22 = smov (!%p404_p3, %s7164_s22), 1  ;;  %7976 = vset.pattern.permute.xlu1 %v11622_v1  ;;  %650 = vmatprep.mubr.bf16.mxu1 %v11622_v1  ;;  %s8690_s23 = smov 48   ;;  %vm6356_vm4 = vcmask 261120   ;;  %vm6359_vm5 = vcmask 392192   ;;  %vm6364_vm6 = vcmask 654336   ;;  %vm6367_vm7 = vcmask 785408  }
  0x10   : > { %493 = vperm.xlu0 %7975, %v8776_v2   ;;  %s7851_s25 = sshll.u32 %s11774_s22, 7  ;;  %s8691_s24 = smov 32   ;;  %vm6370_vm8 = vcmask 916480  }
  0x11   : > { %s8789_s28 = scalar_lea.vmem %s11609_s0, %s7851_s25 }
  0x12   : > { %v416_v3 = vld [vmem:[%s8789_s28 + $0x8] sm:$0xff]  ;;  %v418_v4 = vld [vmem:[%s8789_s28 + $0x18] sm:$0xff]  ;;  %v415_v5 = vld [vmem:[%s8789_s28] sm:$0xff] }
  0x13   : > { %v432_v6 = vpack.c.bf16 %v418_v4, %v416_v3  ;;  %v417_v7 = vld [vmem:[%s8789_s28 + $0x10] sm:$0xff]  ;;  %v420_v8 = vld [vmem:[%s8789_s28 + $0x28] sm:$0xff]  ;;  %v422_v9 = vld [vmem:[%s8789_s28 + $0x38] sm:$0xff] }
  0x14   : > { %513 = vperm.xlu0 %7975, %v8771_v0   ;;  %v431_v10 = vpack.c.bf16 %v417_v7, %v415_v5  ;;  %v434_v11 = vpack.c.bf16 %v422_v9, %v420_v8  ;;  %v419_v12 = vld [vmem:[%s8789_s28 + $0x20] sm:$0xff]  ;;  %v421_v13 = vld [vmem:[%s8789_s28 + $0x30] sm:$0xff]  ;;  %v424_v14 = vld [vmem:[%s8789_s28 + $0x48] sm:$0xff] }
  0x15   : > { %444 = vmatprep.subr.bf16.mxu0 %v432_v6  ;;  %v426_v15 = vld [vmem:[%s8789_s28 + $0x58] sm:$0xff]  ;;  %v433_v16 = vpack.c.bf16 %v421_v13, %v419_v12  ;;  %v423_v17 = vld [vmem:[%s8789_s28 + $0x40] sm:$0xff]  ;;  %v425_v18 = vld [vmem:[%s8789_s28 + $0x50] sm:$0xff] }
  0x16   : > { %445 = vmatpush1.bf16.msra.mxu0 %v431_v10  ;;  %v428_v19 = vld [vmem:[%s8789_s28 + $0x68] sm:$0xff]  ;;  %v436_v20 = vpack.c.bf16 %v426_v15, %v424_v14  ;;  %v430_v21 = vld [vmem:[%s8789_s28 + $0x78] sm:$0xff]  ;;  %v427_v22 = vld [vmem:[%s8789_s28 + $0x60] sm:$0xff]  ;;  %v435_v24 = vpack.c.bf16 %v425_v18, %v423_v17 }
  0x17   : > { %446 = vmatprep.subr.bf16.mxu0 %v434_v11  ;;  %v429_v23 = vld [vmem:[%s8789_s28 + $0x70] sm:$0xff]  ;;  %v438_v25 = vpack.c.bf16 %v430_v21, %v428_v19  ;;  %v485_v12 = vld [vmem:[%s11616_s7] sm:$0xff] }
  0x18   : > { %v437_v26 = vpack.c.bf16 %v429_v23, %v427_v22  ;;  %v8047_v13 = vld [vmem:[%s11615_s6 + $0x100] ss:$8 sps:$4 sm:$0xff]   ;;  %v8049_v14 = vld [vmem:[%s11615_s6 + $0x104] ss:$8 sps:$4 sm:$0xff]   ;;  %v8052_v15 = vld [vmem:[%s11615_s6 + $0x114] ss:$8 sps:$4 sm:$0xff]  }
  0x19   : > { %v8055_v17 = vld [vmem:[%s11615_s6 + $0x124] ss:$8 sps:$4 sm:$0xff]   ;;  %v8053_v18 = vld [vmem:[%s11615_s6 + $0x120] ss:$8 sps:$4 sm:$0xff]   ;;  %v8058_v19 = vld [vmem:[%s11615_s6 + $0x134] ss:$8 sps:$4 sm:$0xff]  }
  0x1a   : > { %447 = vmatpush1.bf16.msra.mxu0 %v433_v16  ;;  %v8050_v16 = vld [vmem:[%s11615_s6 + $0x110] ss:$8 sps:$4 sm:$0xff]   ;;  %v8061_v21 = vld [vmem:[%s11615_s6 + $0x144] ss:$8 sps:$4 sm:$0xff]   ;;  %v8059_v22 = vld [vmem:[%s11615_s6 + $0x140] ss:$8 sps:$4 sm:$0xff]  }
  0x1b   : > { %448 = vmatprep.subr.bf16.mxu0 %v436_v20  ;;  %v8056_v20 = vld [vmem:[%s11615_s6 + $0x130] ss:$8 sps:$4 sm:$0xff]   ;;  %v8064_v23 = vld [vmem:[%s11615_s6 + $0x154] ss:$8 sps:$4 sm:$0xff]  }
  0x1e   : > { %449 = vmatpush1.bf16.msra.mxu0 %v435_v24  ;;  %v8062_v24 = vld [vmem:[%s11615_s6 + $0x150] ss:$8 sps:$4 sm:$0xff]  }
  0x1f   : > { %450 = vmatprep.subr.bf16.mxu0 %v438_v25  ;;  %v8067_v25 = vld [vmem:[%s11615_s6 + $0x164] ss:$8 sps:$4 sm:$0xff]  }
  0x22   : > { %451 = vmatpush1.bf16.msra.mxu0 %v437_v26  ;;  %v8065_v26 = vld [vmem:[%s11615_s6 + $0x160] ss:$8 sps:$4 sm:$0xff]  }
  0x23   : > { %1272 = vmatprep.subr.bf16.mxu0 %v8049_v14 }
  0x25   : > { %7173 = vmatmul.mubr.msk.bf16.vlgmr.msra.gmra.mrb[0].mxu0 %vm440_vm0, %v439_v27  ;;  %v8070_v27 = vld [vmem:[%s11615_s6 + $0x174] ss:$8 sps:$4 sm:$0xff]  }
  0x26   : > { %1273 = vmatpush1.bf16.msra.mxu0 %v8047_v13  ;;  %v8092_v13 = vld [vmem:[%s11615_s6 + $0x1f0] ss:$8 sps:$4 sm:$0xff]  }
  0x27   : > { %1274 = vmatprep.subr.bf16.mxu0 %v8052_v15  ;;  %v8097_v15 = vld [vmem:[%s11615_s6 + $0x204] ss:$8 sps:$4 sm:$0xff]  }
  0x2a   : > { %1275 = vmatpush1.bf16.msra.mxu0 %v8050_v16 }
  0x2b   : > { %1276 = vmatprep.subr.bf16.mxu0 %v8055_v17 }
  0x2e   : > { %1277 = vmatpush1.bf16.msra.mxu0 %v8053_v18 }
  0x2f   : > { %1278 = vmatprep.subr.bf16.mxu0 %v8058_v19 }
  0x32   : > { %1279 = vmatpush1.bf16.msra.mxu0 %v8056_v20 }
  0x33   : > { %1280 = vmatprep.subr.bf16.mxu0 %v8061_v21 }
  0x36   : > { %1281 = vmatpush1.bf16.msra.mxu0 %v8059_v22 }
  0x37   : > { %1282 = vmatprep.subr.bf16.mxu0 %v8064_v23 }
  0x3a   : > { %1283 = vmatpush1.bf16.msra.mxu0 %v8062_v24 }
  0x3b   : > { %1284 = vmatprep.subr.bf16.mxu0 %v8067_v25 }
  0x3e   : > { %1285 = vmatpush1.bf16.msra.mxu0 %v8065_v26 }
  0x3f   : > { %1286 = vmatprep.subr.bf16.mxu0 %v8070_v27 }
  0x8f   : > { %v494_v28 = vpop.permute.xlu0 %493 }
  0x93   : > { %v514_v29 = vpop.permute.xlu0 %513 }
  0xf8   : > { %v478_v30 = vpop.f32.mrb[0].mxu0 }
  0xf9   : > { %v480_v31 = vpop.f32.mrb[1].mxu0  ;;  %v496_v32 = vmul.f32 %v494_v28, %v478_v30  ;;  %v516_v33 = vmul.f32 %v514_v29, %v478_v30 }
  0xfa   : > { %v482_v34 = vpop.f32.mrb[2].mxu0  ;;  %v497_v35 = vmul.f32 %v494_v28, %v480_v31  ;;  %v517_v36 = vmul.f32 %v514_v29, %v480_v31 }
  0xfb   : > { %v483_v37 = vpop.f32.mrb[3].mxu0 }
  0xfc   : > { %v498_v38 = vadd.f32 %v497_v35, %v496_v32  ;;  %v518_v39 = vadd.f32 %v517_v36, %v516_v33  ;;  %v8071_v36 = vld [vmem:[%s11615_s6 + $0x180] ss:$8 sps:$4 sm:$0xff]   ;;  %v8076_v37 = vld [vmem:[%s11615_s6 + $0x194] ss:$8 sps:$4 sm:$0xff]  }
  0xfe   : > { %499 = vadd.xlane.f32.xlu1 %v498_v38 }
 0x102   : > { %519 = vadd.xlane.f32.xlu1 %v518_v39 }
 0x18b   : > { %v500_v40 = vpop.xlane.xlu1 %499 }
 0x18c   : > { %v501_v41 = vrot.slane %v500_v40, 4 }
 0x18e   : > { %v502_v42 = vadd.f32 %v501_v41, %v500_v40 }
 0x18f   : > { %v520_v43 = vpop.xlane.xlu1 %519 }
 0x190   : > { %v521_v44 = vrot.slane %v520_v43, 4  ;;  %v503_v45 = vrot.slane %v502_v42, 2 }
 0x192   : > { %v522_v46 = vadd.f32 %v521_v44, %v520_v43  ;;  %v504_v47 = vadd.f32 %v503_v45, %v502_v42  ;;  %v8074_v42 = vld [vmem:[%s11615_s6 + $0x190] ss:$8 sps:$4 sm:$0xff]   ;;  %v8079_v43 = vld [vmem:[%s11615_s6 + $0x1a4] ss:$8 sps:$4 sm:$0xff]  }
 0x194   : > { %v505_v48 = vrot.slane %v504_v47, 1  ;;  %v523_v49 = vrot.slane %v522_v46, 2 }
 0x196   : > { %v506_v50 = vadd.f32 %v505_v48, %v504_v47  ;;  %v524_v51 = vadd.f32 %v523_v49, %v522_v46  ;;  %v8077_v48 = vld [vmem:[%s11615_s6 + $0x1a0] ss:$8 sps:$4 sm:$0xff]   ;;  %v8082_v49 = vld [vmem:[%s11615_s6 + $0x1b4] ss:$8 sps:$4 sm:$0xff]  }
 0x198   : > { %7917 = vpush %v506_v50  ;;  %v525_v52 = vrot.slane %v524_v51, 1  ;;  %v8080_v50 = vld [vmem:[%s11615_s6 + $0x1b0] ss:$8 sps:$4 sm:$0xff]  }
 0x19a   : > { %v526_v53 = vadd.f32 %v525_v52, %v524_v51  ;;  %v8085_v51 = vld [vmem:[%s11615_s6 + $0x1c4] ss:$8 sps:$4 sm:$0xff]   ;;  %v8083_v52 = vld [vmem:[%s11615_s6 + $0x1c0] ss:$8 sps:$4 sm:$0xff]  }
 0x19c   : > { %7919 = vpush %v526_v53  ;;  %v8088_v53 = vld [vmem:[%s11615_s6 + $0x1d4] ss:$8 sps:$4 sm:$0xff]  }
 0x1c9   : > { %s7918_s13 = spop %7917 }
 0x1ca   : > { %v508_v54 = vstv %s7918_s13 }
 0x1cb   : > { %v510_v55 = vmul.f32 0.0009765625, %v508_v54  ;;  %v8086_v54 = vld [vmem:[%s11615_s6 + $0x1d0] ss:$8 sps:$4 sm:$0xff]  }
 0x1cd   : > { %s7920_s14 = spop %7919  ;;  %v530_v58 = vmul.f32 %v510_v55, %v8776_v2 }
 0x1ce   : > { %v528_v56 = vstv %s7920_s14 }
 0x1cf   : > { %v529_v57 = vmul.f32 0.0009765625, %v528_v56 }
 0x1d1   : > { %v531_v59 = vmul.f32 %v8771_v0, %v529_v57  ;;  %v8825_v0 = vld [vmem:[%s11618_s9 + $0x28] sm:$0xff] }
 0x1d2   : > { %v8828_v11 = vsub.f32 1.0, %v8825_v0 }
 0x1d3   : > { %v532_v60 = vadd.f32 %v531_v59, %v530_v58 }
 0x1d5   : > { %535 = vperm.xlu0 %7975, %v532_v60  }
 0x254   : > { %v536_v61 = vpop.permute.xlu0 %535 }
 0x255   : > { %v8814_v62 = vsub.f32 %v478_v30, %v536_v61  ;;  %v8816_v63 = vsub.f32 %v480_v31, %v536_v61  ;;  %v8073_v31 = vld [vmem:[%s11615_s6 + $0x184] ss:$8 sps:$4 sm:$0xff]  }
 0x257   : > { %v540_v3 = vmul.f32 %v8814_v62, %v8814_v62  ;;  %v541_v4 = vmul.f32 %v8816_v63, %v8816_v63 }
 0x259   : > { %v556_v5 = vmul.f32 %v540_v3, %v514_v29  ;;  %v557_v6 = vmul.f32 %v541_v4, %v514_v29  ;;  %v542_v7 = vmul.f32 %v540_v3, %v494_v28  ;;  %v543_v8 = vmul.f32 %v541_v4, %v494_v28  ;;  %v8068_v28 = vld [vmem:[%s11615_s6 + $0x170] ss:$8 sps:$4 sm:$0xff]  }
 0x25a   : > { %1287 = vmatpush1.bf16.msra.mxu0 %v8068_v28  ;;  %v8098_v28 = vld [vmem:[%s11612_s3] sm:$0xff]  }
 0x25b   : > { %v558_v9 = vadd.f32 %v557_v6, %v556_v5  ;;  %v544_v10 = vadd.f32 %v543_v8, %v542_v7  ;;  %1288 = vmatprep.subr.bf16.mxu0 %v8073_v31  ;;  %v8658_v5 = vld [vmem:[%s11616_s7 + $0x10] sm:$0xff]  ;;  %v8091_v8 = vld [vmem:[%s11615_s6 + $0x1e4] ss:$8 sps:$4 sm:$0xff]  }
 0x25c   : > { %v8107_v31 = vld [vmem:[%s11615_s6 + $0x14] ss:$8 sps:$4 sm:$0xff]  }
 0x25d   : > { %559 = vadd.xlane.f32.xlu0 %v558_v9  ;;  %545 = vadd.xlane.f32.xlu1 %v544_v10  ;;  %v8089_v9 = vld [vmem:[%s11615_s6 + $0x1e0] ss:$8 sps:$4 sm:$0xff]  }
 0x25e   : > { %1289 = vmatpush1.bf16.msra.mxu0 %v8071_v36  ;;  %v7181_v10 = vld [vmem:[%s11618_s9 + $0x20] sm:$0xff]  ;;  %v8116_v36 = vld [vmem:[%s11615_s6 + $0x234] ss:$8 sps:$4 sm:$0xff]  }
 0x25f   : > { %1290 = vmatprep.subr.bf16.mxu0 %v8076_v37  ;;  %v8940_v14 = vsub.f32 1.0, %v7181_v10  ;;  %v8111_v37 = vld [vmem:[%s11615_s6 + $0x20] ss:$8 sps:$4 sm:$0xff]  }
 0x262   : > { %1291 = vmatpush1.bf16.msra.mxu0 %v8074_v42  ;;  %v8120_v42 = vld [vmem:[%s11615_s6 + $0x240] ss:$8 sps:$4 sm:$0xff]  }
 0x263   : > { %1292 = vmatprep.subr.bf16.mxu0 %v8079_v43  ;;  %v8125_v43 = vld [vmem:[%s11615_s6 + $0x44] ss:$8 sps:$4 sm:$0xff]  }
 0x266   : > { %1293 = vmatpush1.bf16.msra.mxu0 %v8077_v48  ;;  %v8134_v48 = vld [vmem:[%s11615_s6 + $0x264] ss:$8 sps:$4 sm:$0xff]  }
 0x267   : > { %1294 = vmatprep.subr.bf16.mxu0 %v8082_v49  ;;  %v8129_v49 = vld [vmem:[%s11615_s6 + $0x50] ss:$8 sps:$4 sm:$0xff]  }
 0x26a   : > { %1295 = vmatpush1.bf16.msra.mxu0 %v8080_v50  ;;  %v8132_v50 = vld [vmem:[%s11615_s6 + $0x260] ss:$8 sps:$4 sm:$0xff]  }
 0x26b   : > { %1296 = vmatprep.subr.bf16.mxu0 %v8085_v51  ;;  %v8137_v51 = vld [vmem:[%s11615_s6 + $0x64] ss:$8 sps:$4 sm:$0xff]  }
 0x26e   : > { %586 = vperm.xlu1 %7976, %v485_v12   ;;  %1297 = vmatpush1.bf16.msra.mxu0 %v8083_v52  ;;  %v8094_v12 = vld [vmem:[%s11615_s6 + $0x1f4] ss:$8 sps:$4 sm:$0xff]  }
 0x26f   : > { %1298 = vmatprep.subr.bf16.mxu0 %v8088_v53  ;;  %v8140_v52 = vld [vmem:[%s11615_s6 + $0x274] ss:$8 sps:$4 sm:$0xff]   ;;  %v8135_v53 = vld [vmem:[%s11615_s6 + $0x60] ss:$8 sps:$4 sm:$0xff]  }
 0x272   : > { %1299 = vmatpush1.bf16.msra.mxu0 %v8086_v54  ;;  %v8138_v54 = vld [vmem:[%s11615_s6 + $0x270] ss:$8 sps:$4 sm:$0xff]  }
 0x273   : > { %678 = vperm.xlu0 %7975, %v8828_v11   ;;  %1300 = vmatprep.subr.bf16.mxu0 %v8091_v8  ;;  %v8161_v8 = vld [vmem:[%s11615_s6 + $0xa4] ss:$8 sps:$4 sm:$0xff]  }
 0x276   : > { %1301 = vmatpush1.bf16.msra.mxu0 %v8089_v9  ;;  %v8164_v9 = vld [vmem:[%s11615_s6 + $0x2b4] ss:$8 sps:$4 sm:$0xff]  }
 0x277   : > { %1302 = vmatprep.subr.bf16.mxu0 %v8094_v12  ;;  %v8167_v12 = vld [vmem:[%s11615_s6 + $0xb4] ss:$8 sps:$4 sm:$0xff]  }
 0x27a   : > { %1303 = vmatpush1.bf16.msra.mxu0 %v8092_v13  ;;  %v8170_v13 = vld [vmem:[%s11615_s6 + $0x2c4] ss:$8 sps:$4 sm:$0xff]  }
 0x27b   : > { %1730 = vmatprep.subr.bf16.mxu0 %v8097_v15  ;;  %v8165_v15 = vld [vmem:[%s11615_s6 + $0xb0] ss:$8 sps:$4 sm:$0xff]  }
 0x2ea   : > { %v560_v29 = vpop.xlane.xlu0 %559  ;;  %v546_v30 = vpop.xlane.xlu1 %545 }
 0x2eb   : > { %v561_v32 = vrot.slane %v560_v29, 4  ;;  %v547_v33 = vrot.slane %v546_v30, 4 }
 0x2ed   : > { %v562_v34 = vadd.f32 %v561_v32, %v560_v29  ;;  %v548_v35 = vadd.f32 %v547_v33, %v546_v30  ;;  %v8099_v29 = vld [vmem:[%s11615_s6] ss:$8 sps:$4 sm:$0xff]   ;;  %v8102_v30 = vld [vmem:[%s11615_s6 + $0x210] ss:$8 sps:$4 sm:$0xff]   ;;  %v8110_v32 = vld [vmem:[%s11615_s6 + $0x224] ss:$8 sps:$4 sm:$0xff]  }
 0x2ee   : > { %v587_v16 = vpop.permute.xlu1 %586  ;;  %v8105_v33 = vld [vmem:[%s11615_s6 + $0x10] ss:$8 sps:$4 sm:$0xff]  }
 0x2ef   : > { %v549_v38 = vrot.slane %v548_v35, 2  ;;  %v563_v39 = vrot.slane %v562_v34, 2 }
 0x2f1   : > { %v550_v40 = vadd.f32 %v549_v38, %v548_v35  ;;  %v564_v41 = vadd.f32 %v563_v39, %v562_v34  ;;  %v8108_v34 = vld [vmem:[%s11615_s6 + $0x220] ss:$8 sps:$4 sm:$0xff]   ;;  %v8113_v35 = vld [vmem:[%s11615_s6 + $0x24] ss:$8 sps:$4 sm:$0xff]   ;;  %v8114_v38 = vld [vmem:[%s11615_s6 + $0x230] ss:$8 sps:$4 sm:$0xff]  }
 0x2f2   : > { %v8119_v39 = vld [vmem:[%s11615_s6 + $0x34] ss:$8 sps:$4 sm:$0xff]  }
 0x2f3   : > { %v551_v44 = vrot.slane %v550_v40, 1  ;;  %v565_v45 = vrot.slane %v564_v41, 1 }
 0x2f5   : > { %v552_v46 = vadd.f32 %v551_v44, %v550_v40  ;;  %v566_v47 = vadd.f32 %v565_v45, %v564_v41  ;;  %v8122_v40 = vld [vmem:[%s11615_s6 + $0x244] ss:$8 sps:$4 sm:$0xff]   ;;  %v8117_v41 = vld [vmem:[%s11615_s6 + $0x30] ss:$8 sps:$4 sm:$0xff]   ;;  %v8128_v44 = vld [vmem:[%s11615_s6 + $0x254] ss:$8 sps:$4 sm:$0xff]  }
 0x2f6   : > { %v8123_v45 = vld [vmem:[%s11615_s6 + $0x40] ss:$8 sps:$4 sm:$0xff]  }
 0x2f7   : > { %7921 = vpush %v552_v46  ;;  %v8126_v46 = vld [vmem:[%s11615_s6 + $0x250] ss:$8 sps:$4 sm:$0xff]  }
 0x2f8   : > { %7923 = vpush %v566_v47  ;;  %v8131_v47 = vld [vmem:[%s11615_s6 + $0x54] ss:$8 sps:$4 sm:$0xff]  }
 0x328   : > { %s7922_s19 = spop %7921 }
 0x329   : > { %v554_v55 = vstv %s7922_s19  ;;  %s7924_s20 = spop %7923 }
 0x32a   : > { %v555_v56 = vmul.f32 0.0009765625, %v554_v55  ;;  %v568_v57 = vstv %s7924_s20  ;;  %v8143_v55 = vld [vmem:[%s11615_s6 + $0x74] ss:$8 sps:$4 sm:$0xff]  }
 0x32b   : > { %v569_v58 = vmul.f32 0.0009765625, %v568_v57  ;;  %v8141_v57 = vld [vmem:[%s11615_s6 + $0x70] ss:$8 sps:$4 sm:$0xff]  }
 0x32c   : > { %v570_v59 = vadd.f32 1e-05, %v555_v56  ;;  %v8146_v56 = vld [vmem:[%s11615_s6 + $0x284] ss:$8 sps:$4 sm:$0xff]  }
 0x32d   : > { %v573_v60 = vadd.f32 1e-05, %v569_v58  ;;  %v8144_v58 = vld [vmem:[%s11615_s6 + $0x280] ss:$8 sps:$4 sm:$0xff]  }
 0x32e   : > { %8502 = vrsqrt.f32 %v570_v59  ;;  %v8149_v59 = vld [vmem:[%s11615_s6 + $0x84] ss:$8 sps:$4 sm:$0xff]  }
 0x32f   : > { %8504 = vrsqrt.f32 %v573_v60  ;;  %v8152_v60 = vld [vmem:[%s11615_s6 + $0x294] ss:$8 sps:$4 sm:$0xff]  }
 0x338   : > { %v8503_v61 = vpop.eup %8502 }
 0x339   : > { %v8505_v3 = vpop.eup %8504  ;;  %v572_v4 = vmul.f32 %v8503_v61, %v8776_v2  ;;  %v7174_v2 = vld [vmem:[%s11616_s7 + $0x8] sm:$0xff] }
 0x33a   : > { %v575_v6 = vmul.f32 %v8658_v5, %v8505_v3  ;;  %v8147_v61 = vld [vmem:[%s11615_s6 + $0x80] ss:$8 sps:$4 sm:$0xff]   ;;  %v8150_v3 = vld [vmem:[%s11615_s6 + $0x290] ss:$8 sps:$4 sm:$0xff]   ;;  %v8158_v5 = vld [vmem:[%s11615_s6 + $0x2a4] ss:$8 sps:$4 sm:$0xff]  }
 0x33c   : > { %v576_v7 = vadd.f32 %v575_v6, %v572_v4  ;;  %v8155_v4 = vld [vmem:[%s11615_s6 + $0x94] ss:$8 sps:$4 sm:$0xff]   ;;  %v8153_v6 = vld [vmem:[%s11615_s6 + $0x90] ss:$8 sps:$4 sm:$0xff]  }
 0x33e   : > { %579 = vperm.xlu1 %7976, %v576_v7   ;;  %v8156_v7 = vld [vmem:[%s11615_s6 + $0x2a0] ss:$8 sps:$4 sm:$0xff]  }
 0x342   : > { %593 = vperm.xlu1 %7976, %v7174_v2   ;;  %v8159_v2 = vld [vmem:[%s11615_s6 + $0xa0] ss:$8 sps:$4 sm:$0xff]  }
 0x346   : > { %673 = vperm.xlu1 %7976, %v8940_v14  }
 0x34a   : > { %702 = vperm.xlu1 %7976, %v7181_v10   ;;  %v8162_v10 = vld [vmem:[%s11615_s6 + $0x2b0] ss:$8 sps:$4 sm:$0xff]  }
 0x34e   : > { %707 = vperm.xlu1 %7976, %v8825_v0   ;;  %v8095_v0 = vld [vmem:[%s11615_s6 + $0x200] ss:$8 sps:$4 sm:$0xff]  }
 0x3bd   : > { %v580_v17 = vpop.permute.xlu1 %579 }
 0x3be   : > { %v582_v18 = vmul.f32 %v580_v17, %v8814_v62  ;;  %v583_v19 = vmul.f32 %v580_v17, %v8816_v63  ;;  %v8101_v62 = vld [vmem:[%s11615_s6 + $0x4] ss:$8 sps:$4 sm:$0xff]   ;;  %v8104_v63 = vld [vmem:[%s11615_s6 + $0x214] ss:$8 sps:$4 sm:$0xff]  }
 0x3bf   : > { %v8173_v17 = vld [vmem:[%s11615_s6 + $0xc4] ss:$8 sps:$4 sm:$0xff]  }
 0x3c0   : > { %v589_v20 = vmul.f32 %v587_v16, %v582_v18  ;;  %v590_v21 = vmul.f32 %v587_v16, %v583_v19  ;;  %v8168_v16 = vld [vmem:[%s11615_s6 + $0x2c0] ss:$8 sps:$4 sm:$0xff]   ;;  %v8176_v18 = vld [vmem:[%s11615_s6 + $0x2d4] ss:$8 sps:$4 sm:$0xff]  }
 0x3c1   : > { %v594_v22 = vpop.permute.xlu1 %593  ;;  %v8171_v19 = vld [vmem:[%s11615_s6 + $0xc0] ss:$8 sps:$4 sm:$0xff]  }
 0x3c2   : > { %v596_v23 = vadd.f32 %v594_v22, %v589_v20  ;;  %v597_v24 = vadd.f32 %v594_v22, %v590_v21  ;;  %v8174_v20 = vld [vmem:[%s11615_s6 + $0x2d0] ss:$8 sps:$4 sm:$0xff]   ;;  %v8179_v21 = vld [vmem:[%s11615_s6 + $0xd4] ss:$8 sps:$4 sm:$0xff]   ;;  %v8182_v22 = vld [vmem:[%s11615_s6 + $0x2e4] ss:$8 sps:$4 sm:$0xff]  }
 0x3c4   : > { %v8949_v25 = vpack.c.bf16 %v596_v23, %v596_v23  ;;  %v8951_v26 = vpack.c.bf16 %v597_v24, %v597_v24  ;;  %v8177_v23 = vld [vmem:[%s11615_s6 + $0xd0] ss:$8 sps:$4 sm:$0xff]   ;;  %v8180_v24 = vld [vmem:[%s11615_s6 + $0x2e0] ss:$8 sps:$4 sm:$0xff]  }
 0x3c6   : > { %7177 = vmatprep.subr.msk.bf16.mxu1 %vm611_vm1, %v8951_v26  ;;  %1304 = vmatprep.mubr.bf16.mxu0 %v8951_v26  ;;  %v613_v27 = vsel %vm611_vm1, %v8949_v25, 0 }
 0x3c7   : > { %619 = vmatpush1.bf16.msra.mxu1 %v613_v27  ;;  %1305 = vmatmul.mubr.bf16.vlgmr.msra.gmra.mrb[4].mxu0 %v8949_v25  ;;  %v8186_v27 = vld [vmem:[%s11615_s6 + $0x2f0] ss:$8 sps:$4 sm:$0xff]  }
 0x3c8   : > { %1731 = vmatpush1.bf16.msra.mxu0 %v8095_v0  ;;  %1762 = vmatprep.mubr.bf16.mxu0 %v8951_v26  ;;  %v8185_v0 = vld [vmem:[%s11615_s6 + $0xe4] ss:$8 sps:$4 sm:$0xff]  }
 0x3c9   : > { %1032 = vmatprep.subr.bf16.mxu1 %v8101_v62  ;;  %1732 = vmatprep.subr.bf16.mxu0 %v8104_v63  ;;  %v8188_v62 = vld [vmem:[%s11615_s6 + $0x2f4] ss:$8 sps:$4 sm:$0xff]   ;;  %v8183_v63 = vld [vmem:[%s11615_s6 + $0xe0] ss:$8 sps:$4 sm:$0xff]  }
 0x3ca   : > { %7178 = vmatmul.mubr.msk.bf16.vlgmr.msra.gmra.mrb[0].mxu1 %vm607_vm2, %v8098_v28  ;;  %v8191_v28 = vld [vmem:[%s11615_s6 + $0xf4] ss:$8 sps:$4 sm:$0xff]  }
 0x3cb   : > { %1033 = vmatpush1.bf16.msra.mxu1 %v8099_v29  ;;  %1064 = vmatprep.mubr.bf16.mxu1 %v8951_v26  ;;  %v8194_v29 = vld [vmem:[%s11615_s6 + $0x404] ss:$8 sps:$4 sm:$0xff]  }
 0x3cc   : > { %1733 = vmatpush1.bf16.msra.mxu0 %v8102_v30  ;;  %1034 = vmatprep.subr.bf16.mxu1 %v8107_v31  ;;  %v8189_v30 = vld [vmem:[%s11615_s6 + $0xf0] ss:$8 sps:$4 sm:$0xff]   ;;  %v8192_v31 = vld [vmem:[%s11615_s6 + $0x400] ss:$8 sps:$4 sm:$0xff]  }
 0x3cd   : > { %1734 = vmatprep.subr.bf16.mxu0 %v8110_v32  ;;  %v8197_v32 = vld [vmem:[%s11615_s6 + $0x414] ss:$8 sps:$4 sm:$0xff]  }
 0x3cf   : > { %1035 = vmatpush1.bf16.msra.mxu1 %v8105_v33  ;;  %v8195_v33 = vld [vmem:[%s11615_s6 + $0x410] ss:$8 sps:$4 sm:$0xff]  }
 0x3d0   : > { %1735 = vmatpush1.bf16.msra.mxu0 %v8108_v34  ;;  %1036 = vmatprep.subr.bf16.mxu1 %v8113_v35  ;;  %v8200_v34 = vld [vmem:[%s11615_s6 + $0x424] ss:$8 sps:$4 sm:$0xff]   ;;  %v8198_v35 = vld [vmem:[%s11615_s6 + $0x420] ss:$8 sps:$4 sm:$0xff]  }
 0x3d1   : > { %1736 = vmatprep.subr.bf16.mxu0 %v8116_v36  ;;  %v8203_v36 = vld [vmem:[%s11615_s6 + $0x434] ss:$8 sps:$4 sm:$0xff]  }
 0x3d3   : > { %1037 = vmatpush1.bf16.msra.mxu1 %v8111_v37  ;;  %v8201_v37 = vld [vmem:[%s11615_s6 + $0x430] ss:$8 sps:$4 sm:$0xff]  }
 0x3d4   : > { %1737 = vmatpush1.bf16.msra.mxu0 %v8114_v38  ;;  %1038 = vmatprep.subr.bf16.mxu1 %v8119_v39  ;;  %v8206_v38 = vld [vmem:[%s11615_s6 + $0x444] ss:$8 sps:$4 sm:$0xff]   ;;  %v8204_v39 = vld [vmem:[%s11615_s6 + $0x440] ss:$8 sps:$4 sm:$0xff]  }
 0x3d5   : > { %1738 = vmatprep.subr.bf16.mxu0 %v8122_v40  ;;  %v8209_v40 = vld [vmem:[%s11615_s6 + $0x454] ss:$8 sps:$4 sm:$0xff]  }
 0x3d7   : > { %1039 = vmatpush1.bf16.msra.mxu1 %v8117_v41  ;;  %v8207_v41 = vld [vmem:[%s11615_s6 + $0x450] ss:$8 sps:$4 sm:$0xff]  }
 0x3d8   : > { %1739 = vmatpush1.bf16.msra.mxu0 %v8120_v42  ;;  %1040 = vmatprep.subr.bf16.mxu1 %v8125_v43  ;;  %v8212_v42 = vld [vmem:[%s11615_s6 + $0x464] ss:$8 sps:$4 sm:$0xff]   ;;  %v8210_v43 = vld [vmem:[%s11615_s6 + $0x460] ss:$8 sps:$4 sm:$0xff]  }
 0x3d9   : > { %1740 = vmatprep.subr.bf16.mxu0 %v8128_v44  ;;  %v8215_v44 = vld [vmem:[%s11615_s6 + $0x474] ss:$8 sps:$4 sm:$0xff]  }
 0x3db   : > { %1041 = vmatpush1.bf16.msra.mxu1 %v8123_v45  ;;  %v8213_v45 = vld [vmem:[%s11615_s6 + $0x470] ss:$8 sps:$4 sm:$0xff]  }
 0x3dc   : > { %1741 = vmatpush1.bf16.msra.mxu0 %v8126_v46  ;;  %1042 = vmatprep.subr.bf16.mxu1 %v8131_v47  ;;  %v8218_v46 = vld [vmem:[%s11615_s6 + $0x484] ss:$8 sps:$4 sm:$0xff]   ;;  %v8216_v47 = vld [vmem:[%s11615_s6 + $0x480] ss:$8 sps:$4 sm:$0xff]  }
 0x3dd   : > { %1742 = vmatprep.subr.bf16.mxu0 %v8134_v48  ;;  %v8221_v48 = vld [vmem:[%s11615_s6 + $0x494] ss:$8 sps:$4 sm:$0xff]  }
 0x3df   : > { %1043 = vmatpush1.bf16.msra.mxu1 %v8129_v49  ;;  %v8219_v49 = vld [vmem:[%s11615_s6 + $0x490] ss:$8 sps:$4 sm:$0xff]  }
 0x3e0   : > { %1743 = vmatpush1.bf16.msra.mxu0 %v8132_v50  ;;  %1044 = vmatprep.subr.bf16.mxu1 %v8137_v51  ;;  %v8224_v50 = vld [vmem:[%s11615_s6 + $0x4a4] ss:$8 sps:$4 sm:$0xff]   ;;  %v8222_v51 = vld [vmem:[%s11615_s6 + $0x4a0] ss:$8 sps:$4 sm:$0xff]  }
 0x3e1   : > { %1744 = vmatprep.subr.bf16.mxu0 %v8140_v52  ;;  %v8227_v52 = vld [vmem:[%s11615_s6 + $0x4b4] ss:$8 sps:$4 sm:$0xff]  }
 0x3e3   : > { %1045 = vmatpush1.bf16.msra.mxu1 %v8135_v53  ;;  %v8225_v53 = vld [vmem:[%s11615_s6 + $0x4b0] ss:$8 sps:$4 sm:$0xff]  }
 0x3e4   : > { %1745 = vmatpush1.bf16.msra.mxu0 %v8138_v54  ;;  %1046 = vmatprep.subr.bf16.mxu1 %v8143_v55  ;;  %v8230_v54 = vld [vmem:[%s11615_s6 + $0x4c4] ss:$8 sps:$4 sm:$0xff]   ;;  %v8228_v55 = vld [vmem:[%s11615_s6 + $0x4c0] ss:$8 sps:$4 sm:$0xff]  }
 0x3e5   : > { %1746 = vmatprep.subr.bf16.mxu0 %v8146_v56  ;;  %v8233_v56 = vld [vmem:[%s11615_s6 + $0x4d4] ss:$8 sps:$4 sm:$0xff]  }
 0x3e7   : > { %1047 = vmatpush1.bf16.msra.mxu1 %v8141_v57  ;;  %v8231_v57 = vld [vmem:[%s11615_s6 + $0x4d0] ss:$8 sps:$4 sm:$0xff]  }
 0x3e8   : > { %1747 = vmatpush1.bf16.msra.mxu0 %v8144_v58  ;;  %1048 = vmatprep.subr.bf16.mxu1 %v8149_v59  ;;  %v8236_v58 = vld [vmem:[%s11615_s6 + $0x4e4] ss:$8 sps:$4 sm:$0xff]   ;;  %v8234_v59 = vld [vmem:[%s11615_s6 + $0x4e0] ss:$8 sps:$4 sm:$0xff]  }
 0x3e9   : > { %1748 = vmatprep.subr.bf16.mxu0 %v8152_v60  ;;  %v8239_v60 = vld [vmem:[%s11615_s6 + $0x4f4] ss:$8 sps:$4 sm:$0xff]  }
 0x3eb   : > { %1049 = vmatpush1.bf16.msra.mxu1 %v8147_v61  ;;  %v8237_v61 = vld [vmem:[%s11615_s6 + $0x4f0] ss:$8 sps:$4 sm:$0xff]  }
 0x3ec   : > { %1749 = vmatpush1.bf16.msra.mxu0 %v8150_v3  ;;  %1050 = vmatprep.subr.bf16.mxu1 %v8155_v4  ;;  %v8242_v3 = vld [vmem:[%s11615_s6 + $0x504] ss:$8 sps:$4 sm:$0xff]   ;;  %v8240_v4 = vld [vmem:[%s11615_s6 + $0x500] ss:$8 sps:$4 sm:$0xff]  }
 0x3ed   : > { %1750 = vmatprep.subr.bf16.mxu0 %v8158_v5  ;;  %v8245_v5 = vld [vmem:[%s11615_s6 + $0x514] ss:$8 sps:$4 sm:$0xff]  }
 0x3ef   : > { %1051 = vmatpush1.bf16.msra.mxu1 %v8153_v6  ;;  %v8243_v6 = vld [vmem:[%s11615_s6 + $0x510] ss:$8 sps:$4 sm:$0xff]  }
 0x3f0   : > { %1751 = vmatpush1.bf16.msra.mxu0 %v8156_v7  ;;  %1052 = vmatprep.subr.bf16.mxu1 %v8161_v8  ;;  %v8248_v7 = vld [vmem:[%s11615_s6 + $0x524] ss:$8 sps:$4 sm:$0xff]   ;;  %v8246_v8 = vld [vmem:[%s11615_s6 + $0x520] ss:$8 sps:$4 sm:$0xff]  }
 0x3f1   : > { %1752 = vmatprep.subr.bf16.mxu0 %v8164_v9  ;;  %v8251_v9 = vld [vmem:[%s11615_s6 + $0x534] ss:$8 sps:$4 sm:$0xff]  }
 0x3f3   : > { %1053 = vmatpush1.bf16.msra.mxu1 %v8159_v2  ;;  %v8249_v2 = vld [vmem:[%s11615_s6 + $0x530] ss:$8 sps:$4 sm:$0xff]  }
 0x3f4   : > { %1753 = vmatpush1.bf16.msra.mxu0 %v8162_v10  ;;  %1054 = vmatprep.subr.bf16.mxu1 %v8167_v12  ;;  %v8254_v10 = vld [vmem:[%s11615_s6 + $0x544] ss:$8 sps:$4 sm:$0xff]   ;;  %v8252_v12 = vld [vmem:[%s11615_s6 + $0x540] ss:$8 sps:$4 sm:$0xff]  }
 0x3f5   : > { %1754 = vmatprep.subr.bf16.mxu0 %v8170_v13  ;;  %v8257_v13 = vld [vmem:[%s11615_s6 + $0x554] ss:$8 sps:$4 sm:$0xff]  }
 0x3f7   : > { %1055 = vmatpush1.bf16.msra.mxu1 %v8165_v15  ;;  %v8255_v15 = vld [vmem:[%s11615_s6 + $0x550] ss:$8 sps:$4 sm:$0xff]  }
 0x3f8   : > { %1755 = vmatpush1.bf16.msra.mxu0 %v8168_v16  ;;  %1056 = vmatprep.subr.bf16.mxu1 %v8173_v17  ;;  %v8260_v16 = vld [vmem:[%s11615_s6 + $0x564] ss:$8 sps:$4 sm:$0xff]   ;;  %v8258_v17 = vld [vmem:[%s11615_s6 + $0x560] ss:$8 sps:$4 sm:$0xff]  }
 0x3f9   : > { %1756 = vmatprep.subr.bf16.mxu0 %v8176_v18  ;;  %v8263_v18 = vld [vmem:[%s11615_s6 + $0x574] ss:$8 sps:$4 sm:$0xff]  }
 0x3fb   : > { %1057 = vmatpush1.bf16.msra.mxu1 %v8171_v19  ;;  %v8261_v19 = vld [vmem:[%s11615_s6 + $0x570] ss:$8 sps:$4 sm:$0xff]  }
 0x3fc   : > { %1757 = vmatpush1.bf16.msra.mxu0 %v8174_v20  ;;  %1058 = vmatprep.subr.bf16.mxu1 %v8179_v21  ;;  %v8266_v20 = vld [vmem:[%s11615_s6 + $0x584] ss:$8 sps:$4 sm:$0xff]   ;;  %v8264_v21 = vld [vmem:[%s11615_s6 + $0x580] ss:$8 sps:$4 sm:$0xff]  }
 0x3fd   : > { %1758 = vmatprep.subr.bf16.mxu0 %v8182_v22  ;;  %v8269_v22 = vld [vmem:[%s11615_s6 + $0x594] ss:$8 sps:$4 sm:$0xff]  }
 0x3ff   : > { %1059 = vmatpush1.bf16.msra.mxu1 %v8177_v23  ;;  %v8267_v23 = vld [vmem:[%s11615_s6 + $0x590] ss:$8 sps:$4 sm:$0xff]  }
 0x400   : > { %1759 = vmatpush1.bf16.msra.mxu0 %v8180_v24  ;;  %1060 = vmatprep.subr.bf16.mxu1 %v8185_v0  ;;  %v8272_v24 = vld [vmem:[%s11615_s6 + $0x5a4] ss:$8 sps:$4 sm:$0xff]   ;;  %v8270_v0 = vld [vmem:[%s11615_s6 + $0x5a0] ss:$8 sps:$4 sm:$0xff]  }
 0x401   : > { %1760 = vmatprep.subr.bf16.mxu0 %v8188_v62  ;;  %v8275_v62 = vld [vmem:[%s11615_s6 + $0x5b4] ss:$8 sps:$4 sm:$0xff]  }
 0x403   : > { %1061 = vmatpush1.bf16.msra.mxu1 %v8183_v63  ;;  %v8273_v63 = vld [vmem:[%s11615_s6 + $0x5b0] ss:$8 sps:$4 sm:$0xff]  }
 0x404   : > { %1761 = vmatpush1.bf16.msra.mxu0 %v8186_v27  ;;  %1062 = vmatprep.subr.bf16.mxu1 %v8191_v28  ;;  %v8278_v27 = vld [vmem:[%s11615_s6 + $0x5c4] ss:$8 sps:$4 sm:$0xff]   ;;  %v8276_v28 = vld [vmem:[%s11615_s6 + $0x5c0] ss:$8 sps:$4 sm:$0xff]  }
 0x405   : > { %2446 = vmatprep.subr.bf16.mxu0 %v8194_v29  ;;  %v8281_v29 = vld [vmem:[%s11615_s6 + $0x5d4] ss:$8 sps:$4 sm:$0xff]  }
 0x407   : > { %1763 = vmatmul.mubr.bf16.vlgmr.msra.gmra.mrb[8].mxu0 %v8949_v25  ;;  %1063 = vmatpush1.bf16.msra.mxu1 %v8189_v30  ;;  %v8279_v30 = vld [vmem:[%s11615_s6 + $0x5d0] ss:$8 sps:$4 sm:$0xff]  }
 0x408   : > { %2447 = vmatpush1.bf16.msra.mxu0 %v8192_v31  ;;  %2478 = vmatprep.mubr.bf16.mxu0 %v8951_v26  ;;  %v8284_v31 = vld [vmem:[%s11615_s6 + $0x5e4] ss:$8 sps:$4 sm:$0xff]  }
 0x409   : > { %2448 = vmatprep.subr.bf16.mxu0 %v8197_v32  ;;  %v8282_v32 = vld [vmem:[%s11615_s6 + $0x5e0] ss:$8 sps:$4 sm:$0xff]  }
 0x40a   : > { %1065 = vmatmul.mubr.bf16.vlgmr.msra.gmra.mrb[4].mxu1 %v8949_v25 }
 0x40b   : > { %1364 = vmatprep.mubr.bf16.mxu1 %v11622_v1 }
 0x40c   : > { %2449 = vmatpush1.bf16.msra.mxu0 %v8195_v33  ;;  %v8287_v33 = vld [vmem:[%s11615_s6 + $0x5f4] ss:$8 sps:$4 sm:$0xff]  }
 0x40d   : > { %2450 = vmatprep.subr.bf16.mxu0 %v8200_v34  ;;  %v8285_v34 = vld [vmem:[%s11615_s6 + $0x5f0] ss:$8 sps:$4 sm:$0xff]  }
 0x410   : > { %2451 = vmatpush1.bf16.msra.mxu0 %v8198_v35  ;;  %v8290_v35 = vld [vmem:[%s11615_s6 + $0x704] ss:$8 sps:$4 sm:$0xff]  }
 0x411   : > { %2452 = vmatprep.subr.bf16.mxu0 %v8203_v36  ;;  %v8288_v36 = vld [vmem:[%s11615_s6 + $0x700] ss:$8 sps:$4 sm:$0xff]  }
 0x414   : > { %2453 = vmatpush1.bf16.msra.mxu0 %v8201_v37  ;;  %v8293_v37 = vld [vmem:[%s11615_s6 + $0x714] ss:$8 sps:$4 sm:$0xff]  }
 0x415   : > { %2454 = vmatprep.subr.bf16.mxu0 %v8206_v38  ;;  %v8291_v38 = vld [vmem:[%s11615_s6 + $0x710] ss:$8 sps:$4 sm:$0xff]  }
 0x418   : > { %2455 = vmatpush1.bf16.msra.mxu0 %v8204_v39  ;;  %v8296_v39 = vld [vmem:[%s11615_s6 + $0x724] ss:$8 sps:$4 sm:$0xff]  }
 0x419   : > { %2456 = vmatprep.subr.bf16.mxu0 %v8209_v40  ;;  %v8294_v40 = vld [vmem:[%s11615_s6 + $0x720] ss:$8 sps:$4 sm:$0xff]  }
 0x41c   : > { %2457 = vmatpush1.bf16.msra.mxu0 %v8207_v41  ;;  %v8299_v41 = vld [vmem:[%s11615_s6 + $0x734] ss:$8 sps:$4 sm:$0xff]  }
 0x41d   : > { %2458 = vmatprep.subr.bf16.mxu0 %v8212_v42  ;;  %v8297_v42 = vld [vmem:[%s11615_s6 + $0x730] ss:$8 sps:$4 sm:$0xff]  }
 0x420   : > { %2459 = vmatpush1.bf16.msra.mxu0 %v8210_v43  ;;  %v8302_v43 = vld [vmem:[%s11615_s6 + $0x744] ss:$8 sps:$4 sm:$0xff]  }
 0x421   : > { %2460 = vmatprep.subr.bf16.mxu0 %v8215_v44  ;;  %v9381_v44 = vpop.permute.xlu1 %673 }
 0x424   : > { %2461 = vmatpush1.bf16.msra.mxu0 %v8213_v45  ;;  %v8300_v45 = vld [vmem:[%s11615_s6 + $0x740] ss:$8 sps:$4 sm:$0xff]  }
 0x425   : > { %2462 = vmatprep.subr.bf16.mxu0 %v8218_v46  ;;  %v8305_v46 = vld [vmem:[%s11615_s6 + $0x754] ss:$8 sps:$4 sm:$0xff]  }
 0x428   : > { %2463 = vmatpush1.bf16.msra.mxu0 %v8216_v47  ;;  %v8303_v47 = vld [vmem:[%s11615_s6 + $0x750] ss:$8 sps:$4 sm:$0xff]  }
 0x429   : > { %2464 = vmatprep.subr.bf16.mxu0 %v8221_v48  ;;  %v9392_v48 = vpop.permute.xlu1 %702 }
 0x42c   : > { %2465 = vmatpush1.bf16.msra.mxu0 %v8219_v49  ;;  %v8308_v49 = vld [vmem:[%s11615_s6 + $0x764] ss:$8 sps:$4 sm:$0xff]  }
 0x42d   : > { %2466 = vmatprep.subr.bf16.mxu0 %v8224_v50 }
 0x430   : > { %2467 = vmatpush1.bf16.msra.mxu0 %v8222_v51 }
 0x431   : > { %2468 = vmatprep.subr.bf16.mxu0 %v8227_v52 }
 0x434   : > { %2469 = vmatpush1.bf16.msra.mxu0 %v8225_v53 }
 0x435   : > { %2470 = vmatprep.subr.bf16.mxu0 %v8230_v54 }
 0x438   : > { %2471 = vmatpush1.bf16.msra.mxu0 %v8228_v55  ;;  %v8306_v55 = vld [vmem:[%s11615_s6 + $0x760] ss:$8 sps:$4 sm:$0xff]  }
 0x439   : > { %2472 = vmatprep.subr.bf16.mxu0 %v8233_v56 }
 0x43c   : > { %2473 = vmatpush1.bf16.msra.mxu0 %v8231_v57 }
 0x43d   : > { %2474 = vmatprep.subr.bf16.mxu0 %v8236_v58 }
 0x440   : > { %2475 = vmatpush1.bf16.msra.mxu0 %v8234_v59  ;;  %v8311_v59 = vld [vmem:[%s11615_s6 + $0x774] ss:$8 sps:$4 sm:$0xff]  }
 0x441   : > { %2476 = vmatprep.subr.bf16.mxu0 %v8239_v60  ;;  %v9406_v60 = vpop.permute.xlu0 %678 }
 0x444   : > { %2477 = vmatpush1.bf16.msra.mxu0 %v8237_v61 }
 0x445   : > { %2804 = vmatprep.subr.bf16.mxu0 %v8242_v3 }
 0x447   : > { %2479 = vmatmul.mubr.bf16.vlgmr.msra.gmra.mrb[12].mxu0 %v8949_v25 }
 0x448   : > { %2805 = vmatpush1.bf16.msra.mxu0 %v8240_v4  ;;  %2836 = vmatprep.mubr.bf16.mxu0 %v8951_v26 }
 0x449   : > { %2806 = vmatprep.subr.bf16.mxu0 %v8245_v5  ;;  %v8312_v5 = vld [vmem:[%s11611_s2 + $0x8] sm:$0xff]  }
 0x44c   : > { %2807 = vmatpush1.bf16.msra.mxu0 %v8243_v6  ;;  %v9418_v6 = vpop.permute.xlu1 %707 }
 0x44d   : > { %2808 = vmatprep.subr.bf16.mxu0 %v8248_v7 }
 0x450   : > { %2809 = vmatpush1.bf16.msra.mxu0 %v8246_v8 }
 0x451   : > { %2810 = vmatprep.subr.bf16.mxu0 %v8251_v9 }
 0x454   : > { %2811 = vmatpush1.bf16.msra.mxu0 %v8249_v2 }
 0x455   : > { %2812 = vmatprep.subr.bf16.mxu0 %v8254_v10 }
 0x458   : > { %2813 = vmatpush1.bf16.msra.mxu0 %v8252_v12 }
 0x459   : > { %2814 = vmatprep.subr.bf16.mxu0 %v8257_v13  ;;  %v8309_v13 = vld [vmem:[%s11615_s6 + $0x770] ss:$8 sps:$4 sm:$0xff]  }
 0x45c   : > { %2815 = vmatpush1.bf16.msra.mxu0 %v8255_v15  ;;  %v8315_v15 = vld [vmem:[%s11615_s6 + $0x784] ss:$8 sps:$4 sm:$0xff]  }
 0x45d   : > { %2816 = vmatprep.subr.bf16.mxu0 %v8260_v16 }
 0x460   : > { %2817 = vmatpush1.bf16.msra.mxu0 %v8258_v17 }
 0x461   : > { %2818 = vmatprep.subr.bf16.mxu0 %v8263_v18 }
 0x464   : > { %2819 = vmatpush1.bf16.msra.mxu0 %v8261_v19 }
 0x465   : > { %2820 = vmatprep.subr.bf16.mxu0 %v8266_v20 }
 0x468   : > { %2821 = vmatpush1.bf16.msra.mxu0 %v8264_v21 }
 0x469   : > { %2822 = vmatprep.subr.bf16.mxu0 %v8269_v22  ;;  %v8313_v22 = vld [vmem:[%s11615_s6 + $0x780] ss:$8 sps:$4 sm:$0xff]  }
 0x46c   : > { %2823 = vmatpush1.bf16.msra.mxu0 %v8267_v23 }
 0x46d   : > { %2824 = vmatprep.subr.bf16.mxu0 %v8272_v24 }
 0x470   : > { %2825 = vmatpush1.bf16.msra.mxu0 %v8270_v0  ;;  %v8318_v0 = vld [vmem:[%s11615_s6 + $0x794] ss:$8 sps:$4 sm:$0xff]  }
 0x471   : > { %2826 = vmatprep.subr.bf16.mxu0 %v8275_v62  ;;  %v8337_v62 = vld [vmem:[%s11613_s4 + $0x8] sm:$0xff]  }
 0x474   : > { %2827 = vmatpush1.bf16.msra.mxu0 %v8273_v63  ;;  %v8316_v63 = vld [vmem:[%s11615_s6 + $0x790] ss:$8 sps:$4 sm:$0xff]  }
 0x475   : > { %2828 = vmatprep.subr.bf16.mxu0 %v8278_v27  ;;  %v8321_v27 = vld [vmem:[%s11615_s6 + $0x7a4] ss:$8 sps:$4 sm:$0xff]  }
 0x478   : > { %2829 = vmatpush1.bf16.msra.mxu0 %v8276_v28  ;;  %v8319_v28 = vld [vmem:[%s11615_s6 + $0x7a0] ss:$8 sps:$4 sm:$0xff]  }
 0x479   : > { %2830 = vmatprep.subr.bf16.mxu0 %v8281_v29  ;;  %v8324_v29 = vld [vmem:[%s11615_s6 + $0x7b4] ss:$8 sps:$4 sm:$0xff]  }
 0x47c   : > { %2831 = vmatpush1.bf16.msra.mxu0 %v8279_v30  ;;  %v8322_v30 = vld [vmem:[%s11615_s6 + $0x7b0] ss:$8 sps:$4 sm:$0xff]  }
 0x47d   : > { %2832 = vmatprep.subr.bf16.mxu0 %v8284_v31  ;;  %v8327_v31 = vld [vmem:[%s11615_s6 + $0x7c4] ss:$8 sps:$4 sm:$0xff]  }
 0x480   : > { %2833 = vmatpush1.bf16.msra.mxu0 %v8282_v32  ;;  %v8325_v32 = vld [vmem:[%s11615_s6 + $0x7c0] ss:$8 sps:$4 sm:$0xff]  }
 0x481   : > { %2834 = vmatprep.subr.bf16.mxu0 %v8287_v33  ;;  %v8330_v33 = vld [vmem:[%s11615_s6 + $0x7d4] ss:$8 sps:$4 sm:$0xff]  }
 0x484   : > { %2835 = vmatpush1.bf16.msra.mxu0 %v8285_v34  ;;  %v8328_v34 = vld [vmem:[%s11615_s6 + $0x7d0] ss:$8 sps:$4 sm:$0xff]  }
 0x485   : > { %3520 = vmatprep.subr.bf16.mxu0 %v8290_v35  ;;  %v8333_v35 = vld [vmem:[%s11615_s6 + $0x7e4] ss:$8 sps:$4 sm:$0xff]  }
 0x487   : > { %2837 = vmatmul.mubr.bf16.vlgmr.msra.gmra.mrb[16].mxu0 %v8949_v25 }
 0x488   : > { %3521 = vmatpush1.bf16.msra.mxu0 %v8288_v36  ;;  %3552 = vmatprep.mubr.bf16.mxu0 %v8951_v26  ;;  %v8331_v36 = vld [vmem:[%s11615_s6 + $0x7e0] ss:$8 sps:$4 sm:$0xff]  }
 0x489   : > { %3522 = vmatprep.subr.bf16.mxu0 %v8293_v37  ;;  %v8336_v37 = vld [vmem:[%s11615_s6 + $0x7f4] ss:$8 sps:$4 sm:$0xff]  }
 0x48c   : > { %3523 = vmatpush1.bf16.msra.mxu0 %v8291_v38  ;;  %v8334_v38 = vld [vmem:[%s11615_s6 + $0x7f0] ss:$8 sps:$4 sm:$0xff]  }
 0x48d   : > { %3524 = vmatprep.subr.bf16.mxu0 %v8296_v39 }
 0x490   : > { %3525 = vmatpush1.bf16.msra.mxu0 %v8294_v40 }
 0x491   : > { %3526 = vmatprep.subr.bf16.mxu0 %v8299_v41 }
 0x494   : > { %3527 = vmatpush1.bf16.msra.mxu0 %v8297_v42 }
 0x495   : > { %3528 = vmatprep.subr.bf16.mxu0 %v8302_v43 }
 0x498   : > { %3529 = vmatpush1.bf16.msra.mxu0 %v8300_v45 }
 0x499   : > { %3530 = vmatprep.subr.bf16.mxu0 %v8305_v46 }
 0x49a   : > { %v1306_v50 = vpop.f32.mrb[4].mxu0 }
 0x49b   : > { %v1313_v51 = vpack.c.bf16 %v1306_v50, %v1306_v50  ;;  %v1308_v52 = vpop.f32.mrb[5].mxu0 }
 0x49c   : > { %v1314_v53 = vpack.c.bf16 %v1308_v52, %v1308_v52  ;;  %3531 = vmatpush1.bf16.msra.mxu0 %v8303_v47  ;;  %v1310_v54 = vpop.f32.mrb[6].mxu0  ;;  %v8338_v52 = vld [vmem:[%s11611_s2] sm:$0xff]  }
 0x49d   : > { %v1327_v56 = vsel %vm611_vm1, %v1313_v51, 0  ;;  %v9401_v57 = vpop.f32.mrb[0].mxu1  ;;  %v1311_v58 = vpop.f32.mrb[7].mxu0  ;;  %3532 = vmatprep.subr.bf16.mxu0 %v8308_v49 }
 0x49e   : > { %v681_v61 = vmul.f32 %v9381_v44, %v9401_v57  ;;  %v710_v3 = vmul.f32 %v9392_v48, %v9401_v57  ;;  %v9412_v4 = vpop.f32.mrb[1].mxu1  ;;  %7282 = vmatprep.subr.msk.bf16.mxu1 %vm611_vm1, %v1314_v53  ;;  %v8340_v58 = vld [vmem:[%s11611_s2 + $0x10] sm:$0xff]  }
 0x49f   : > { %v682_v7 = vmul.f32 %v9381_v44, %v9412_v4  ;;  %v711_v8 = vmul.f32 %v9392_v48, %v9412_v4  ;;  %v9424_v9 = vpop.f32.mrb[2].mxu1  ;;  %1333 = vmatpush1.bf16.msra.mxu1 %v1327_v56 }
 0x4a0   : > { %v683_v2 = vmul.f32 %v9406_v60, %v9424_v9  ;;  %v712_v10 = vmul.f32 %v9418_v6, %v9424_v9  ;;  %3533 = vmatpush1.bf16.msra.mxu0 %v8306_v55  ;;  %v9430_v12 = vpop.f32.mrb[3].mxu1  ;;  %7287 = vmatprep.subr.msk.bf16.mxu1 %vm611_vm1, %v1314_v53  ;;  %v8339_v55 = vld [vmem:[%s11613_s4] sm:$0xff]  }
 0x4a1   : > { %3534 = vmatprep.subr.bf16.mxu0 %v8311_v59  ;;  %v685_v16 = vadd.f32 %v682_v7, %v681_v61  ;;  %v714_v17 = vadd.f32 %v711_v8, %v710_v3  ;;  %v684_v18 = vmul.f32 %v9406_v60, %v9430_v12  ;;  %v713_v20 = vmul.f32 %v9418_v6, %v9430_v12  ;;  %v8343_v59 = vld [vmem:[%s11615_s6 + $0x304] ss:$8 sps:$4 sm:$0xff]   ;;  %v8344_v61 = vld [vmem:[%s11613_s4 + $0x10] sm:$0xff]   ;;  %v8341_v3 = vld [vmem:[%s11615_s6 + $0x300] ss:$8 sps:$4 sm:$0xff]  }
 0x4a2   : > { %7283 = vmatmul.mubr.msk.bf16.vlgmr.msra.gmra.mrb[8].mxu1 %vm607_vm2, %v8312_v5  ;;  %v8347_v5 = vld [vmem:[%s11615_s6 + $0x314] ss:$8 sps:$4 sm:$0xff]   ;;  %v8345_v7 = vld [vmem:[%s11615_s6 + $0x310] ss:$8 sps:$4 sm:$0xff]   ;;  %v8350_v8 = vld [vmem:[%s11615_s6 + $0x324] ss:$8 sps:$4 sm:$0xff]  }
 0x4a3   : > { %1387 = vmatpush1.bf16.msra.mxu1 %v1327_v56  ;;  %v686_v19 = vadd.f32 %v685_v16, %v683_v2  ;;  %v715_v21 = vadd.f32 %v714_v17, %v712_v10  ;;  %1418 = vmatprep.mubr.bf16.mxu1 %v11622_v1  ;;  %v8348_v2 = vld [vmem:[%s11615_s6 + $0x320] ss:$8 sps:$4 sm:$0xff]   ;;  %v8353_v10 = vld [vmem:[%s11615_s6 + $0x334] ss:$8 sps:$4 sm:$0xff]  }
 0x4a4   : > { %3535 = vmatpush1.bf16.msra.mxu0 %v8309_v13  ;;  %v8351_v13 = vld [vmem:[%s11615_s6 + $0x330] ss:$8 sps:$4 sm:$0xff]   ;;  %v8354_v16 = vld [vmem:[%s11615_s6 + $0x340] ss:$8 sps:$4 sm:$0xff]   ;;  %v8359_v17 = vld [vmem:[%s11615_s6 + $0x354] ss:$8 sps:$4 sm:$0xff]  }
 0x4a5   : > { %3536 = vmatprep.subr.bf16.mxu0 %v8315_v15  ;;  %v687_v23 = vadd.f32 %v686_v19, %v684_v18  ;;  %v716_v24 = vadd.f32 %v715_v21, %v713_v20  ;;  %v8356_v15 = vld [vmem:[%s11615_s6 + $0x344] ss:$8 sps:$4 sm:$0xff]   ;;  %v8357_v18 = vld [vmem:[%s11615_s6 + $0x350] ss:$8 sps:$4 sm:$0xff]   ;;  %v8360_v20 = vld [vmem:[%s11615_s6 + $0x360] ss:$8 sps:$4 sm:$0xff]  }
 0x4a6   : > { %v8362_v19 = vld [vmem:[%s11615_s6 + $0x364] ss:$8 sps:$4 sm:$0xff]   ;;  %v8365_v21 = vld [vmem:[%s11615_s6 + $0x374] ss:$8 sps:$4 sm:$0xff]  }
 0x4a7   : > { %688 = vadd.xlane.f32.xlu1 %v687_v23  ;;  %717 = vadd.xlane.f32.xlu0 %v716_v24  ;;  %v8368_v23 = vld [vmem:[%s11615_s6 + $0x384] ss:$8 sps:$4 sm:$0xff]  }
 0x4a8   : > { %3537 = vmatpush1.bf16.msra.mxu0 %v8313_v22  ;;  %v8363_v22 = vld [vmem:[%s11615_s6 + $0x370] ss:$8 sps:$4 sm:$0xff]  }
 0x4a9   : > { %3538 = vmatprep.subr.bf16.mxu0 %v8318_v0  ;;  %v8366_v0 = vld [vmem:[%s11615_s6 + $0x380] ss:$8 sps:$4 sm:$0xff]  }
 0x4aa   : > { %7288 = vmatmul.mubr.msk.bf16.vlgmr.msra.gmra.mrb[12].mxu1 %vm607_vm2, %v8337_v62 }
 0x4ab   : > { %1475 = vmatprep.mubr.bf16.mxu1 %v11622_v1 }
 0x4ac   : > { %3539 = vmatpush1.bf16.msra.mxu0 %v8316_v63  ;;  %v8371_v63 = vld [vmem:[%s11615_s6 + $0x394] ss:$8 sps:$4 sm:$0xff]  }
 0x4ad   : > { %3540 = vmatprep.subr.bf16.mxu0 %v8321_v27 }
 0x4b0   : > { %3541 = vmatpush1.bf16.msra.mxu0 %v8319_v28 }
 0x4b1   : > { %3542 = vmatprep.subr.bf16.mxu0 %v8324_v29  ;;  %v8369_v29 = vld [vmem:[%s11615_s6 + $0x390] ss:$8 sps:$4 sm:$0xff]  }
 0x4b4   : > { %3543 = vmatpush1.bf16.msra.mxu0 %v8322_v30  ;;  %v8374_v30 = vld [vmem:[%s11615_s6 + $0x3a4] ss:$8 sps:$4 sm:$0xff]  }
 0x4b5   : > { %3544 = vmatprep.subr.bf16.mxu0 %v8327_v31  ;;  %v8372_v31 = vld [vmem:[%s11615_s6 + $0x3a0] ss:$8 sps:$4 sm:$0xff]  }
 0x4b8   : > { %3545 = vmatpush1.bf16.msra.mxu0 %v8325_v32  ;;  %v8377_v32 = vld [vmem:[%s11615_s6 + $0x3b4] ss:$8 sps:$4 sm:$0xff]  }
 0x4b9   : > { %3546 = vmatprep.subr.bf16.mxu0 %v8330_v33  ;;  %v8375_v33 = vld [vmem:[%s11615_s6 + $0x3b0] ss:$8 sps:$4 sm:$0xff]  }
 0x4bc   : > { %3547 = vmatpush1.bf16.msra.mxu0 %v8328_v34  ;;  %v8380_v34 = vld [vmem:[%s11615_s6 + $0x3c4] ss:$8 sps:$4 sm:$0xff]  }
 0x4bd   : > { %3548 = vmatprep.subr.bf16.mxu0 %v8333_v35  ;;  %v8378_v35 = vld [vmem:[%s11615_s6 + $0x3c0] ss:$8 sps:$4 sm:$0xff]  }
 0x4c0   : > { %3549 = vmatpush1.bf16.msra.mxu0 %v8331_v36  ;;  %v8383_v36 = vld [vmem:[%s11615_s6 + $0x3d4] ss:$8 sps:$4 sm:$0xff]  }
 0x4c1   : > { %3550 = vmatprep.subr.bf16.mxu0 %v8336_v37  ;;  %v8381_v37 = vld [vmem:[%s11615_s6 + $0x3d0] ss:$8 sps:$4 sm:$0xff]  }
 0x4c4   : > { %3551 = vmatpush1.bf16.msra.mxu0 %v8334_v38  ;;  %v8386_v38 = vld [vmem:[%s11615_s6 + $0x3e4] ss:$8 sps:$4 sm:$0xff]  }
 0x4c7   : > { %3553 = vmatmul.mubr.bf16.vlgmr.msra.gmra.mrb[20].mxu0 %v8949_v25 }
 0x4da   : > { %v1764_v39 = vpop.f32.mrb[8].mxu0 }
 0x4db   : > { %v1766_v40 = vpop.f32.mrb[9].mxu0  ;;  %v1771_v54 = vpack.c.bf16 %v1764_v39, %v1764_v39  ;;  %v8384_v39 = vld [vmem:[%s11615_s6 + $0x3e0] ss:$8 sps:$4 sm:$0xff]  }
 0x4dc   : > { %v1768_v41 = vpop.f32.mrb[10].mxu0  ;;  %v1772_v53 = vpack.c.bf16 %v1766_v40, %v1766_v40  ;;  %v8389_v40 = vld [vmem:[%s11615_s6 + $0x3f4] ss:$8 sps:$4 sm:$0xff]  }
 0x4dd   : > { %v1769_v42 = vpop.f32.mrb[11].mxu0  ;;  %v1066_v43 = vpop.f32.mrb[4].mxu1  ;;  %v1785_v56 = vsel %vm611_vm1, %v1771_v54, 0 }
 0x4de   : > { %v1073_v45 = vpack.c.bf16 %v1066_v43, %v1066_v43  ;;  %v1068_v46 = vpop.f32.mrb[5].mxu1 }
 0x4df   : > { %v1074_v47 = vpack.c.bf16 %v1068_v46, %v1068_v46  ;;  %v1070_v49 = vpop.f32.mrb[6].mxu1  ;;  %v8387_v46 = vld [vmem:[%s11615_s6 + $0x3f0] ss:$8 sps:$4 sm:$0xff]  }
 0x4e0   : > { %v1438_v50 = vsel %vm611_vm1, %v1073_v45, 0  ;;  %v1071_v51 = vpop.f32.mrb[7].mxu1 }
 0x4e1   : > { %7290 = vmatprep.subr.msk.bf16.mxu1 %vm611_vm1, %v1074_v47 }
 0x4e2   : > { %1444 = vmatpush1.bf16.msra.mxu1 %v1438_v50 }
 0x4e3   : > { %7293 = vmatprep.subr.msk.bf16.mxu1 %vm611_vm1, %v1074_v47 }
 0x4e5   : > { %7291 = vmatmul.mubr.msk.bf16.vlgmr.msra.gmra.mrb[8].mxu1 %vm607_vm2, %v8338_v52 }
 0x4e6   : > { %1495 = vmatpush1.bf16.msra.mxu1 %v1438_v50  ;;  %1526 = vmatprep.mubr.bf16.mxu1 %v11622_v1 }
 0x4e7   : > { %7362 = vmatprep.subr.msk.bf16.mxu1 %vm611_vm1, %v1772_v53 }
 0x4ed   : > { %7294 = vmatmul.mubr.msk.bf16.vlgmr.msra.gmra.mrb[12].mxu1 %vm607_vm2, %v8339_v55 }
 0x4ee   : > { %1791 = vmatpush1.bf16.msra.mxu1 %v1785_v56  ;;  %1822 = vmatprep.mubr.bf16.mxu1 %v11622_v1 }
 0x4ef   : > { %7367 = vmatprep.subr.msk.bf16.mxu1 %vm611_vm1, %v1772_v53 }
 0x4f5   : > { %7363 = vmatmul.mubr.msk.bf16.vlgmr.msra.gmra.mrb[8].mxu1 %vm607_vm2, %v8340_v58 }
 0x4f6   : > { %1845 = vmatpush1.bf16.msra.mxu1 %v1785_v56  ;;  %1876 = vmatprep.mubr.bf16.mxu1 %v11622_v1 }
 0x4f7   : > { %2088 = vmatprep.subr.bf16.mxu1 %v8343_v59 }
 0x4fd   : > { %7368 = vmatmul.mubr.msk.bf16.vlgmr.msra.gmra.mrb[12].mxu1 %vm607_vm2, %v8344_v61 }
 0x4fe   : > { %2089 = vmatpush1.bf16.msra.mxu1 %v8341_v3  ;;  %2120 = vmatprep.mubr.bf16.mxu1 %v8951_v26 }
 0x4ff   : > { %2090 = vmatprep.subr.bf16.mxu1 %v8347_v5 }
 0x502   : > { %2091 = vmatpush1.bf16.msra.mxu1 %v8345_v7 }
 0x503   : > { %2092 = vmatprep.subr.bf16.mxu1 %v8350_v8 }
 0x506   : > { %2093 = vmatpush1.bf16.msra.mxu1 %v8348_v2 }
 0x507   : > { %2094 = vmatprep.subr.bf16.mxu1 %v8353_v10 }
 0x50a   : > { %2095 = vmatpush1.bf16.msra.mxu1 %v8351_v13 }
 0x50b   : > { %2096 = vmatprep.subr.bf16.mxu1 %v8356_v15 }
 0x50e   : > { %2097 = vmatpush1.bf16.msra.mxu1 %v8354_v16  ;;  %v9633_v16 = vld [vmem:[%s11618_s9 + $0x20] sm:$0xff] }
 0x50f   : > { %2098 = vmatprep.subr.bf16.mxu1 %v8359_v17 }
 0x512   : > { %2099 = vmatpush1.bf16.msra.mxu1 %v8357_v18  ;;  %v9639_v18 = vld [vmem:[%s11618_s9 + $0x28] sm:$0xff] }
 0x513   : > { %2100 = vmatprep.subr.bf16.mxu1 %v8362_v19 }
 0x516   : > { %2101 = vmatpush1.bf16.msra.mxu1 %v8360_v20  ;;  %v9645_v20 = vld [vmem:[%s11617_s8 + $0x20] sm:$0xff] }
 0x517   : > { %2102 = vmatprep.subr.bf16.mxu1 %v8365_v21 }
 0x51a   : > { %2103 = vmatpush1.bf16.msra.mxu1 %v8363_v22  ;;  %v9573_v24 = vpop.f32.mrb[12].mxu0 }
 0x51b   : > { %v9578_v62 = vpop.f32.mrb[13].mxu0  ;;  %2104 = vmatprep.subr.bf16.mxu1 %v8368_v23  ;;  %v9648_v23 = vsub.f32 1.0, %v9645_v20 }
 0x51c   : > { %v2484_v27 = vpop.f32.mrb[14].mxu0 }
 0x51d   : > { %v2485_v28 = vpop.f32.mrb[15].mxu0 }
 0x51e   : > { %2105 = vmatpush1.bf16.msra.mxu1 %v8366_v0  ;;  %v9654_v0 = vld [vmem:[%s11617_s8 + $0x28] sm:$0xff] }
 0x51f   : > { %2106 = vmatprep.subr.bf16.mxu1 %v8371_v63  ;;  %v9658_v63 = vsub.f32 1.0, %v9654_v0 }
 0x522   : > { %2107 = vmatpush1.bf16.msra.mxu1 %v8369_v29 }
 0x523   : > { %2108 = vmatprep.subr.bf16.mxu1 %v8374_v30 }
 0x526   : > { %2109 = vmatpush1.bf16.msra.mxu1 %v8372_v31 }
 0x527   : > { %2110 = vmatprep.subr.bf16.mxu1 %v8377_v32 }
 0x52a   : > { %2111 = vmatpush1.bf16.msra.mxu1 %v8375_v33 }
 0x52b   : > { %2112 = vmatprep.subr.bf16.mxu1 %v8380_v34 }
 0x52e   : > { %2113 = vmatpush1.bf16.msra.mxu1 %v8378_v35 }
 0x52f   : > { %2114 = vmatprep.subr.bf16.mxu1 %v8383_v36 }
 0x532   : > { %2115 = vmatpush1.bf16.msra.mxu1 %v8381_v37 }
 0x533   : > { %2116 = vmatprep.subr.bf16.mxu1 %v8386_v38 }
 0x534   : > { %v718_v41 = vpop.xlane.xlu0 %717  ;;  %v689_v42 = vpop.xlane.xlu1 %688 }
 0x535   : > { %v719_v43 = vrot.slane %v718_v41, 4  ;;  %v690_v45 = vrot.slane %v689_v42, 4 }
 0x536   : > { %2117 = vmatpush1.bf16.msra.mxu1 %v8384_v39 }
 0x537   : > { %v720_v47 = vadd.f32 %v719_v43, %v718_v41  ;;  %v691_v49 = vadd.f32 %v690_v45, %v689_v42  ;;  %2118 = vmatprep.subr.bf16.mxu1 %v8389_v40 }
 0x539   : > { %v692_v50 = vrot.slane %v691_v49, 2  ;;  %v721_v51 = vrot.slane %v720_v47, 2 }
 0x53a   : > { %2119 = vmatpush1.bf16.msra.mxu1 %v8387_v46 }
 0x53b   : > { %v693_v52 = vadd.f32 %v692_v50, %v691_v49  ;;  %v722_v53 = vadd.f32 %v721_v51, %v720_v47 }
 0x53d   : > { %2121 = vmatmul.mubr.bf16.vlgmr.msra.gmra.mrb[16].mxu1 %v8949_v25  ;;  %v694_v54 = vrot.slane %v693_v52, 1  ;;  %v723_v55 = vrot.slane %v722_v53, 1 }
 0x53e   : > { %2180 = vmatprep.mubr.bf16.mxu1 %v11622_v1 }
 0x53f   : > { %v695_v56 = vadd.f32 %v694_v54, %v693_v52  ;;  %v724_v58 = vadd.f32 %v723_v55, %v722_v53 }
 0x541   : > { %7925 = vpush %v695_v56 }
 0x542   : > { %7927 = vpush %v724_v58 }
 0x55a   : > { %v9624_v59 = vpop.f32.mrb[16].mxu0 }
 0x55b   : > { %v9626_v61 = vpop.f32.mrb[17].mxu0 }
 0x55c   : > { %v2842_v3 = vpop.f32.mrb[18].mxu0 }
 0x55d   : > { %v2843_v5 = vpop.f32.mrb[19].mxu0  ;;  %v2487_v3 = vpack.c.bf16 %v9573_v24, %v9573_v24  ;;  %v2846_v24 = vpack.c.bf16 %v9626_v61, %v9626_v61  ;;  %v8394_v61 = vld [vmem:[%s11611_s2 + $0x28] sm:$0xff]  }
 0x55e   : > { %v8391_v5 = vld [vmem:[%s11613_s4 + $0x18] sm:$0xff]  }
 0x572   : > { %s7926_s13 = spop %7925 }
 0x573   : > { %v697_v7 = vstv %s7926_s13  ;;  %s7928_s14 = spop %7927 }
 0x574   : > { %v699_v8 = vmul.f32 0.00048828125, %v697_v7  ;;  %v726_v2 = vstv %s7928_s14  ;;  %v2501_v7 = vsel %vm611_vm1, %v2487_v3, 0 }
 0x575   : > { %v727_v10 = vmul.f32 0.00048828125, %v726_v2  ;;  %v8393_v2 = vld [vmem:[%s11613_s4 + $0x20] sm:$0xff]  }
 0x576   : > { %v728_v13 = vmul.f32 %v699_v8, %v8940_v14  ;;  %v729_v15 = vmul.f32 %v699_v8, %v8828_v11  ;;  %v2845_v8 = vpack.c.bf16 %v9624_v59, %v9624_v59  ;;  %v8397_v59 = vld [vmem:[%s11615_s6 + $0x604] ss:$8 sps:$4 sm:$0xff]  }
 0x577   : > { %v730_v17 = vmul.f32 %v9633_v16, %v727_v10  ;;  %v731_v19 = vmul.f32 %v9639_v18, %v727_v10 }
 0x578   : > { %v2859_v10 = vsel %vm611_vm1, %v2845_v8, 0 }
 0x579   : > { %v733_v21 = vadd.f32 %v731_v19, %v729_v15  ;;  %v732_v22 = vadd.f32 %v730_v17, %v728_v13  ;;  %v8398_v13 = vld [vmem:[%s11613_s4 + $0x28] sm:$0xff]   ;;  %v8401_v17 = vld [vmem:[%s11615_s6 + $0x614] ss:$8 sps:$4 sm:$0xff]   ;;  %v8399_v19 = vld [vmem:[%s11615_s6 + $0x610] ss:$8 sps:$4 sm:$0xff]  }
 0x57a   : > { %v8395_v15 = vld [vmem:[%s11615_s6 + $0x600] ss:$8 sps:$4 sm:$0xff]  }
 0x57b   : > { %741 = vperm.xlu0 %7975, %v733_v21   ;;  %736 = vperm.xlu1 %7976, %v732_v22   ;;  %v8404_v21 = vld [vmem:[%s11615_s6 + $0x624] ss:$8 sps:$4 sm:$0xff]   ;;  %v8402_v22 = vld [vmem:[%s11615_s6 + $0x620] ss:$8 sps:$4 sm:$0xff]  }
 0x57f   : > { %4055 = vperm.xlu1 %7976, %v9648_v23  }
 0x583   : > { %4083 = vperm.xlu1 %7976, %v9645_v20  }
 0x587   : > { %4060 = vperm.xlu1 %7976, %v9658_v63  }
 0x58b   : > { %4088 = vperm.xlu1 %7976, %v9654_v0  }
 0x59a   : > { %v9662_v27 = vpop.f32.mrb[20].mxu0 }
 0x59b   : > { %v9664_v28 = vpop.f32.mrb[21].mxu0 }
 0x59c   : > { %v3558_v29 = vpop.f32.mrb[22].mxu0 }
 0x59d   : > { %v3559_v30 = vpop.f32.mrb[23].mxu0  ;;  %v8407_v29 = vld [vmem:[%s11615_s6 + $0x634] ss:$8 sps:$4 sm:$0xff]  }
 0x59e   : > { %v8405_v30 = vld [vmem:[%s11615_s6 + $0x630] ss:$8 sps:$4 sm:$0xff]  }
 0x5fa   : > { %v742_v31 = vpop.permute.xlu0 %741  ;;  %v737_v32 = vpop.permute.xlu1 %736 }
 0x5fb   : > { %v9667_v33 = vsub.f32 %v9424_v9, %v742_v31  ;;  %v9670_v34 = vsub.f32 %v9430_v12, %v742_v31  ;;  %v9673_v35 = vsub.f32 %v9401_v57, %v737_v32  ;;  %v9676_v36 = vsub.f32 %v9412_v4, %v737_v32  ;;  %v8410_v31 = vld [vmem:[%s11615_s6 + $0x644] ss:$8 sps:$4 sm:$0xff]   ;;  %v8408_v32 = vld [vmem:[%s11615_s6 + $0x640] ss:$8 sps:$4 sm:$0xff]  }
 0x5fd   : > { %v750_v37 = vmul.f32 %v9667_v33, %v9667_v33  ;;  %v748_v38 = vmul.f32 %v9673_v35, %v9673_v35  ;;  %v749_v39 = vmul.f32 %v9676_v36, %v9676_v36  ;;  %v751_v9 = vmul.f32 %v9670_v34, %v9670_v34 }
 0x5ff   : > { %v770_v12 = vmul.f32 %v748_v38, %v9392_v48  ;;  %v771_v57 = vmul.f32 %v749_v39, %v9392_v48  ;;  %v752_v40 = vmul.f32 %v748_v38, %v9381_v44  ;;  %v753_v4 = vmul.f32 %v749_v39, %v9381_v44  ;;  %v8411_v38 = vld [vmem:[%s11615_s6 + $0x650] ss:$8 sps:$4 sm:$0xff]   ;;  %v8416_v39 = vld [vmem:[%s11615_s6 + $0x664] ss:$8 sps:$4 sm:$0xff]  }
 0x600   : > { %v772_v41 = vmul.f32 %v750_v37, %v9418_v6  ;;  %v754_v43 = vmul.f32 %v750_v37, %v9406_v60  ;;  %v773_v46 = vmul.f32 %v751_v9, %v9418_v6  ;;  %v755_v49 = vmul.f32 %v751_v9, %v9406_v60  ;;  %v8390_v6 = vld [vmem:[%s11611_s2 + $0x18] sm:$0xff]   ;;  %v8414_v9 = vld [vmem:[%s11615_s6 + $0x660] ss:$8 sps:$4 sm:$0xff]  }
 0x601   : > { %v774_v42 = vadd.f32 %v771_v57, %v770_v12  ;;  %v756_v45 = vadd.f32 %v753_v4, %v752_v40  ;;  %v2488_v60 = vpack.c.bf16 %v9578_v62, %v9578_v62  ;;  %v8392_v62 = vld [vmem:[%s11611_s2 + $0x20] sm:$0xff]   ;;  %v8413_v37 = vld [vmem:[%s11615_s6 + $0x654] ss:$8 sps:$4 sm:$0xff]   ;;  %v8417_v57 = vld [vmem:[%s11615_s6 + $0x670] ss:$8 sps:$4 sm:$0xff]  }
 0x602   : > { %v8419_v12 = vld [vmem:[%s11615_s6 + $0x674] ss:$8 sps:$4 sm:$0xff]   ;;  %v8422_v40 = vld [vmem:[%s11615_s6 + $0x684] ss:$8 sps:$4 sm:$0xff]   ;;  %v8420_v4 = vld [vmem:[%s11615_s6 + $0x680] ss:$8 sps:$4 sm:$0xff]  }
 0x603   : > { %v775_v47 = vadd.f32 %v774_v42, %v772_v41  ;;  %v757_v50 = vadd.f32 %v756_v45, %v754_v43  ;;  %v8425_v41 = vld [vmem:[%s11615_s6 + $0x694] ss:$8 sps:$4 sm:$0xff]   ;;  %v8423_v42 = vld [vmem:[%s11615_s6 + $0x690] ss:$8 sps:$4 sm:$0xff]   ;;  %v8428_v43 = vld [vmem:[%s11615_s6 + $0x6a4] ss:$8 sps:$4 sm:$0xff]  }
 0x604   : > { %v8426_v45 = vld [vmem:[%s11615_s6 + $0x6a0] ss:$8 sps:$4 sm:$0xff]  }
 0x605   : > { %v776_v51 = vadd.f32 %v775_v47, %v773_v46  ;;  %v758_v52 = vadd.f32 %v757_v50, %v755_v49  ;;  %v8431_v46 = vld [vmem:[%s11615_s6 + $0x6b4] ss:$8 sps:$4 sm:$0xff]   ;;  %v8429_v47 = vld [vmem:[%s11615_s6 + $0x6b0] ss:$8 sps:$4 sm:$0xff]   ;;  %v8434_v49 = vld [vmem:[%s11615_s6 + $0x6c4] ss:$8 sps:$4 sm:$0xff]  }
 0x606   : > { %v8432_v50 = vld [vmem:[%s11615_s6 + $0x6c0] ss:$8 sps:$4 sm:$0xff]  }
 0x607   : > { %777 = vadd.xlane.f32.xlu1 %v776_v51  ;;  %759 = vadd.xlane.f32.xlu0 %v758_v52  ;;  %v8437_v51 = vld [vmem:[%s11615_s6 + $0x6d4] ss:$8 sps:$4 sm:$0xff]   ;;  %v8435_v52 = vld [vmem:[%s11615_s6 + $0x6d0] ss:$8 sps:$4 sm:$0xff]  }
 0x610   : > { %v2122_v48 = vpop.f32.mrb[16].mxu1 }
 0x611   : > { %v2129_v53 = vpack.c.bf16 %v2122_v48, %v2122_v48  ;;  %v2124_v54 = vpop.f32.mrb[17].mxu1  ;;  %v8440_v48 = vld [vmem:[%s11615_s6 + $0x6e4] ss:$8 sps:$4 sm:$0xff]  }
 0x612   : > { %v2130_v44 = vpack.c.bf16 %v2124_v54, %v2124_v54  ;;  %v2126_v55 = vpop.f32.mrb[18].mxu1  ;;  %v8443_v54 = vld [vmem:[%s11615_s6 + $0x6f4] ss:$8 sps:$4 sm:$0xff]  }
 0x613   : > { %v2143_v56 = vsel %vm611_vm1, %v2129_v53, 0  ;;  %v2127_v58 = vpop.f32.mrb[19].mxu1  ;;  %v8438_v53 = vld [vmem:[%s11615_s6 + $0x6e0] ss:$8 sps:$4 sm:$0xff]   ;;  %v9837_v55 = vpop.permute.xlu1 %4055 }
 0x614   : > { %7436 = vmatprep.subr.msk.bf16.mxu1 %vm611_vm1, %v2130_v44 }
 0x615   : > { %2149 = vmatpush1.bf16.msra.mxu1 %v2143_v56 }
 0x616   : > { %7441 = vmatprep.subr.msk.bf16.mxu1 %vm611_vm1, %v2130_v44  ;;  %v8441_v44 = vld [vmem:[%s11615_s6 + $0x6f0] ss:$8 sps:$4 sm:$0xff]  }
 0x618   : > { %7437 = vmatmul.mubr.msk.bf16.vlgmr.msra.gmra.mrb[8].mxu1 %vm607_vm2, %v8390_v6 }
 0x619   : > { %2203 = vmatpush1.bf16.msra.mxu1 %v2143_v56  ;;  %2234 = vmatprep.mubr.bf16.mxu1 %v11622_v1  ;;  %v9841_v56 = vpop.permute.xlu1 %4083 }
 0x61a   : > { %7510 = vmatprep.subr.msk.bf16.mxu1 %vm611_vm1, %v2488_v60 }
 0x61d   : > { %v9843_v58 = vpop.permute.xlu1 %4060 }
 0x620   : > { %7442 = vmatmul.mubr.msk.bf16.vlgmr.msra.gmra.mrb[12].mxu1 %vm607_vm2, %v8391_v5 }
 0x621   : > { %2507 = vmatpush1.bf16.msra.mxu1 %v2501_v7  ;;  %2538 = vmatprep.mubr.bf16.mxu1 %v11622_v1  ;;  %v9845_v6 = vpop.permute.xlu1 %4088 }
 0x622   : > { %7515 = vmatprep.subr.msk.bf16.mxu1 %vm611_vm1, %v2488_v60 }
 0x628   : > { %7511 = vmatmul.mubr.msk.bf16.vlgmr.msra.gmra.mrb[8].mxu1 %vm607_vm2, %v8392_v62 }
 0x629   : > { %2561 = vmatpush1.bf16.msra.mxu1 %v2501_v7  ;;  %2592 = vmatprep.mubr.bf16.mxu1 %v11622_v1 }
 0x62a   : > { %7584 = vmatprep.subr.msk.bf16.mxu1 %vm611_vm1, %v2846_v24 }
 0x630   : > { %7516 = vmatmul.mubr.msk.bf16.vlgmr.msra.gmra.mrb[12].mxu1 %vm607_vm2, %v8393_v2 }
 0x631   : > { %2865 = vmatpush1.bf16.msra.mxu1 %v2859_v10  ;;  %2896 = vmatprep.mubr.bf16.mxu1 %v11622_v1 }
 0x632   : > { %7589 = vmatprep.subr.msk.bf16.mxu1 %vm611_vm1, %v2846_v24 }
 0x638   : > { %7585 = vmatmul.mubr.msk.bf16.vlgmr.msra.gmra.mrb[8].mxu1 %vm607_vm2, %v8394_v61 }
 0x639   : > { %2919 = vmatpush1.bf16.msra.mxu1 %v2859_v10  ;;  %2950 = vmatprep.mubr.bf16.mxu1 %v11622_v1 }
 0x63a   : > { %3162 = vmatprep.subr.bf16.mxu1 %v8397_v59 }
 0x640   : > { %7590 = vmatmul.mubr.msk.bf16.vlgmr.msra.gmra.mrb[12].mxu1 %vm607_vm2, %v8398_v13 }
 0x641   : > { %3163 = vmatpush1.bf16.msra.mxu1 %v8395_v15  ;;  %3194 = vmatprep.mubr.bf16.mxu1 %v8951_v26 }
 0x642   : > { %3164 = vmatprep.subr.bf16.mxu1 %v8401_v17 }
 0x645   : > { %3165 = vmatpush1.bf16.msra.mxu1 %v8399_v19 }
 0x646   : > { %3166 = vmatprep.subr.bf16.mxu1 %v8404_v21 }
 0x649   : > { %3167 = vmatpush1.bf16.msra.mxu1 %v8402_v22 }
 0x64a   : > { %3168 = vmatprep.subr.bf16.mxu1 %v8407_v29 }
 0x64d   : > { %3169 = vmatpush1.bf16.msra.mxu1 %v8405_v30 }
 0x64e   : > { %3170 = vmatprep.subr.bf16.mxu1 %v8410_v31 }
 0x651   : > { %3171 = vmatpush1.bf16.msra.mxu1 %v8408_v32 }
 0x652   : > { %3172 = vmatprep.subr.bf16.mxu1 %v8413_v37 }
 0x655   : > { %3173 = vmatpush1.bf16.msra.mxu1 %v8411_v38 }
 0x656   : > { %3174 = vmatprep.subr.bf16.mxu1 %v8416_v39 }
 0x659   : > { %3175 = vmatpush1.bf16.msra.mxu1 %v8414_v9 }
 0x65a   : > { %3176 = vmatprep.subr.bf16.mxu1 %v8419_v12 }
 0x65d   : > { %3177 = vmatpush1.bf16.msra.mxu1 %v8417_v57 }
 0x65e   : > { %3178 = vmatprep.subr.bf16.mxu1 %v8422_v40 }
 0x661   : > { %3179 = vmatpush1.bf16.msra.mxu1 %v8420_v4 }
 0x662   : > { %3180 = vmatprep.subr.bf16.mxu1 %v8425_v41 }
 0x665   : > { %3181 = vmatpush1.bf16.msra.mxu1 %v8423_v42 }
 0x666   : > { %3182 = vmatprep.subr.bf16.mxu1 %v8428_v43 }
 0x669   : > { %3183 = vmatpush1.bf16.msra.mxu1 %v8426_v45  ;;  %v8444_v45 = vld [vmem:[%s11611_s2 + $0x30] sm:$0xff]  }
 0x66a   : > { %3184 = vmatprep.subr.bf16.mxu1 %v8431_v46  ;;  %v8445_v46 = vld [vmem:[%s11613_s4 + $0x30] sm:$0xff]  }
 0x66d   : > { %3185 = vmatpush1.bf16.msra.mxu1 %v8429_v47 }
 0x66e   : > { %3186 = vmatprep.subr.bf16.mxu1 %v8434_v49  ;;  %v8450_v49 = vld [vmem:[%s11613_s4 + $0x38] sm:$0xff]  }
 0x671   : > { %3187 = vmatpush1.bf16.msra.mxu1 %v8432_v50  ;;  %v8447_v50 = vld [vmem:[%s11615_s6 + $0x800] ss:$8 sps:$4 sm:$0xff]  }
 0x672   : > { %3188 = vmatprep.subr.bf16.mxu1 %v8437_v51  ;;  %v8453_v51 = vld [vmem:[%s11615_s6 + $0x814] ss:$8 sps:$4 sm:$0xff]  }
 0x675   : > { %3189 = vmatpush1.bf16.msra.mxu1 %v8435_v52  ;;  %v8451_v52 = vld [vmem:[%s11615_s6 + $0x810] ss:$8 sps:$4 sm:$0xff]  }
 0x676   : > { %3190 = vmatprep.subr.bf16.mxu1 %v8440_v48  ;;  %v8456_v48 = vld [vmem:[%s11615_s6 + $0x824] ss:$8 sps:$4 sm:$0xff]  }
 0x679   : > { %3191 = vmatpush1.bf16.msra.mxu1 %v8438_v53  ;;  %v8454_v53 = vld [vmem:[%s11615_s6 + $0x820] ss:$8 sps:$4 sm:$0xff]  }
 0x67a   : > { %3192 = vmatprep.subr.bf16.mxu1 %v8443_v54  ;;  %v8459_v54 = vld [vmem:[%s11615_s6 + $0x834] ss:$8 sps:$4 sm:$0xff]  }
 0x67d   : > { %3193 = vmatpush1.bf16.msra.mxu1 %v8441_v44  ;;  %v8462_v44 = vld [vmem:[%s11615_s6 + $0x844] ss:$8 sps:$4 sm:$0xff]  }
 0x680   : > { %3195 = vmatmul.mubr.bf16.vlgmr.msra.gmra.mrb[20].mxu1 %v8949_v25 }
 0x681   : > { %3254 = vmatprep.mubr.bf16.mxu1 %v11622_v1 }
 0x694   : > { %v778_v60 = vpop.xlane.xlu1 %777  ;;  %v760_v3 = vpop.xlane.xlu0 %759 }
 0x695   : > { %v779_v5 = vrot.slane %v778_v60, 4  ;;  %v761_v7 = vrot.slane %v760_v3, 4 }
 0x697   : > { %v780_v62 = vadd.f32 %v779_v5, %v778_v60  ;;  %v762_v24 = vadd.f32 %v761_v7, %v760_v3  ;;  %v8460_v60 = vld [vmem:[%s11615_s6 + $0x840] ss:$8 sps:$4 sm:$0xff]   ;;  %v8465_v3 = vld [vmem:[%s11615_s6 + $0x854] ss:$8 sps:$4 sm:$0xff]   ;;  %v8463_v5 = vld [vmem:[%s11615_s6 + $0x850] ss:$8 sps:$4 sm:$0xff]  }
 0x698   : > { %v8468_v7 = vld [vmem:[%s11615_s6 + $0x864] ss:$8 sps:$4 sm:$0xff]  }
 0x699   : > { %v781_v8 = vrot.slane %v780_v62, 2  ;;  %v763_v2 = vrot.slane %v762_v24, 2 }
 0x69b   : > { %v782_v10 = vadd.f32 %v781_v8, %v780_v62  ;;  %v764_v61 = vadd.f32 %v763_v2, %v762_v24  ;;  %v8466_v62 = vld [vmem:[%s11615_s6 + $0x860] ss:$8 sps:$4 sm:$0xff]   ;;  %v8471_v24 = vld [vmem:[%s11615_s6 + $0x874] ss:$8 sps:$4 sm:$0xff]   ;;  %v8469_v8 = vld [vmem:[%s11615_s6 + $0x870] ss:$8 sps:$4 sm:$0xff]  }
 0x69c   : > { %v8474_v2 = vld [vmem:[%s11615_s6 + $0x884] ss:$8 sps:$4 sm:$0xff]  }
 0x69d   : > { %v783_v59 = vrot.slane %v782_v10, 1  ;;  %v765_v13 = vrot.slane %v764_v61, 1 }
 0x69f   : > { %v784_v15 = vadd.f32 %v783_v59, %v782_v10  ;;  %v766_v17 = vadd.f32 %v765_v13, %v764_v61  ;;  %v8472_v10 = vld [vmem:[%s11615_s6 + $0x880] ss:$8 sps:$4 sm:$0xff]   ;;  %v8477_v61 = vld [vmem:[%s11615_s6 + $0x894] ss:$8 sps:$4 sm:$0xff]   ;;  %v8475_v59 = vld [vmem:[%s11615_s6 + $0x890] ss:$8 sps:$4 sm:$0xff]  }
 0x6a0   : > { %v8480_v13 = vld [vmem:[%s11615_s6 + $0x8a4] ss:$8 sps:$4 sm:$0xff]  }
 0x6a1   : > { %7929 = vpush %v766_v17  ;;  %v8483_v17 = vld [vmem:[%s11615_s6 + $0x8b4] ss:$8 sps:$4 sm:$0xff]  }
 0x6a2   : > { %7931 = vpush %v784_v15  ;;  %v8478_v15 = vld [vmem:[%s11615_s6 + $0x8a0] ss:$8 sps:$4 sm:$0xff]  }
 0x6d2   : > { %s7930_s15 = spop %7929 }
 0x6d3   : > { %v768_v19 = vstv %s7930_s15  ;;  %s7932_s16 = spop %7931 }
 0x6d4   : > { %v769_v21 = vmul.f32 0.00048828125, %v768_v19  ;;  %v786_v22 = vstv %s7932_s16  ;;  %v8481_v19 = vld [vmem:[%s11615_s6 + $0x8b0] ss:$8 sps:$4 sm:$0xff]   ;;  %s11552_s16 = scalar_lea.vmem %s11621_s12, %s7851_s25 }
 0x6d5   : > { %v787_v29 = vmul.f32 0.00048828125, %v786_v22  ;;  %v8484_v22 = vld [vmem:[%s11615_s6 + $0x8c0] ss:$8 sps:$4 sm:$0xff]  }
 0x6d6   : > { %v788_v30 = vadd.f32 1e-05, %v769_v21  ;;  %v8486_v21 = vld [vmem:[%s11615_s6 + $0x8c4] ss:$8 sps:$4 sm:$0xff]  }
 0x6d7   : > { %v792_v31 = vadd.f32 1e-05, %v787_v29  ;;  %v8489_v29 = vld [vmem:[%s11615_s6 + $0x8d4] ss:$8 sps:$4 sm:$0xff]  }
 0x6d8   : > { %8506 = vrsqrt.f32 %v788_v30  ;;  %v8487_v30 = vld [vmem:[%s11615_s6 + $0x8d0] ss:$8 sps:$4 sm:$0xff]  }
 0x6d9   : > { %8508 = vrsqrt.f32 %v792_v31  ;;  %v8492_v31 = vld [vmem:[%s11615_s6 + $0x8e4] ss:$8 sps:$4 sm:$0xff]  }
 0x6e2   : > { %v9847_v32 = vpop.eup %8506 }
 0x6e3   : > { %v9849_v37 = vpop.eup %8508  ;;  %v791_v38 = vmul.f32 %v9847_v32, %v8828_v11  ;;  %v3562_v11 = vpack.c.bf16 %v9664_v28, %v9664_v28  ;;  %v8446_v28 = vld [vmem:[%s11611_s2 + $0x38] sm:$0xff]  }
 0x6e4   : > { %v795_v39 = vmul.f32 %v9639_v18, %v9849_v37  ;;  %v3561_v18 = vpack.c.bf16 %v9662_v27, %v9662_v27  ;;  %v8449_v27 = vld [vmem:[%s11615_s6 + $0x804] ss:$8 sps:$4 sm:$0xff]  }
 0x6e6   : > { %v9855_v9 = vadd.f32 %v795_v39, %v791_v38  ;;  %v3575_v47 = vsel %vm611_vm1, %v3561_v18, 0  ;;  %v8490_v38 = vld [vmem:[%s11615_s6 + $0x8e0] ss:$8 sps:$4 sm:$0xff]   ;;  %v8495_v39 = vld [vmem:[%s11615_s6 + $0x8f4] ss:$8 sps:$4 sm:$0xff]  }
 0x753   : > { %v3196_v12 = vpop.f32.mrb[20].mxu1 }
 0x754   : > { %v3203_v57 = vpack.c.bf16 %v3196_v12, %v3196_v12  ;;  %v3198_v40 = vpop.f32.mrb[21].mxu1  ;;  %v8493_v12 = vld [vmem:[%s11615_s6 + $0x8f0] ss:$8 sps:$4 sm:$0xff]  }
 0x755   : > { %v3204_v4 = vpack.c.bf16 %v3198_v40, %v3198_v40  ;;  %v3200_v41 = vpop.f32.mrb[22].mxu1 }
 0x756   : > { %v3217_v42 = vsel %vm611_vm1, %v3203_v57, 0  ;;  %v3201_v43 = vpop.f32.mrb[23].mxu1 }
 0x757   : > { %7658 = vmatprep.subr.msk.bf16.mxu1 %vm611_vm1, %v3204_v4 }
 0x758   : > { %3223 = vmatpush1.bf16.msra.mxu1 %v3217_v42 }
 0x759   : > { %7663 = vmatprep.subr.msk.bf16.mxu1 %vm611_vm1, %v3204_v4 }
 0x75b   : > { %7659 = vmatmul.mubr.msk.bf16.vlgmr.msra.gmra.mrb[8].mxu1 %vm607_vm2, %v8444_v45 }
 0x75c   : > { %3277 = vmatpush1.bf16.msra.mxu1 %v3217_v42  ;;  %3308 = vmatprep.mubr.bf16.mxu1 %v11622_v1 }
 0x75d   : > { %7732 = vmatprep.subr.msk.bf16.mxu1 %vm611_vm1, %v3562_v11 }
 0x763   : > { %7664 = vmatmul.mubr.msk.bf16.vlgmr.msra.gmra.mrb[12].mxu1 %vm607_vm2, %v8445_v46 }
 0x764   : > { %3581 = vmatpush1.bf16.msra.mxu1 %v3575_v47  ;;  %3612 = vmatprep.mubr.bf16.mxu1 %v11622_v1 }
 0x765   : > { %7737 = vmatprep.subr.msk.bf16.mxu1 %vm611_vm1, %v3562_v11  ;;  %v8496_v11 = vld [vmem:[%s11611_s2 + $0x40] sm:$0xff]  }
 0x76b   : > { %7733 = vmatmul.mubr.msk.bf16.vlgmr.msra.gmra.mrb[8].mxu1 %vm607_vm2, %v8446_v28 }
 0x76c   : > { %3635 = vmatpush1.bf16.msra.mxu1 %v3575_v47  ;;  %3666 = vmatprep.mubr.bf16.mxu1 %v11622_v1 }
 0x76d   : > { %3878 = vmatprep.subr.bf16.mxu1 %v8449_v27 }
 0x773   : > { %7738 = vmatmul.mubr.msk.bf16.vlgmr.msra.gmra.mrb[12].mxu1 %vm607_vm2, %v8450_v49 }
 0x774   : > { %3879 = vmatpush1.bf16.msra.mxu1 %v8447_v50  ;;  %3910 = vmatprep.mubr.bf16.mxu1 %v8951_v26  ;;  %v8457_v26 = vld [vmem:[%s11615_s6 + $0x830] ss:$8 sps:$4 sm:$0xff]  }
 0x775   : > { %3880 = vmatprep.subr.bf16.mxu1 %v8453_v51 }
 0x778   : > { %3881 = vmatpush1.bf16.msra.mxu1 %v8451_v52 }
 0x779   : > { %3882 = vmatprep.subr.bf16.mxu1 %v8456_v48 }
 0x77c   : > { %3883 = vmatpush1.bf16.msra.mxu1 %v8454_v53 }
 0x77d   : > { %3884 = vmatprep.subr.bf16.mxu1 %v8459_v54 }
 0x780   : > { %3885 = vmatpush1.bf16.msra.mxu1 %v8457_v26 }
 0x781   : > { %3886 = vmatprep.subr.bf16.mxu1 %v8462_v44 }
 0x784   : > { %3887 = vmatpush1.bf16.msra.mxu1 %v8460_v60 }
 0x785   : > { %3888 = vmatprep.subr.bf16.mxu1 %v8465_v3 }
 0x788   : > { %3889 = vmatpush1.bf16.msra.mxu1 %v8463_v5 }
 0x789   : > { %3890 = vmatprep.subr.bf16.mxu1 %v8468_v7 }
 0x78c   : > { %3891 = vmatpush1.bf16.msra.mxu1 %v8466_v62 }
 0x78d   : > { %3892 = vmatprep.subr.bf16.mxu1 %v8471_v24 }
 0x790   : > { %3893 = vmatpush1.bf16.msra.mxu1 %v8469_v8 }
 0x791   : > { %3894 = vmatprep.subr.bf16.mxu1 %v8474_v2 }
 0x794   : > { %3895 = vmatpush1.bf16.msra.mxu1 %v8472_v10 }
 0x795   : > { %3896 = vmatprep.subr.bf16.mxu1 %v8477_v61 }
 0x798   : > { %3897 = vmatpush1.bf16.msra.mxu1 %v8475_v59 }
 0x799   : > { %3898 = vmatprep.subr.bf16.mxu1 %v8480_v13 }
 0x79c   : > { %3899 = vmatpush1.bf16.msra.mxu1 %v8478_v15 }
 0x79d   : > { %3900 = vmatprep.subr.bf16.mxu1 %v8483_v17 }
 0x7a0   : > { %3901 = vmatpush1.bf16.msra.mxu1 %v8481_v19 }
 0x7a1   : > { %3902 = vmatprep.subr.bf16.mxu1 %v8486_v21 }
 0x7a4   : > { %3903 = vmatpush1.bf16.msra.mxu1 %v8484_v22 }
 0x7a5   : > { %3904 = vmatprep.subr.bf16.mxu1 %v8489_v29 }
 0x7a8   : > { %3905 = vmatpush1.bf16.msra.mxu1 %v8487_v30 }
 0x7a9   : > { %3906 = vmatprep.subr.bf16.mxu1 %v8492_v31 }
 0x7ac   : > { %3907 = vmatpush1.bf16.msra.mxu1 %v8490_v38 }
 0x7ad   : > { %3908 = vmatprep.subr.bf16.mxu1 %v8495_v39 }
 0x7b0   : > { %3909 = vmatpush1.bf16.msra.mxu1 %v8493_v12 }
 0x7b3   : > { %3911 = vmatmul.mubr.bf16.vlgmr.msra.gmra.mrb[24].mxu1 %v8949_v25  ;;  %v8497_v25 = vld [vmem:[%s11613_s4 + $0x40] sm:$0xff]  }
 0x7b4   : > { %3970 = vmatprep.mubr.bf16.mxu1 %v11622_v1 }
 0x886   : > { %v3912_v57 = vpop.f32.mrb[24].mxu1 }
 0x887   : > { %v3919_v40 = vpack.c.bf16 %v3912_v57, %v3912_v57  ;;  %v3914_v4 = vpop.f32.mrb[25].mxu1 }
 0x888   : > { %v3920_v41 = vpack.c.bf16 %v3914_v4, %v3914_v4  ;;  %v3916_v42 = vpop.f32.mrb[26].mxu1 }
 0x889   : > { %v3933_v43 = vsel %vm611_vm1, %v3919_v40, 0  ;;  %v3917_v45 = vpop.f32.mrb[27].mxu1 }
 0x88a   : > { %7806 = vmatprep.subr.msk.bf16.mxu1 %vm611_vm1, %v3920_v41 }
 0x88b   : > { %3939 = vmatpush1.bf16.msra.mxu1 %v3933_v43 }
 0x88c   : > { %7811 = vmatprep.subr.msk.bf16.mxu1 %vm611_vm1, %v3920_v41 }
 0x88e   : > { %7807 = vmatmul.mubr.msk.bf16.vlgmr.msra.gmra.mrb[8].mxu1 %vm607_vm2, %v8496_v11 }
 0x88f   : > { %3993 = vmatpush1.bf16.msra.mxu1 %v3933_v43  ;;  %4024 = vmatprep.mubr.bf16.mxu1 %v11622_v1 }
 0x896   : > { %7812 = vmatmul.mubr.msk.bf16.vlgmr.msra.gmra.mrb[12].mxu1 %vm607_vm2, %v8497_v25 }
 0x961   : > { %v3972_v18 = vpop.f32.mrb[8].mxu1 }
 0x962   : > { %v4063_v46 = vmul.f32 %v9837_v55, %v3972_v18  ;;  %v4091_v47 = vmul.f32 %v9841_v56, %v3972_v18  ;;  %v3974_v28 = vpop.f32.mrb[9].mxu1 }
 0x963   : > { %v4064_v27 = vmul.f32 %v9837_v55, %v3974_v28  ;;  %v4092_v49 = vmul.f32 %v9841_v56, %v3974_v28  ;;  %v3976_v50 = vpop.f32.mrb[10].mxu1 }
 0x964   : > { %v4065_v51 = vmul.f32 %v9843_v58, %v3976_v50  ;;  %v4093_v52 = vmul.f32 %v9845_v6, %v3976_v50  ;;  %v3978_v48 = vpop.f32.mrb[11].mxu1 }
 0x965   : > { %v4067_v53 = vadd.f32 %v4064_v27, %v4063_v46  ;;  %v4095_v54 = vadd.f32 %v4092_v49, %v4091_v47  ;;  %v4066_v26 = vmul.f32 %v9843_v58, %v3978_v48  ;;  %v4094_v60 = vmul.f32 %v9845_v6, %v3978_v48 }
 0x967   : > { %v4068_v44 = vadd.f32 %v4067_v53, %v4065_v51  ;;  %v4096_v3 = vadd.f32 %v4095_v54, %v4093_v52 }
 0x969   : > { %v10005_v5 = vpop.f32.mrb[12].mxu1  ;;  %v4069_v7 = vadd.f32 %v4068_v44, %v4066_v26  ;;  %v4097_v62 = vadd.f32 %v4096_v3, %v4094_v60 }
 0x96a   : > { %v10007_v24 = vpop.f32.mrb[13].mxu1 }
 0x96b   : > { %4070 = vadd.xlane.f32.xlu0 %v4069_v7  ;;  %v10009_v8 = vpop.f32.mrb[14].mxu1 }
 0x96c   : > { %v10011_v2 = vpop.f32.mrb[15].mxu1 }
 0x96f   : > { %4098 = vadd.xlane.f32.xlu0 %v4097_v62 }
 0x9f8   : > { %v4071_v10 = vpop.xlane.xlu0 %4070 }
 0x9f9   : > { %v4072_v61 = vrot.slane %v4071_v10, 4 }
 0x9fb   : > { %v4073_v59 = vadd.f32 %v4072_v61, %v4071_v10 }
 0x9fc   : > { %v4099_v13 = vpop.xlane.xlu0 %4098 }
 0x9fd   : > { %v4100_v15 = vrot.slane %v4099_v13, 4  ;;  %v4074_v17 = vrot.slane %v4073_v59, 2 }
 0x9ff   : > { %v4101_v19 = vadd.f32 %v4100_v15, %v4099_v13  ;;  %v4075_v21 = vadd.f32 %v4074_v17, %v4073_v59 }
 0xa01   : > { %v4076_v22 = vrot.slane %v4075_v21, 1  ;;  %v4102_v29 = vrot.slane %v4101_v19, 2 }
 0xa03   : > { %v4077_v30 = vadd.f32 %v4076_v22, %v4075_v21  ;;  %v4103_v31 = vadd.f32 %v4102_v29, %v4101_v19  ;;  %v790_v19 = vmul.f32 %v9847_v32, %v8940_v14  ;;  %v794_v21 = vmul.f32 %v9633_v16, %v9849_v37  ;;  %v661_v29 = vld [vmem:[%s11618_s9] sm:$0xff]  ;;  %v7813_v14 = vld [vmem:[%s11617_s8 + $0x10] sm:$0xff] }
 0xa04   : > { %v4043_v16 = vld [vmem:[%s11617_s8] sm:$0xff] }
 0xa05   : > { %7933 = vpush %v4077_v30  ;;  %v4104_v38 = vrot.slane %v4103_v31, 1  ;;  %v796_v22 = vadd.f32 %v794_v21, %v790_v19  ;;  %v7179_v30 = vld [vmem:[%s11618_s9 + $0x10] sm:$0xff] }
 0xa07   : > { %v4105_v39 = vadd.f32 %v4104_v38, %v4103_v31 }
 0xa09   : > { %7935 = vpush %v4105_v39 }
 0xa36   : > { %s7934_s26 = spop %7933 }
 0xa37   : > { %v4079_v12 = vstv %s7934_s26 }
 0xa38   : > { %v4080_v57 = vmul.f32 0.00048828125, %v4079_v12 }
 0xa3a   : > { %s7936_s27 = spop %7935  ;;  %v4109_v41 = vmul.f32 %v4080_v57, %v9648_v23  ;;  %v4110_v42 = vmul.f32 %v4080_v57, %v9658_v63 }
 0xa3b   : > { %v4107_v40 = vstv %s7936_s27 }
 0xa3c   : > { %v4108_v4 = vmul.f32 0.00048828125, %v4107_v40 }
 0xa3e   : > { %v4111_v43 = vmul.f32 %v9645_v20, %v4108_v4  ;;  %v4112_v45 = vmul.f32 %v9654_v0, %v4108_v4 }
 0xa40   : > { %v4114_v11 = vadd.f32 %v4112_v45, %v4110_v42  ;;  %v4113_v25 = vadd.f32 %v4111_v43, %v4109_v41 }
 0xa42   : > { %4122 = vperm.xlu0 %7975, %v4114_v11   ;;  %4117 = vperm.xlu1 %7976, %v4113_v25  }
 0xac1   : > { %v4123_v46 = vpop.permute.xlu0 %4122  ;;  %v4118_v47 = vpop.permute.xlu1 %4117 }
 0xac2   : > { %v10017_v27 = vsub.f32 %v3976_v50, %v4123_v46  ;;  %v10019_v49 = vsub.f32 %v3978_v48, %v4123_v46  ;;  %v10021_v51 = vsub.f32 %v3972_v18, %v4118_v47  ;;  %v10023_v52 = vsub.f32 %v3974_v28, %v4118_v47 }
 0xac4   : > { %v4131_v53 = vmul.f32 %v10017_v27, %v10017_v27  ;;  %v4129_v54 = vmul.f32 %v10021_v51, %v10021_v51  ;;  %v4130_v26 = vmul.f32 %v10023_v52, %v10023_v52  ;;  %v4132_v44 = vmul.f32 %v10019_v49, %v10019_v49 }
 0xac6   : > { %v4151_v50 = vmul.f32 %v4129_v54, %v9841_v56  ;;  %v4152_v48 = vmul.f32 %v4130_v26, %v9841_v56  ;;  %v4133_v18 = vmul.f32 %v4129_v54, %v9837_v55  ;;  %v4134_v28 = vmul.f32 %v4130_v26, %v9837_v55  ;;  %v10044_v55 = vld [vmem:[%s11619_s10 + $0x20] sm:$0xff] }
 0xac7   : > { %v4153_v60 = vmul.f32 %v4131_v53, %v9845_v6  ;;  %v4135_v7 = vmul.f32 %v4131_v53, %v9843_v58  ;;  %v4154_v10 = vmul.f32 %v4132_v44, %v9845_v6  ;;  %v4136_v59 = vmul.f32 %v4132_v44, %v9843_v58  ;;  %v10052_v6 = vld [vmem:[%s11619_s10 + $0x28] sm:$0xff] }
 0xac8   : > { %v4155_v3 = vadd.f32 %v4152_v48, %v4151_v50  ;;  %v4137_v62 = vadd.f32 %v4134_v28, %v4133_v18  ;;  %v10047_v56 = vsub.f32 1.0, %v10044_v55  ;;  %v10056_v58 = vsub.f32 1.0, %v10052_v6 }
 0xaca   : > { %v4156_v61 = vadd.f32 %v4155_v3, %v4153_v60  ;;  %v4138_v13 = vadd.f32 %v4137_v62, %v4135_v7 }
 0xacc   : > { %v4157_v15 = vadd.f32 %v4156_v61, %v4154_v10  ;;  %v4139_v17 = vadd.f32 %v4138_v13, %v4136_v59 }
 0xace   : > { %4158 = vadd.xlane.f32.xlu0 %v4157_v15  ;;  %4140 = vadd.xlane.f32.xlu1 %v4139_v17 }
 0xadf   : > { %4233 = vperm.xlu1 %7976, %v10047_v56  }
 0xae3   : > { %4238 = vperm.xlu1 %7976, %v10056_v58  }
 0xae4   : > { %4261 = vperm.xlu0 %7975, %v10044_v55  }
 0xae7   : > { %4266 = vperm.xlu1 %7976, %v10052_v6  }
 0xae8   : > { %800 = vperm.xlu0 %7975, %v796_v22  }
 0xaeb   : > { %814 = vperm.xlu1 %7976, %v661_v29  }
 0xaec   : > { %828 = vperm.xlu0 %7975, %v7179_v30  }
 0xaef   : > { %4209 = vperm.xlu1 %7976, %v7813_v14  }
 0xaf0   : > { %4195 = vperm.xlu0 %7975, %v4043_v16  }
 0xb5b   : > { %v4159_v32 = vpop.xlane.xlu0 %4158  ;;  %v4141_v31 = vpop.xlane.xlu1 %4140 }
 0xb5c   : > { %v4160_v37 = vrot.slane %v4159_v32, 4  ;;  %v4142_v38 = vrot.slane %v4141_v31, 4 }
 0xb5e   : > { %v4161_v39 = vadd.f32 %v4160_v37, %v4159_v32  ;;  %v4143_v12 = vadd.f32 %v4142_v38, %v4141_v31 }
 0xb5f   : > { %v10077_v57 = vpop.permute.xlu1 %4233 }
 0xb60   : > { %v4162_v40 = vrot.slane %v4161_v39, 2  ;;  %v4144_v4 = vrot.slane %v4143_v12, 2  ;;  %v4241_v41 = vmul.f32 %v10077_v57, %v10005_v5  ;;  %v4242_v42 = vmul.f32 %v10077_v57, %v10007_v24 }
 0xb62   : > { %v4163_v43 = vadd.f32 %v4162_v40, %v4161_v39  ;;  %v4145_v11 = vadd.f32 %v4144_v4, %v4143_v12  ;;  %v4245_v25 = vadd.f32 %v4242_v42, %v4241_v41 }
 0xb63   : > { %v10083_v45 = vpop.permute.xlu0 %4261  ;;  %v10085_v46 = vpop.permute.xlu1 %4238 }
 0xb64   : > { %v4164_v47 = vrot.slane %v4163_v43, 1  ;;  %v4269_v53 = vmul.f32 %v10083_v45, %v10005_v5  ;;  %v4270_v54 = vmul.f32 %v10083_v45, %v10007_v24  ;;  %v4146_v26 = vrot.slane %v4145_v11, 1 }
 0xb65   : > { %v4243_v44 = vmul.f32 %v10085_v46, %v10009_v8  ;;  %v4244_v28 = vmul.f32 %v10085_v46, %v10011_v2 }
 0xb66   : > { %v4165_v50 = vadd.f32 %v4164_v47, %v4163_v43  ;;  %v4273_v48 = vadd.f32 %v4270_v54, %v4269_v53  ;;  %v4147_v18 = vadd.f32 %v4146_v26, %v4145_v11 }
 0xb67   : > { %v4246_v60 = vadd.f32 %v4245_v25, %v4243_v44  ;;  %v801_v3 = vpop.permute.xlu0 %800  ;;  %v10095_v7 = vpop.permute.xlu1 %4266 }
 0xb68   : > { %7937 = vpush %v4147_v18  ;;  %v4271_v10 = vmul.f32 %v10095_v7, %v10009_v8  ;;  %v808_v61 = vmul.f32 %v801_v3, %v9673_v35  ;;  %v809_v59 = vmul.f32 %v801_v3, %v9676_v36  ;;  %v4272_v13 = vmul.f32 %v10095_v7, %v10011_v2 }
 0xb69   : > { %v4247_v62 = vadd.f32 %v4246_v60, %v4244_v28  ;;  %7939 = vpush %v4165_v50 }
 0xb6a   : > { %v4274_v15 = vadd.f32 %v4273_v48, %v4271_v10 }
 0xb6b   : > { %4248 = vadd.xlane.f32.xlu0 %v4247_v62  ;;  %v815_v17 = vpop.permute.xlu1 %814  ;;  %v829_v29 = vpop.permute.xlu0 %828 }
 0xb6c   : > { %v822_v19 = vmul.f32 %v815_v17, %v808_v61  ;;  %v823_v21 = vmul.f32 %v815_v17, %v809_v59  ;;  %v4275_v22 = vadd.f32 %v4274_v15, %v4272_v13 }
 0xb6e   : > { %v836_v30 = vadd.f32 %v829_v29, %v822_v19  ;;  %v837_v14 = vadd.f32 %v829_v29, %v823_v21 }
 0xb6f   : > { %v4196_v47 = vpop.permute.xlu0 %4195 }
 0xb70   : > { %v4401_v16 = vpack.c.bf16 %v836_v30, %v836_v30  ;;  %v4402_v32 = vpack.c.bf16 %v837_v14, %v837_v14 }
 0xb72   : > { %4405 = vmatprep.subr.bf16.mxu0 %v4402_v32 }
 0xb73   : > { %4406 = vmatpush1.bf16.xpose.msra.mxu0 %v4401_v16 }
 0xb99   : > { %s7938_s26 = spop %7937 }
 0xb9a   : > { %v4149_v35 = vstv %s7938_s26  ;;  %s7940_s27 = spop %7939  ;;  %s8692_s26 = smov 16  }
 0xb9b   : > { %v4150_v36 = vmul.f32 0.00048828125, %v4149_v35  ;;  %v4167_v37 = vstv %s7940_s27 }
 0xb9c   : > { %v4168_v31 = vmul.f32 0.00048828125, %v4167_v37 }
 0xb9d   : > { %v4169_v38 = vadd.f32 1e-05, %v4150_v36 }
 0xb9e   : > { %v4173_v39 = vadd.f32 1e-05, %v4168_v31 }
 0xb9f   : > { %8510 = vrsqrt.f32 %v4169_v38 }
 0xba0   : > { %8512 = vrsqrt.f32 %v4173_v39 }
 0xba9   : > { %v8511_v12 = vpop.eup %8510 }
 0xbaa   : > { %v8513_v40 = vpop.eup %8512  ;;  %v4171_v4 = vmul.f32 %v8511_v12, %v9648_v23  ;;  %v4172_v41 = vmul.f32 %v8511_v12, %v9658_v63  ;;  %v4210_v23 = vpop.permute.xlu1 %4209 }
 0xbab   : > { %v4175_v42 = vmul.f32 %v8513_v40, %v9645_v20  ;;  %v4176_v43 = vmul.f32 %v8513_v40, %v9654_v0 }
 0xbad   : > { %v4177_v11 = vadd.f32 %v4175_v42, %v4171_v4  ;;  %v10107_v25 = vadd.f32 %v4176_v43, %v4172_v41 }
 0xbaf   : > { %4181 = vperm.xlu1 %7976, %v4177_v11  }
 0xbd3   : > { %4276 = vadd.xlane.f32.xlu1 %v4275_v22 }
 0xbf8   : > { %v4249_v53 = vpop.xlane.xlu0 %4248 }
 0xbf9   : > { %v4250_v54 = vrot.slane %v4249_v53, 4 }
 0xbfb   : > { %v4251_v26 = vadd.f32 %v4250_v54, %v4249_v53 }
 0xbfd   : > { %v4252_v44 = vrot.slane %v4251_v26, 2 }
 0xbff   : > { %v4253_v50 = vadd.f32 %v4252_v44, %v4251_v26 }
 0xc01   : > { %v4254_v48 = vrot.slane %v4253_v50, 1 }
 0xc03   : > { %v4255_v18 = vadd.f32 %v4254_v48, %v4253_v50 }
 0xc05   : > { %7941 = vpush %v4255_v18 }
 0xc2e   : > { %v4182_v63 = vpop.permute.xlu1 %4181 }
 0xc2f   : > { %v4189_v20 = vmul.f32 %v4182_v63, %v10021_v51  ;;  %v4190_v0 = vmul.f32 %v4182_v63, %v10023_v52 }
 0xc31   : > { %v4203_v28 = vmul.f32 %v4196_v47, %v4189_v20  ;;  %v4204_v60 = vmul.f32 %v4196_v47, %v4190_v0 }
 0xc33   : > { %v4217_v3 = vadd.f32 %v4210_v23, %v4203_v28  ;;  %v4218_v62 = vadd.f32 %v4210_v23, %v4204_v60 }
 0xc35   : > { %v4400_v10 = vpack.c.bf16 %v4218_v62, %v4218_v62  ;;  %v4399_v61 = vpack.c.bf16 %v4217_v3, %v4217_v3 }
 0xc36   : > { %s7942_s29 = spop %7941 }
 0xc37   : > { %4437 = vmatprep.mubr.bf16.mxu0 %v4400_v10  ;;  %v4257_v51 = vstv %s7942_s29 }
 0xc38   : > { %4438 = vmatmul.mubr.bf16.vlgmr.msra.gmra.mrb[24].mxu0 %v4399_v61  ;;  %v4258_v52 = vmul.f32 0.00048828125, %v4257_v51 }
 0xc39   : > { %4499 = vmatprep.mubr.bf16.mxu0 %v11622_v1 }
 0xc3a   : > { %v4287_v14 = vmul.f32 %v4258_v52, %v10047_v56  ;;  %v4288_v16 = vmul.f32 %v4258_v52, %v10056_v58 }
 0xc60   : > { %v4277_v59 = vpop.xlane.xlu1 %4276 }
 0xc61   : > { %v4278_v13 = vrot.slane %v4277_v59, 4 }
 0xc63   : > { %v4279_v15 = vadd.f32 %v4278_v13, %v4277_v59 }
 0xc65   : > { %v4280_v17 = vrot.slane %v4279_v15, 2 }
 0xc67   : > { %v4281_v19 = vadd.f32 %v4280_v17, %v4279_v15 }
 0xc69   : > { %v4282_v21 = vrot.slane %v4281_v19, 1 }
 0xc6b   : > { %v4283_v22 = vadd.f32 %v4282_v21, %v4281_v19 }
 0xc6d   : > { %7943 = vpush %v4283_v22 }
 0xc9e   : > { %s7944_s30 = spop %7943 }
 0xc9f   : > { %v4285_v29 = vstv %s7944_s30 }
 0xca0   : > { %v4286_v30 = vmul.f32 0.00048828125, %v4285_v29 }
 0xca2   : > { %v4289_v32 = vmul.f32 %v10044_v55, %v4286_v30  ;;  %v4290_v35 = vmul.f32 %v10052_v6, %v4286_v30 }
 0xca4   : > { %v4292_v36 = vadd.f32 %v4290_v35, %v4288_v16  ;;  %v4291_v37 = vadd.f32 %v4289_v32, %v4287_v14  ;;  %v7814_v35 = vld [vmem:[%s11617_s8 + $0x18] sm:$0xff] }
 0xca6   : > { %4300 = vperm.xlu1 %7976, %v4292_v36   ;;  %4295 = vperm.xlu0 %7975, %v4291_v37  }
 0xd0b   : > { %v4439_v31 = vpop.f32.mrb[24].mxu0 }
 0xd0c   : > { %v4441_v38 = vpop.f32.mrb[25].mxu0  ;;  %v4445_v3 = vmul.f32 0.35355338, %v4439_v31 }
 0xd0d   : > { %v4442_v39 = vpop.f32.mrb[26].mxu0 }
 0xd0e   : > { %v4443_v12 = vpop.f32.mrb[27].mxu0 }
 0xd25   : > { %v4301_v40 = vpop.permute.xlu1 %4300  ;;  %v4296_v4 = vpop.permute.xlu0 %4295 }
 0xd26   : > { %v10117_v41 = vsub.f32 %v10009_v8, %v4301_v40  ;;  %v10120_v42 = vsub.f32 %v10011_v2, %v4301_v40  ;;  %v10123_v43 = vsub.f32 %v10005_v5, %v4296_v4  ;;  %v10126_v11 = vsub.f32 %v10007_v24, %v4296_v4 }
 0xd28   : > { %v4309_v47 = vmul.f32 %v10117_v41, %v10117_v41  ;;  %v4307_v53 = vmul.f32 %v10123_v43, %v10123_v43  ;;  %v4308_v54 = vmul.f32 %v10126_v11, %v10126_v11  ;;  %v4310_v8 = vmul.f32 %v10120_v42, %v10120_v42 }
 0xd2a   : > { %v4329_v2 = vmul.f32 %v4307_v53, %v10083_v45  ;;  %v4330_v5 = vmul.f32 %v4308_v54, %v10083_v45  ;;  %v4311_v26 = vmul.f32 %v4307_v53, %v10077_v57  ;;  %v4312_v24 = vmul.f32 %v4308_v54, %v10077_v57  ;;  %v4221_v57 = vld [vmem:[%s11619_s10] sm:$0xff] }
 0xd2b   : > { %v4331_v44 = vmul.f32 %v4309_v47, %v10095_v7  ;;  %v4313_v48 = vmul.f32 %v4309_v47, %v10085_v46  ;;  %v4332_v23 = vmul.f32 %v4310_v8, %v10095_v7  ;;  %v4314_v20 = vmul.f32 %v4310_v8, %v10085_v46  ;;  %v662_v7 = vld [vmem:[%s11618_s9 + $0x8] sm:$0xff] }
 0xd2c   : > { %v4333_v50 = vadd.f32 %v4330_v5, %v4329_v2  ;;  %v4315_v18 = vadd.f32 %v4312_v24, %v4311_v26  ;;  %v4446_v45 = vsel %vm607_vm2, %v4445_v3, -inf  ;;  %v7817_v26 = vld [vmem:[%s11619_s10 + $0x10] sm:$0xff] }
 0xd2e   : > { %v4334_v63 = vadd.f32 %v4333_v50, %v4331_v44  ;;  %v4316_v0 = vadd.f32 %v4315_v18, %v4313_v48 }
 0xd30   : > { %v4335_v28 = vadd.f32 %v4334_v63, %v4332_v23  ;;  %v4317_v60 = vadd.f32 %v4316_v0, %v4314_v20 }
 0xd32   : > { %4336 = vadd.xlane.f32.xlu1 %v4335_v28  ;;  %4318 = vadd.xlane.f32.xlu0 %v4317_v60 }
 0xd36   : > { %4447 = vmax.xlane.f32.xlu0 %v4446_v45 }
 0xd4c   : > { %4373 = vperm.xlu0 %7975, %v4221_v57  }
 0xd50   : > { %819 = vperm.xlu0 %7975, %v662_v7  }
 0xd54   : > { %4186 = vperm.xlu0 %7975, %v10107_v25  }
 0xdbf   : > { %v4337_v46 = vpop.xlane.xlu1 %4336  ;;  %v4319_v10 = vpop.xlane.xlu0 %4318 }
 0xdc0   : > { %v4338_v62 = vrot.slane %v4337_v46, 4  ;;  %v4320_v61 = vrot.slane %v4319_v10, 4 }
 0xdc2   : > { %v4339_v59 = vadd.f32 %v4338_v62, %v4337_v46  ;;  %v4321_v13 = vadd.f32 %v4320_v61, %v4319_v10 }
 0xdc3   : > { %v4448_v15 = vpop.xlane.xlu0 %4447 }
 0xdc4   : > { %v4340_v17 = vrot.slane %v4339_v59, 2  ;;  %v4449_v19 = vsub.f32 %v4445_v3, %v4448_v15  ;;  %v4322_v21 = vrot.slane %v4321_v13, 2 }
 0xdc6   : > { %v4341_v22 = vadd.f32 %v4340_v17, %v4339_v59  ;;  %v4450_v51 = vmul.f32 1.442695, %v4449_v19  ;;  %v4323_v52 = vadd.f32 %v4322_v21, %v4321_v13 }
 0xdc8   : > { %v4342_v29 = vrot.slane %v4341_v22, 1  ;;  %8514 = vpow2.f32 %v4450_v51  ;;  %v4324_v30 = vrot.slane %v4323_v52, 1 }
 0xdca   : > { %v4343_v14 = vadd.f32 %v4342_v29, %v4341_v22  ;;  %v4325_v16 = vadd.f32 %v4324_v30, %v4323_v52 }
 0xdcc   : > { %7945 = vpush %v4325_v16 }
 0xdcd   : > { %7947 = vpush %v4343_v14 }
 0xdd2   : > { %v8515_v25 = vpop.eup %8514 }
 0xdd3   : > { %v4452_v32 = vsel %vm607_vm2, %v8515_v25, 0.0 }
 0xdd4   : > { %4453 = vadd.xlane.f32.xlu0 %v4452_v32 }
 0xdea   : > { %4214 = vperm.xlu0 %7975, %v7814_v35  }
 0xdfd   : > { %s7946_s19 = spop %7945 }
 0xdfe   : > { %v4327_v36 = vstv %s7946_s19  ;;  %s7948_s20 = spop %7947  ;;  %s8688_s19 = smov 80  }
 0xdff   : > { %v4328_v37 = vmul.f32 0.00048828125, %v4327_v36  ;;  %v4345_v31 = vstv %s7948_s20  ;;  %s8689_s20 = smov 64  }
 0xe00   : > { %v4346_v38 = vmul.f32 0.00048828125, %v4345_v31 }
 0xe01   : > { %v4347_v39 = vadd.f32 1e-05, %v4328_v37 }
 0xe02   : > { %v4351_v12 = vadd.f32 1e-05, %v4346_v38 }
 0xe03   : > { %8516 = vrsqrt.f32 %v4347_v39  ;;  %v4222_v39 = vld [vmem:[%s11619_s10 + $0x8] sm:$0xff] }
 0xe04   : > { %8518 = vrsqrt.f32 %v4351_v12  ;;  %v7818_v12 = vld [vmem:[%s11619_s10 + $0x18] sm:$0xff] }
 0xe0d   : > { %v8517_v40 = vpop.eup %8516 }
 0xe0e   : > { %v8519_v4 = vpop.eup %8518  ;;  %v4349_v47 = vmul.f32 %v8517_v40, %v10047_v56  ;;  %v4350_v53 = vmul.f32 %v8517_v40, %v10056_v58  ;;  %v7180_v56 = vld [vmem:[%s11618_s9 + $0x18] sm:$0xff] }
 0xe0f   : > { %v4353_v54 = vmul.f32 %v8519_v4, %v10044_v55  ;;  %v4354_v8 = vmul.f32 %v8519_v4, %v10052_v6  ;;  %v4044_v55 = vld [vmem:[%s11617_s8 + $0x8] sm:$0xff]  ;;  %v4374_v6 = vpop.permute.xlu0 %4373 }
 0xe11   : > { %v4355_v2 = vadd.f32 %v4353_v54, %v4349_v47  ;;  %v10160_v5 = vadd.f32 %v4354_v8, %v4350_v53 }
 0xe13   : > { %4359 = vperm.xlu1 %7976, %v4355_v2   ;;  %v820_v58 = vpop.permute.xlu0 %819 }
 0xe17   : > { %4387 = vperm.xlu1 %7976, %v7817_v26   ;;  %v4187_v24 = vpop.permute.xlu0 %4186 }
 0xe18   : > { %v4191_v15 = vmul.f32 %v4187_v24, %v10017_v27  ;;  %v4192_v17 = vmul.f32 %v4187_v24, %v10019_v49 }
 0xe1b   : > { %805 = vperm.xlu1 %7976, %v9855_v9  }
 0xe1f   : > { %833 = vperm.xlu1 %7976, %v7180_v56  }
 0xe23   : > { %4200 = vperm.xlu1 %7976, %v4044_v55  }
 0xe61   : > { %v4454_v44 = vpop.xlane.xlu0 %4453 }
 0xe62   : > { %8520 = vrcp.f32 %v4454_v44 }
 0xe69   : > { %v4215_v51 = vpop.permute.xlu0 %4214 }
 0xe6c   : > { %v8521_v63 = vpop.eup %8520 }
 0xe6d   : > { %v4456_v45 = vmul.f32 %v8521_v63, %v8515_v25 }
 0xe6f   : > { %v4457_v10 = vpack.c.bf16 %v4456_v45, %v4456_v45 }
 0xe92   : > { %v4360_v50 = vpop.permute.xlu1 %4359 }
 0xe93   : > { %v4367_v48 = vmul.f32 %v4360_v50, %v10123_v43  ;;  %v4368_v9 = vmul.f32 %v4360_v50, %v10126_v11 }
 0xe95   : > { %v4381_v18 = vmul.f32 %v4374_v6, %v4367_v48  ;;  %v4382_v23 = vmul.f32 %v4374_v6, %v4368_v9 }
 0xe96   : > { %v4388_v20 = vpop.permute.xlu1 %4387 }
 0xe97   : > { %v4395_v0 = vadd.f32 %v4388_v20, %v4381_v18  ;;  %v4396_v28 = vadd.f32 %v4388_v20, %v4382_v23 }
 0xe99   : > { %v4403_v60 = vpack.c.bf16 %v4395_v0, %v4395_v0  ;;  %v4404_v3 = vpack.c.bf16 %v4396_v28, %v4396_v28 }
 0xe9a   : > { %v806_v57 = vpop.permute.xlu1 %805 }
 0xe9b   : > { %v810_v7 = vmul.f32 %v806_v57, %v9667_v33  ;;  %v811_v46 = vmul.f32 %v806_v57, %v9670_v34  ;;  %7821 = vmatprep.subr.msk.bf16.mxu0 %vm611_vm1, %v4404_v3  ;;  %v4462_v43 = vsel %vm611_vm1, %v4403_v60, 0  ;;  %v4710_v60 = vlaneseq }
 0xe9c   : > { %4468 = vmatpush1.bf16.msra.mxu0 %v4462_v43 }
 0xe9d   : > { %v824_v11 = vmul.f32 %v820_v58, %v810_v7  ;;  %v825_v62 = vmul.f32 %v820_v58, %v811_v46  ;;  %v4711_v57 = vshrl.u32 %v4710_v60, 7  ;;  %v8694_v46 = vmov 1934713408  }
 0xe9e   : > { %v834_v61 = vpop.permute.xlu1 %833  ;;  %v4772_v43 = vunpack.c.l.s4 %v8694_v46 }
 0xe9f   : > { %v838_v59 = vadd.f32 %v834_v61, %v824_v11  ;;  %v839_v13 = vadd.f32 %v834_v61, %v825_v62  ;;  %7822 = vmatmul.mubr.msk.bf16.vlgmr.msra.gmra.mrb[28].mxu0 %vm607_vm2, %v4457_v10 }
 0xea1   : > { %v4511_v33 = vpack.c.bf16 %v839_v13, %v839_v13  ;;  %v4510_v34 = vpack.c.bf16 %v838_v59, %v838_v59  ;;  %v4773_v59 = vunpack.c.0.s8 %v4772_v43 }
 0xea2   : > { %v4201_v19 = vpop.permute.xlu1 %4200 }
 0xea3   : > { %v4205_v21 = vmul.f32 %v4201_v19, %v4191_v15  ;;  %v4206_v22 = vmul.f32 %v4201_v19, %v4192_v17  ;;  %4514 = vmatprep.subr.bf16.mxu0 %v4511_v33 }
 0xea5   : > { %4515 = vmatpush1.bf16.xpose.msra.mxu0 %v4510_v34  ;;  %v4220_v52 = vadd.f32 %v4215_v51, %v4206_v22  ;;  %v4219_v29 = vadd.f32 %v4215_v51, %v4205_v21 }
 0xea7   : > { %v4509_v30 = vpack.c.bf16 %v4220_v52, %v4220_v52  ;;  %v4508_v14 = vpack.c.bf16 %v4219_v29, %v4219_v29  ;;  %v10235_v52 = vsub.s32 %v4773_v59, %v4711_v57 }
 0xea9   : > { %4546 = vmatprep.mubr.bf16.mxu0 %v4509_v30  ;;  %11685 = vst [vmem:[#allocation2_spill] sm:$0xff] %v10235_v52 }
 0xeac   : > { %4547 = vmatmul.mubr.bf16.vlgmr.msra.gmra.mrb[32].mxu0 %v4508_v14 }
 0xead   : > { %4608 = vmatprep.mubr.bf16.mxu0 %v11622_v1 }
 0xf72   : > { %v10182_v16 = vpop.f32.mrb[28].mxu0 }
 0xf73   : > { %v10184_v27 = vpop.f32.mrb[29].mxu0 }
 0xf74   : > { %v4505_v49 = vpop.f32.mrb[30].mxu0 }
 0xf75   : > { %v4506_v25 = vpop.f32.mrb[31].mxu0 }
 0xf7f   : > { %v4548_v32 = vpop.f32.mrb[32].mxu0 }
 0xf80   : > { %v4554_v35 = vmul.f32 0.35355338, %v4548_v32  ;;  %v4550_v36 = vpop.f32.mrb[33].mxu0 }
 0xf81   : > { %v4551_v37 = vpop.f32.mrb[34].mxu0 }
 0xf82   : > { %v4552_v31 = vpop.f32.mrb[35].mxu0  ;;  %v4555_v38 = vsel %vm607_vm2, %v4554_v35, -inf }
 0xf83   : > { %4556 = vmax.xlane.f32.xlu1 %v4555_v38 }
 0xf94   : > { %4378 = vperm.xlu1 %7976, %v4222_v39  }
 0xf98   : > { %4392 = vperm.xlu1 %7976, %v7818_v12  }
0x1010   : > { %v4557_v40 = vpop.xlane.xlu1 %4556 }
0x1011   : > { %v4558_v4 = vsub.f32 %v4554_v35, %v4557_v40 }
0x1013   : > { %v4559_v47 = vmul.f32 1.442695, %v4558_v4 }
0x1014   : > { %v4379_v2 = vpop.permute.xlu1 %4378 }
0x1015   : > { %8522 = vpow2.f32 %v4559_v47 }
0x1018   : > { %v4393_v24 = vpop.permute.xlu1 %4392 }
0x101f   : > { %v8523_v53 = vpop.eup %8522 }
0x1020   : > { %v4561_v54 = vsel %vm607_vm2, %v8523_v53, 0.0 }
0x1021   : > { %4562 = vadd.xlane.f32.xlu0 %v4561_v54 }
0x1037   : > { %4364 = vperm.xlu0 %7975, %v10160_v5  }
0x103b   : > { %4663 = vrot.lane.b32.xlu0 %v10184_v27, %s8686_s17 }
0x103f   : > { %4669 = vrot.lane.b32.xlu0 %v10184_v27, %s8687_s18 }
0x1043   : > { %4675 = vrot.lane.b32.xlu0 %v10184_v27, %s8688_s19 }
0x1047   : > { %4681 = vrot.lane.b32.xlu0 %v10184_v27, %s8689_s20 }
0x104b   : > { %4687 = vrot.lane.b32.xlu0 %v10184_v27, %s8690_s23 }
0x104f   : > { %4693 = vrot.lane.b32.xlu0 %v10184_v27, %s8691_s24 }
0x1053   : > { %4699 = vrot.lane.b32.xlu0 %v10184_v27, %s8692_s26 }
0x1057   : > { %4619 = vrot.lane.b32.xlu0 %v10182_v16, %s8686_s17 }
0x105b   : > { %4625 = vrot.lane.b32.xlu0 %v10182_v16, %s8687_s18 }
0x105f   : > { %4631 = vrot.lane.b32.xlu0 %v10182_v16, %s8688_s19 }
0x1063   : > { %4637 = vrot.lane.b32.xlu0 %v10182_v16, %s8689_s20 }
0x1067   : > { %4643 = vrot.lane.b32.xlu0 %v10182_v16, %s8690_s23 }
0x106b   : > { %4649 = vrot.lane.b32.xlu0 %v10182_v16, %s8691_s24 }
0x106f   : > { %4655 = vrot.lane.b32.xlu0 %v10182_v16, %s8692_s26 }
0x10ae   : > { %v4563_v8 = vpop.xlane.xlu0 %4562 }
0x10af   : > { %8524 = vrcp.f32 %v4563_v8 }
0x10b6   : > { %v4365_v5 = vpop.permute.xlu0 %4364 }
0x10b7   : > { %v4369_v26 = vmul.f32 %v4365_v5, %v10117_v41  ;;  %v4370_v56 = vmul.f32 %v4365_v5, %v10120_v42  ;;  %v8693_v42 = vmov 1983009808  }
0x10b8   : > { %v4708_v28 = vunpack.c.l.s4 %v8693_v42 }
0x10b9   : > { %v4383_v55 = vmul.f32 %v4379_v2, %v4369_v26  ;;  %v4384_v6 = vmul.f32 %v4379_v2, %v4370_v56  ;;  %v8525_v58 = vpop.eup %8524 }
0x10ba   : > { %v4664_v44 = vpop.permute.xlu0 %4663  ;;  %v4565_v23 = vmul.f32 %v8525_v58, %v8523_v53  ;;  %v4709_v45 = vunpack.c.0.s8 %v4708_v28 }
0x10bb   : > { %v4398_v50 = vadd.f32 %v4393_v24, %v4384_v6  ;;  %v4397_v48 = vadd.f32 %v4393_v24, %v4383_v55 }
0x10bc   : > { %v4566_v0 = vpack.c.bf16 %v4565_v23, %v4565_v23  ;;  %v10229_v62 = vsub.s32 %v4709_v45, %v4711_v57 }
0x10bd   : > { %v4513_v9 = vpack.c.bf16 %v4398_v50, %v4398_v50  ;;  %v4512_v18 = vpack.c.bf16 %v4397_v48, %v4397_v48 }
0x10be   : > { %v4670_v63 = vpop.permute.xlu0 %4669 }
0x10bf   : > { %7823 = vmatprep.subr.msk.bf16.mxu0 %vm611_vm1, %v4513_v9  ;;  %v4571_v20 = vsel %vm611_vm1, %v4512_v18, 0  ;;  %v4841_v10 = vcombine.low %v10184_v27, %v4670_v63  ;;  %v4842_v19 = vcombine.high %v10184_v27, %v4670_v63 }
0x10c0   : > { %4577 = vmatpush1.bf16.msra.mxu0 %v4571_v20 }
0x10c1   : > { %v4849_v34 = vrot.slane %v4841_v10, %v10229_v62  ;;  %v4856_v27 = vrot.slane %v4842_v19, %v10229_v62 }
0x10c2   : > { %v4676_v41 = vpop.permute.xlu0 %4675 }
0x10c3   : > { %7824 = vmatmul.mubr.msk.bf16.vlgmr.msra.gmra.mrb[36].mxu0 %vm607_vm2, %v4566_v0  ;;  %v4857_v11 = vcombine.low %v4664_v44, %v4676_v41  ;;  %v4858_v13 = vcombine.high %v4664_v44, %v4676_v41 }
0x10c4   : > { %6461 = vmatprep.mubr.bf16.mxu0 %v11622_v1 }
0x10c5   : > { %v4865_v15 = vrot.slane %v4857_v11, %v10229_v62  ;;  %v4872_v29 = vrot.slane %v4858_v13, %v10229_v62 }
0x10c6   : > { %v4682_v3 = vpop.permute.xlu0 %4681 }
0x10c7   : > { %v4905_v30 = vcombine.low %v4849_v34, %v4865_v15  ;;  %v4906_v36 = vcombine.high %v4849_v34, %v4865_v15  ;;  %v4921_v40 = vcombine.low %v4856_v27, %v4872_v29  ;;  %v4922_v53 = vcombine.high %v4856_v27, %v4872_v29 }
0x10c9   : > { %v4913_v12 = vrot.slane %v4905_v30, %v10235_v52  ;;  %v4920_v8 = vrot.slane %v4906_v36, %v10235_v52  ;;  %v4929_v55 = vrot.slane %v4921_v40, %v10235_v52  ;;  %v4936_v24 = vrot.slane %v4922_v53, %v10235_v52 }
0x10ca   : > { %v4688_v7 = vpop.permute.xlu0 %4687 }
0x10ce   : > { %v4694_v61 = vpop.permute.xlu0 %4693 }
0x10cf   : > { %v4873_v17 = vcombine.low %v4682_v3, %v4694_v61  ;;  %v4874_v33 = vcombine.high %v4682_v3, %v4694_v61 }
0x10d1   : > { %v4881_v14 = vrot.slane %v4873_v17, %v10229_v62  ;;  %v4888_v49 = vrot.slane %v4874_v33, %v10229_v62 }
0x10d2   : > { %v4700_v21 = vpop.permute.xlu0 %4699 }
0x10d3   : > { %v4889_v22 = vcombine.low %v4688_v7, %v4700_v21  ;;  %v4890_v51 = vcombine.high %v4688_v7, %v4700_v21 }
0x10d5   : > { %v4897_v25 = vrot.slane %v4889_v22, %v10229_v62  ;;  %v4904_v32 = vrot.slane %v4890_v51, %v10229_v62 }
0x10d6   : > { %v4620_v35 = vpop.permute.xlu0 %4619 }
0x10d7   : > { %v4937_v37 = vcombine.low %v4881_v14, %v4897_v25  ;;  %v4938_v31 = vcombine.high %v4881_v14, %v4897_v25  ;;  %v4953_v38 = vcombine.low %v4888_v49, %v4904_v32  ;;  %v4954_v39 = vcombine.high %v4888_v49, %v4904_v32 }
0x10d9   : > { %v4945_v4 = vrot.slane %v4937_v37, %v10235_v52  ;;  %v4952_v47 = vrot.slane %v4938_v31, %v10235_v52  ;;  %v4961_v2 = vrot.slane %v4953_v38, %v10235_v52  ;;  %v4968_v26 = vrot.slane %v4954_v39, %v10235_v52 }
0x10da   : > { %v4626_v54 = vpop.permute.xlu0 %4625 }
0x10db   : > { %v10248_v5 = vcombine.low %v4913_v12, %v4945_v4  ;;  %v10251_v56 = vcombine.high %v4913_v12, %v4945_v4  ;;  %v10256_v58 = vcombine.low %v4920_v8, %v4952_v47  ;;  %v10259_v50 = vcombine.low %v4929_v55, %v4961_v2 }
0x10dc   : > { %v10261_v48 = vcombine.low %v4936_v24, %v4968_v26  ;;  %v10265_v18 = vcombine.high %v4920_v8, %v4952_v47  ;;  %v10269_v20 = vcombine.high %v4929_v55, %v4961_v2  ;;  %v10273_v28 = vcombine.high %v4936_v24, %v4968_v26 }
0x10dd   : > { %v5253_v6 = vsel %vm5249_vm3, %v10248_v5, -inf  ;;  %v5265_v9 = vsel %vm5249_vm3, %v10256_v58, -inf  ;;  %v4705_v60 = vcombine.low %v10182_v16, %v4626_v54  ;;  %v4706_v57 = vcombine.high %v10182_v16, %v4626_v54 }
0x10de   : > { %5254 = vmax.xlane.f32.xlu0 %v5253_v6  ;;  %v4632_v44 = vpop.permute.xlu0 %4631  ;;  %v5271_v63 = vsel %vm5249_vm3, %v10265_v18, -inf  ;;  %v5283_v42 = vsel %vm5249_vm3, %v10269_v20, -inf  ;;  %v5295_v11 = vsel %vm5249_vm3, %v10273_v28, -inf }
0x10df   : > { %v4721_v41 = vcombine.low %v4620_v35, %v4632_v44  ;;  %v4722_v3 = vcombine.high %v4620_v35, %v4632_v44  ;;  %v4713_v10 = vrot.slane %v4705_v60, %v10229_v62  ;;  %v4720_v17 = vrot.slane %v4706_v57, %v10229_v62 }
0x10e1   : > { %v4729_v7 = vrot.slane %v4721_v41, %v10229_v62  ;;  %v4736_v61 = vrot.slane %v4722_v3, %v10229_v62  ;;  %v5277_v41 = vsel %vm5249_vm3, %v10259_v50, -inf }
0x10e2   : > { %5266 = vmax.xlane.f32.xlu0 %v5265_v9  ;;  %v4638_v23 = vpop.permute.xlu0 %4637 }
0x10e3   : > { %v4769_v33 = vcombine.low %v4713_v10, %v4729_v7  ;;  %v4770_v22 = vcombine.high %v4713_v10, %v4729_v7  ;;  %v4785_v51 = vcombine.low %v4720_v17, %v4736_v61  ;;  %v4786_v29 = vcombine.high %v4720_v17, %v4736_v61 }
0x10e5   : > { %v4777_v32 = vrot.slane %v4769_v33, %v10235_v52  ;;  %v4784_v31 = vrot.slane %v4770_v22, %v10235_v52  ;;  %v4793_v38 = vrot.slane %v4785_v51, %v10235_v52  ;;  %v4800_v39 = vrot.slane %v4786_v29, %v10235_v52 }
0x10e6   : > { %5272 = vmax.xlane.f32.xlu0 %v5271_v63  ;;  %v4644_v0 = vpop.permute.xlu0 %4643 }
0x10ea   : > { %5284 = vmax.xlane.f32.xlu0 %v5283_v42  ;;  %v4650_v45 = vpop.permute.xlu0 %4649  ;;  %v5289_v42 = vsel %vm5249_vm3, %v10261_v48, -inf }
0x10eb   : > { %v4737_v46 = vcombine.low %v4638_v23, %v4650_v45  ;;  %v4738_v43 = vcombine.high %v4638_v23, %v4650_v45 }
0x10ed   : > { %v4745_v16 = vrot.slane %v4737_v46, %v10229_v62  ;;  %v4752_v19 = vrot.slane %v4738_v43, %v10229_v62 }
0x10ee   : > { %5296 = vmax.xlane.f32.xlu0 %v5295_v11  ;;  %v4656_v59 = vpop.permute.xlu0 %4655 }
0x10ef   : > { %v4753_v13 = vcombine.low %v4644_v0, %v4656_v59  ;;  %v4754_v15 = vcombine.high %v4644_v0, %v4656_v59  ;;  %v5259_v0 = vsel %vm5249_vm3, %v10251_v56, -inf }
0x10f1   : > { %v4761_v34 = vrot.slane %v4753_v13, %v10229_v62  ;;  %v4768_v21 = vrot.slane %v4754_v15, %v10229_v62 }
0x10f3   : > { %v4801_v30 = vcombine.low %v4745_v16, %v4761_v34  ;;  %v4802_v14 = vcombine.high %v4745_v16, %v4761_v34  ;;  %v4817_v49 = vcombine.low %v4752_v19, %v4768_v21  ;;  %v4818_v25 = vcombine.high %v4752_v19, %v4768_v21 }
0x10f5   : > { %v4809_v27 = vrot.slane %v4801_v30, %v10235_v52  ;;  %v4816_v35 = vrot.slane %v4802_v14, %v10235_v52  ;;  %v4825_v36 = vrot.slane %v4817_v49, %v10235_v52  ;;  %v4832_v37 = vrot.slane %v4818_v25, %v10235_v52 }
0x10f7   : > { %v10295_v12 = vcombine.high %v4777_v32, %v4809_v27  ;;  %v10297_v40 = vcombine.low %v4777_v32, %v4809_v27  ;;  %v10299_v4 = vcombine.low %v4784_v31, %v4816_v35  ;;  %v10301_v47 = vcombine.low %v4793_v38, %v4825_v36 }
0x10f8   : > { %v10303_v53 = vcombine.low %v4800_v39, %v4832_v37  ;;  %v10307_v8 = vcombine.high %v4784_v31, %v4816_v35  ;;  %v10311_v26 = vcombine.high %v4793_v38, %v4825_v36  ;;  %v10315_v6 = vcombine.high %v4800_v39, %v4832_v37 }
0x10f9   : > { %v5256_v54 = vsel %vm5249_vm3, %v10295_v12, -inf  ;;  %v5250_v60 = vsel %vm5249_vm3, %v10297_v40, -inf  ;;  %v5262_v3 = vsel %vm5249_vm3, %v10299_v4, -inf  ;;  %v5274_v45 = vsel %vm5249_vm3, %v10301_v47, -inf }
0x10fa   : > { %5257 = vmax.xlane.f32.xlu0 %v5256_v54  ;;  %v5268_v2 = vsel %vm5249_vm3, %v10307_v8, -inf  ;;  %v5280_v55 = vsel %vm5249_vm3, %v10311_v26, -inf  ;;  %v5292_v24 = vsel %vm5249_vm3, %v10315_v6, -inf  ;;  %v5286_v57 = vsel %vm5249_vm3, %v10303_v53, -inf }
0x10fe   : > { %5269 = vmax.xlane.f32.xlu0 %v5268_v2 }
0x1102   : > { %5281 = vmax.xlane.f32.xlu0 %v5280_v55 }
0x1106   : > { %5293 = vmax.xlane.f32.xlu0 %v5292_v24 }
0x1196   : > { %v4610_v44 = vpop.f32.mrb[36].mxu0 }
0x1197   : > { %4621 = vrot.lane.b32.xlu1 %v4610_v44, %s8686_s17  ;;  %v10320_v9 = vpop.f32.mrb[37].mxu0 }
0x1198   : > { %v4614_v23 = vpop.f32.mrb[38].mxu0 }
0x1199   : > { %v4615_v63 = vpop.f32.mrb[39].mxu0 }
0x119b   : > { %4627 = vrot.lane.b32.xlu1 %v4610_v44, %s8687_s18 }
0x119f   : > { %4633 = vrot.lane.b32.xlu1 %v4610_v44, %s8688_s19 }
0x11a3   : > { %4639 = vrot.lane.b32.xlu1 %v4610_v44, %s8689_s20 }
0x11a7   : > { %4645 = vrot.lane.b32.xlu1 %v4610_v44, %s8690_s23 }
0x11ab   : > { %4651 = vrot.lane.b32.xlu1 %v4610_v44, %s8691_s24 }
0x11af   : > { %4657 = vrot.lane.b32.xlu1 %v4610_v44, %s8692_s26 }
0x11b3   : > { %4665 = vrot.lane.b32.xlu1 %v10320_v9, %s8686_s17 }
0x11b7   : > { %4671 = vrot.lane.b32.xlu1 %v10320_v9, %s8687_s18 }
0x11bb   : > { %4677 = vrot.lane.b32.xlu1 %v10320_v9, %s8688_s19 }
0x11bf   : > { %4683 = vrot.lane.b32.xlu1 %v10320_v9, %s8689_s20 }
0x11c3   : > { %4689 = vrot.lane.b32.xlu1 %v10320_v9, %s8690_s23 }
0x11c7   : > { %4695 = vrot.lane.b32.xlu1 %v10320_v9, %s8691_s24 }
0x11cb   : > { %4701 = vrot.lane.b32.xlu1 %v10320_v9, %s8692_s26 }
0x11ef   : > { %5260 = vmax.xlane.f32.xlu1 %v5259_v0 }
0x11f3   : > { %5278 = vmax.xlane.f32.xlu1 %v5277_v41 }
0x11f7   : > { %5290 = vmax.xlane.f32.xlu1 %v5289_v42 }
0x11fb   : > { %5251 = vmax.xlane.f32.xlu1 %v5250_v60 }
0x11ff   : > { %5263 = vmax.xlane.f32.xlu1 %v5262_v3 }
0x1203   : > { %5275 = vmax.xlane.f32.xlu1 %v5274_v45 }
0x1207   : > { %5287 = vmax.xlane.f32.xlu1 %v5286_v57 }
0x1209   : > { %v4622_v7 = vpop.permute.xlu1 %4621 }
0x120d   : > { %v4628_v46 = vpop.permute.xlu1 %4627 }
0x120e   : > { %v4977_v13 = vcombine.low %v4610_v44, %v4628_v46  ;;  %v4978_v51 = vcombine.high %v4610_v44, %v4628_v46 }
0x1210   : > { %v4985_v19 = vrot.slane %v4977_v13, %v10229_v62  ;;  %v10372_v38 = vrot.slane %v4978_v51, %v10229_v62 }
0x1211   : > { %v4634_v43 = vpop.permute.xlu1 %4633 }
0x1212   : > { %v4993_v61 = vcombine.low %v4622_v7, %v4634_v43  ;;  %v4994_v34 = vcombine.high %v4622_v7, %v4634_v43 }
0x1214   : > { %v5001_v15 = vrot.slane %v4993_v61, %v10229_v62  ;;  %v10367_v27 = vrot.slane %v4994_v34, %v10229_v62 }
0x1215   : > { %v4640_v11 = vpop.permute.xlu1 %4639 }
0x1216   : > { %v5041_v29 = vcombine.low %v4985_v19, %v5001_v15  ;;  %v5042_v35 = vcombine.high %v4985_v19, %v5001_v15  ;;  %v5057_v44 = vcombine.low %v10372_v38, %v10367_v27 }
0x1218   : > { %v5049_v39 = vrot.slane %v5041_v29, %v10235_v52  ;;  %v5056_v24 = vrot.slane %v5042_v35, %v10235_v52  ;;  %v5065_v57 = vrot.slane %v5057_v44, %v10235_v52 }
0x1219   : > { %v4646_v10 = vpop.permute.xlu1 %4645 }
0x121d   : > { %v4652_v59 = vpop.permute.xlu1 %4651 }
0x121e   : > { %v5009_v17 = vcombine.low %v4640_v11, %v4652_v59  ;;  %v5010_v33 = vcombine.high %v4640_v11, %v4652_v59 }
0x1220   : > { %v5017_v30 = vrot.slane %v5009_v17, %v10229_v62  ;;  %v10364_v25 = vrot.slane %v5010_v33, %v10229_v62 }
0x1221   : > { %v4658_v16 = vpop.permute.xlu1 %4657 }
0x1222   : > { %v5025_v21 = vcombine.low %v4646_v10, %v4658_v16  ;;  %v5026_v22 = vcombine.high %v4646_v10, %v4658_v16 }
0x1224   : > { %v5033_v14 = vrot.slane %v5025_v21, %v10229_v62  ;;  %v10361_v49 = vrot.slane %v5026_v22, %v10229_v62 }
0x1225   : > { %v4666_v32 = vpop.permute.xlu1 %4665 }
0x1226   : > { %v5073_v36 = vcombine.low %v5017_v30, %v5033_v14  ;;  %v5074_v37 = vcombine.high %v5017_v30, %v5033_v14  ;;  %v5089_v31 = vcombine.low %v10364_v25, %v10361_v49 }
0x1228   : > { %v5081_v54 = vrot.slane %v5073_v36, %v10235_v52  ;;  %v5088_v2 = vrot.slane %v5074_v37, %v10235_v52  ;;  %v5097_v0 = vrot.slane %v5089_v31, %v10235_v52 }
0x1229   : > { %v4672_v55 = vpop.permute.xlu1 %4671 }
0x122a   : > { %v10380_v23 = vcombine.high %v5049_v39, %v5081_v54  ;;  %v10382_v63 = vcombine.low %v5049_v39, %v5081_v54  ;;  %v10389_v60 = vcombine.high %v5056_v24, %v5088_v2  ;;  %v10391_v3 = vcombine.low %v5056_v24, %v5088_v2  ;;  %v5255_v54 = vpop.xlane.xlu0 %5254 }
0x122b   : > { %v10398_v43 = vcombine.high %v5065_v57, %v5097_v0  ;;  %v10400_v11 = vcombine.low %v5065_v57, %v5097_v0  ;;  %v5113_v33 = vcombine.low %v10320_v9, %v4672_v55  ;;  %v5114_v14 = vcombine.high %v10320_v9, %v4672_v55 }
0x122c   : > { %v5304_v41 = vsel %vm5249_vm3, %v10380_v23, -inf  ;;  %v5298_v42 = vsel %vm5249_vm3, %v10382_v63, -inf  ;;  %v5316_v7 = vsel %vm5249_vm3, %v10389_v60, -inf  ;;  %v5310_v46 = vsel %vm5249_vm3, %v10391_v3, -inf }
0x122d   : > { %5305 = vmax.xlane.f32.xlu0 %v5304_v41  ;;  %5299 = vmax.xlane.f32.xlu1 %v5298_v42  ;;  %v4678_v45 = vpop.permute.xlu1 %4677  ;;  %11686 = vst [vmem:[#allocation3_spill] sm:$0xff] %v10400_v11  ;;  %v5328_v61 = vsel %vm5249_vm3, %v10398_v43, -inf  ;;  %v5322_v59 = vsel %vm5249_vm3, %v10400_v11, -inf  ;;  %v5121_v22 = vrot.slane %v5113_v33, %v10229_v62  ;;  %v5128_v41 = vrot.slane %v5114_v14, %v10229_v62 }
0x122e   : > { %v5129_v15 = vcombine.low %v4666_v32, %v4678_v45  ;;  %v5130_v51 = vcombine.high %v4666_v32, %v4678_v45 }
0x1230   : > { %v5137_v16 = vrot.slane %v5129_v15, %v10229_v62  ;;  %v5144_v2 = vrot.slane %v5130_v51, %v10229_v62  ;;  %v5090_v51 = vcombine.high %v10364_v25, %v10361_v49 }
0x1231   : > { %5317 = vmax.xlane.f32.xlu0 %v5316_v7  ;;  %5311 = vmax.xlane.f32.xlu1 %v5310_v46  ;;  %v4684_v10 = vpop.permute.xlu1 %4683 }
0x1232   : > { %v5177_v35 = vcombine.low %v5121_v22, %v5137_v16  ;;  %v5178_v24 = vcombine.high %v5121_v22, %v5137_v16  ;;  %v5193_v57 = vcombine.low %v5128_v41, %v5144_v2  ;;  %v5104_v25 = vrot.slane %v5090_v51, %v10235_v52 }
0x1234   : > { %v5185_v9 = vrot.slane %v5177_v35, %v10235_v52  ;;  %v5192_v45 = vrot.slane %v5178_v24, %v10235_v52 }
0x1235   : > { %5329 = vmax.xlane.f32.xlu0 %v5328_v61  ;;  %5323 = vmax.xlane.f32.xlu1 %v5322_v59  ;;  %v4690_v13 = vpop.permute.xlu1 %4689 }
0x1239   : > { %v4696_v17 = vpop.permute.xlu1 %4695 }
0x123a   : > { %v5145_v19 = vcombine.low %v4684_v10, %v4696_v17  ;;  %v5146_v34 = vcombine.high %v4684_v10, %v4696_v17  ;;  %v5347_v10 = vsub.f32 %v10248_v5, %v5255_v54 }
0x123c   : > { %v5153_v36 = vrot.slane %v5145_v19, %v10229_v62  ;;  %v5160_v39 = vrot.slane %v5146_v34, %v10229_v62  ;;  %v5194_v19 = vcombine.high %v5128_v41, %v5144_v2  ;;  %v5201_v34 = vrot.slane %v5193_v57, %v10235_v52 }
0x123d   : > { %v4702_v21 = vpop.permute.xlu1 %4701 }
0x123e   : > { %v5161_v29 = vcombine.low %v4690_v13, %v4702_v21  ;;  %v5162_v30 = vcombine.high %v4690_v13, %v4702_v21  ;;  %v5267_v13 = vpop.xlane.xlu0 %5266  ;;  %v5380_v21 = vmul.f32 1.442695, %v5347_v10 }
0x123f   : > { %v5351_v22 = vsub.f32 %v10256_v58, %v5267_v13 }
0x1240   : > { %v5169_v37 = vrot.slane %v5161_v29, %v10229_v62  ;;  %v5176_v31 = vrot.slane %v5162_v30, %v10229_v62  ;;  %8526 = vpow2.f32 %v5380_v21 }
0x1241   : > { %v5388_v49 = vmul.f32 1.442695, %v5351_v22 }
0x1242   : > { %v5209_v44 = vcombine.low %v5153_v36, %v5169_v37  ;;  %v5210_v0 = vcombine.high %v5153_v36, %v5169_v37  ;;  %v5225_v32 = vcombine.low %v5160_v39, %v5176_v31  ;;  %v5226_v61 = vcombine.high %v5160_v39, %v5176_v31  ;;  %v5273_v10 = vpop.xlane.xlu0 %5272 }
0x1243   : > { %v5058_v37 = vcombine.high %v10372_v38, %v10367_v27  ;;  %v5208_v31 = vrot.slane %v5194_v19, %v10235_v52  ;;  %8528 = vpow2.f32 %v5388_v49  ;;  %v5353_v13 = vsub.f32 %v10265_v18, %v5273_v10 }
0x1244   : > { %v5217_v55 = vrot.slane %v5209_v44, %v10235_v52  ;;  %v5224_v42 = vrot.slane %v5210_v0, %v10235_v52  ;;  %v5233_v59 = vrot.slane %v5225_v32, %v10235_v52  ;;  %v5240_v29 = vrot.slane %v5226_v61, %v10235_v52 }
0x1245   : > { %v5072_v27 = vrot.slane %v5058_v37, %v10235_v52 }
0x1246   : > { %v10420_v7 = vcombine.high %v5185_v9, %v5217_v55  ;;  %v10422_v46 = vcombine.low %v5185_v9, %v5217_v55  ;;  %v10430_v33 = vcombine.high %v5192_v45, %v5224_v42  ;;  %v10432_v16 = vcombine.low %v5192_v45, %v5224_v42  ;;  %v5285_v61 = vpop.xlane.xlu0 %5284 }
0x1247   : > { %v10443_v35 = vcombine.high %v5201_v34, %v5233_v59  ;;  %v10445_v36 = vcombine.low %v5201_v34, %v5233_v59  ;;  %v10455_v2 = vcombine.high %v5208_v31, %v5240_v29  ;;  %v10457_v24 = vcombine.low %v5208_v31, %v5240_v29 }
0x1248   : > { %11687 = vst [vmem:[#allocation4_spill] sm:$0xff] %v10420_v7  ;;  %11688 = vst [vmem:[#allocation5_spill] sm:$0xff] %v10422_v46  ;;  %v5307_v15 = vsel %vm5249_vm3, %v10420_v7, -inf  ;;  %v5301_v17 = vsel %vm5249_vm3, %v10422_v46, -inf  ;;  %v5319_v30 = vsel %vm5249_vm3, %v10430_v33, -inf  ;;  %v5313_v14 = vsel %vm5249_vm3, %v10432_v16, -inf }
0x1249   : > { %11689 = vst [vmem:[#allocation6_spill] sm:$0xff] %v10430_v33  ;;  %11690 = vst [vmem:[#allocation7_spill] sm:$0xff] %v10432_v16  ;;  %5308 = vmax.xlane.f32.xlu0 %v5307_v15  ;;  %5302 = vmax.xlane.f32.xlu1 %v5301_v17  ;;  %v5331_v39 = vsel %vm5249_vm3, %v10443_v35, -inf  ;;  %v5325_v54 = vsel %vm5249_vm3, %v10445_v36, -inf  ;;  %v5343_v38 = vsel %vm5249_vm3, %v10455_v2, -inf  ;;  %v5337_v44 = vsel %vm5249_vm3, %v10457_v24, -inf }
0x124a   : > { %11691 = vst [vmem:[#allocation8_spill] sm:$0xff] %v10443_v35  ;;  %11692 = vst [vmem:[#allocation9_spill] sm:$0xff] %v10445_v36  ;;  %v10464_v0 = vcombine.high %v5072_v27, %v5104_v25  ;;  %v10466_v32 = vcombine.low %v5072_v27, %v5104_v25  ;;  %v10472_v55 = vpop.eup %8526  ;;  %v5297_v59 = vpop.xlane.xlu0 %5296  ;;  %v5392_v34 = vmul.f32 1.442695, %v5353_v13  ;;  %v5357_v21 = vsub.f32 %v10269_v20, %v5285_v61 }
0x124b   : > { %11693 = vst [vmem:[#allocation10_spill] sm:$0xff] %v10455_v2  ;;  %11694 = vst [vmem:[#allocation11_spill] sm:$0xff] %v10457_v24  ;;  %v5445_v42 = vsel %vm5249_vm3, %v10472_v55, 0.0 }
0x124c   : > { %11695 = vst [vmem:[#allocation12_spill] sm:$0xff] %v10464_v0  ;;  %11696 = vst [vmem:[#allocation13_spill] sm:$0xff] %v10466_v32  ;;  %v5340_v41 = vsel %vm5249_vm3, %v10464_v0, -inf  ;;  %v5334_v9 = vsel %vm5249_vm3, %v10466_v32, -inf }
0x124d   : > { %5320 = vmax.xlane.f32.xlu0 %v5319_v30  ;;  %5314 = vmax.xlane.f32.xlu1 %v5313_v14  ;;  %v10476_v45 = vpop.eup %8528  ;;  %v5400_v30 = vmul.f32 1.442695, %v5357_v21  ;;  %v5361_v14 = vsub.f32 %v10273_v28, %v5297_v59 }
0x124e   : > { %v5457_v57 = vsel %vm5249_vm3, %v10476_v45, 0.0  ;;  %v5258_v19 = vpop.xlane.xlu0 %5257 }
0x1251   : > { %5332 = vmax.xlane.f32.xlu0 %v5331_v39  ;;  %5326 = vmax.xlane.f32.xlu1 %v5325_v54  ;;  %v5408_v39 = vmul.f32 1.442695, %v5361_v14  ;;  %v5348_v54 = vsub.f32 %v10295_v12, %v5258_v19 }
0x1252   : > { %v5270_v31 = vpop.xlane.xlu0 %5269 }
0x1255   : > { %5344 = vmax.xlane.f32.xlu0 %v5343_v38  ;;  %5338 = vmax.xlane.f32.xlu1 %v5337_v44 }
0x1259   : > { %5341 = vmax.xlane.f32.xlu0 %v5340_v41  ;;  %5335 = vmax.xlane.f32.xlu1 %v5334_v9  ;;  %v5282_v41 = vpop.xlane.xlu0 %5281 }
0x125d   : > { %5446 = vadd.xlane.f32.xlu1 %v5445_v42  ;;  %v5382_v42 = vmul.f32 1.442695, %v5348_v54 }
0x1261   : > { %5458 = vadd.xlane.f32.xlu1 %v5457_v57  ;;  %v5352_v57 = vsub.f32 %v10307_v8, %v5270_v31 }
0x1263   : > { %v5390_v19 = vmul.f32 1.442695, %v5352_v57 }
0x127c   : > { %v5261_v15 = vpop.xlane.xlu1 %5260 }
0x127d   : > { %v5349_v17 = vsub.f32 %v10251_v56, %v5261_v15 }
0x127f   : > { %v5384_v22 = vmul.f32 1.442695, %v5349_v17 }
0x1280   : > { %v5279_v51 = vpop.xlane.xlu1 %5278 }
0x1281   : > { %8530 = vpow2.f32 %v5384_v22  ;;  %v5355_v29 = vsub.f32 %v10259_v50, %v5279_v51  ;;  %v5294_v22 = vpop.xlane.xlu0 %5293 }
0x1282   : > { %8532 = vpow2.f32 %v5392_v34  ;;  %v5356_v34 = vsub.f32 %v10311_v26, %v5282_v41 }
0x1283   : > { %v5396_v37 = vmul.f32 1.442695, %v5355_v29 }
0x1284   : > { %v5291_v49 = vpop.xlane.xlu1 %5290 }
0x1285   : > { %8534 = vpow2.f32 %v5396_v37  ;;  %v5359_v25 = vsub.f32 %v10261_v48, %v5291_v49  ;;  %v5398_v49 = vmul.f32 1.442695, %v5356_v34 }
0x1286   : > { %8536 = vpow2.f32 %v5400_v30 }
0x1287   : > { %v5404_v27 = vmul.f32 1.442695, %v5359_v25  ;;  %v5360_v25 = vsub.f32 %v10315_v6, %v5294_v22 }
0x1288   : > { %v5252_v38 = vpop.xlane.xlu1 %5251 }
0x1289   : > { %8538 = vpow2.f32 %v5404_v27  ;;  %v5346_v44 = vsub.f32 %v10297_v40, %v5252_v38  ;;  %v5406_v57 = vmul.f32 1.442695, %v5360_v25 }
0x128a   : > { %8540 = vpow2.f32 %v5408_v39 }
0x128b   : > { %v10488_v9 = vpop.eup %8530  ;;  %v5378_v10 = vmul.f32 1.442695, %v5346_v44 }
0x128c   : > { %v5264_v61 = vpop.xlane.xlu1 %5263  ;;  %v5451_v59 = vsel %vm5249_vm3, %v10488_v9, 0.0  ;;  %v10493_v13 = vpop.eup %8532 }
0x128d   : > { %8542 = vpow2.f32 %v5378_v10  ;;  %v5350_v15 = vsub.f32 %v10299_v4, %v5264_v61  ;;  %5452 = vadd.xlane.f32.xlu0 %v5451_v59  ;;  %v5463_v29 = vsel %vm5249_vm3, %v10493_v13, 0.0 }
0x128e   : > { %8544 = vpow2.f32 %v5382_v42 }
0x128f   : > { %v10496_v17 = vpop.eup %8534  ;;  %v5386_v21 = vmul.f32 1.442695, %v5350_v15 }
0x1290   : > { %v5276_v51 = vpop.xlane.xlu1 %5275  ;;  %v5469_v30 = vsel %vm5249_vm3, %v10496_v17, 0.0  ;;  %v10503_v14 = vpop.eup %8536 }
0x1291   : > { %8546 = vpow2.f32 %v5386_v21  ;;  %v5354_v37 = vsub.f32 %v10301_v47, %v5276_v51  ;;  %5464 = vadd.xlane.f32.xlu0 %v5463_v29  ;;  %5470 = vadd.xlane.f32.xlu1 %v5469_v30  ;;  %v5475_v27 = vsel %vm5249_vm3, %v10503_v14, 0.0 }
0x1292   : > { %8548 = vpow2.f32 %v5390_v19 }
0x1293   : > { %v10506_v31 = vpop.eup %8538  ;;  %v5394_v39 = vmul.f32 1.442695, %v5354_v37 }
0x1294   : > { %v5288_v54 = vpop.xlane.xlu1 %5287  ;;  %v5481_v38 = vsel %vm5249_vm3, %v10506_v31, 0.0  ;;  %v10513_v44 = vpop.eup %8540 }
0x1295   : > { %8550 = vpow2.f32 %v5394_v39  ;;  %v5358_v41 = vsub.f32 %v10303_v53, %v5288_v54  ;;  %5476 = vadd.xlane.f32.xlu0 %v5475_v27  ;;  %5482 = vadd.xlane.f32.xlu1 %v5481_v38  ;;  %v5487_v61 = vsel %vm5249_vm3, %v10513_v44, 0.0 }
0x1296   : > { %8552 = vpow2.f32 %v5398_v49 }
0x1297   : > { %v10516_v42 = vpop.eup %8542  ;;  %v5402_v10 = vmul.f32 1.442695, %v5358_v41 }
0x1298   : > { %v5442_v59 = vsel %vm5249_vm3, %v10516_v42, 0.0  ;;  %v10522_v15 = vpop.eup %8544 }
0x1299   : > { %8554 = vpow2.f32 %v5402_v10  ;;  %5488 = vadd.xlane.f32.xlu0 %v5487_v61  ;;  %5443 = vadd.xlane.f32.xlu1 %v5442_v59  ;;  %v5448_v34 = vsel %vm5249_vm3, %v10522_v15, 0.0 }
0x129a   : > { %8556 = vpow2.f32 %v5406_v57 }
0x129b   : > { %v10524_v19 = vpop.eup %8546 }
0x129c   : > { %v5454_v21 = vsel %vm5249_vm3, %v10524_v19, 0.0  ;;  %v10530_v22 = vpop.eup %8548 }
0x129d   : > { %5449 = vadd.xlane.f32.xlu0 %v5448_v34  ;;  %5455 = vadd.xlane.f32.xlu1 %v5454_v21  ;;  %v5460_v29 = vsel %vm5249_vm3, %v10530_v22, 0.0 }
0x129f   : > { %v10532_v51 = vpop.eup %8550 }
0x12a0   : > { %v5466_v30 = vsel %vm5249_vm3, %v10532_v51, 0.0  ;;  %v10538_v37 = vpop.eup %8552 }
0x12a1   : > { %5461 = vadd.xlane.f32.xlu0 %v5460_v29  ;;  %5467 = vadd.xlane.f32.xlu1 %v5466_v30  ;;  %v5472_v25 = vsel %vm5249_vm3, %v10538_v37, 0.0 }
0x12a3   : > { %v10540_v49 = vpop.eup %8554 }
0x12a4   : > { %v5478_v39 = vsel %vm5249_vm3, %v10540_v49, 0.0  ;;  %v10546_v54 = vpop.eup %8556 }
0x12a5   : > { %5473 = vadd.xlane.f32.xlu0 %v5472_v25  ;;  %5479 = vadd.xlane.f32.xlu1 %v5478_v39  ;;  %v5484_v27 = vsel %vm5249_vm3, %v10546_v54, 0.0 }
0x12a9   : > { %5485 = vadd.xlane.f32.xlu0 %v5484_v27 }
0x12ba   : > { %v5306_v38 = vpop.xlane.xlu0 %5305  ;;  %v5300_v41 = vpop.xlane.xlu1 %5299 }
0x12bb   : > { %v5364_v57 = vsub.f32 %v10380_v23, %v5306_v38  ;;  %v5362_v10 = vsub.f32 %v10382_v63, %v5300_v41 }
0x12bd   : > { %v5414_v61 = vmul.f32 1.442695, %v5364_v57  ;;  %v5410_v59 = vmul.f32 1.442695, %v5362_v10 }
0x12be   : > { %v5318_v34 = vpop.xlane.xlu0 %5317  ;;  %v5312_v21 = vpop.xlane.xlu1 %5311 }
0x12bf   : > { %8558 = vpow2.f32 %v5414_v61  ;;  %v5368_v29 = vsub.f32 %v10389_v60, %v5318_v34  ;;  %v5366_v30 = vsub.f32 %v10391_v3, %v5312_v21 }
0x12c0   : > { %8560 = vpow2.f32 %v5410_v59 }
0x12c1   : > { %v5422_v25 = vmul.f32 1.442695, %v5368_v29  ;;  %v5418_v39 = vmul.f32 1.442695, %v5366_v30 }
0x12c2   : > { %v5330_v1 = vpop.xlane.xlu0 %5329  ;;  %v5324_v27 = vpop.xlane.xlu1 %5323 }
0x12c3   : > { %8562 = vpow2.f32 %v5422_v25  ;;  %v5372_v52 = vsub.f32 %v10398_v43, %v5330_v1  ;;  %v5370_v38 = vsub.f32 %v10400_v11, %v5324_v27 }
0x12c4   : > { %8564 = vpow2.f32 %v5418_v39 }
0x12c5   : > { %v5430_v41 = vmul.f32 1.442695, %v5372_v52  ;;  %v5426_v57 = vmul.f32 1.442695, %v5370_v38 }
0x12c7   : > { %8566 = vpow2.f32 %v5430_v41 }
0x12c8   : > { %8568 = vpow2.f32 %v5426_v57 }
0x12c9   : > { %v10556_v10 = vpop.eup %8558 }
0x12ca   : > { %11697 = vst [vmem:[#allocation14_spill] sm:$0xff] %v10556_v10  ;;  %v10558_v61 = vpop.eup %8560  ;;  %v5496_v59 = vsel %vm5249_vm3, %v10556_v10, 0.0 }
0x12cb   : > { %11698 = vst [vmem:[#allocation15_spill] sm:$0xff] %v10558_v61  ;;  %5497 = vadd.xlane.f32.xlu0 %v5496_v59  ;;  %v5490_v34 = vsel %vm5249_vm3, %v10558_v61, 0.0 }
0x12cc   : > { %5491 = vadd.xlane.f32.xlu1 %v5490_v34 }
0x12cd   : > { %v10564_v1 = vpop.eup %8562 }
0x12ce   : > { %11699 = vst [vmem:[#allocation16_spill] sm:$0xff] %v10564_v1  ;;  %v10566_v21 = vpop.eup %8564  ;;  %v5508_v52 = vsel %vm5249_vm3, %v10564_v1, 0.0 }
0x12cf   : > { %11700 = vst [vmem:[#allocation17_spill] sm:$0xff] %v10566_v21  ;;  %5509 = vadd.xlane.f32.xlu0 %v5508_v52  ;;  %v5502_v29 = vsel %vm5249_vm3, %v10566_v21, 0.0 }
0x12d0   : > { %5503 = vadd.xlane.f32.xlu1 %v5502_v29 }
0x12d1   : > { %v10572_v30 = vpop.eup %8566 }
0x12d2   : > { %11701 = vst [vmem:[#allocation18_spill] sm:$0xff] %v10572_v30  ;;  %v10574_v25 = vpop.eup %8568  ;;  %v5520_v39 = vsel %vm5249_vm3, %v10572_v30, 0.0 }
0x12d3   : > { %11702 = vst [vmem:[#allocation19_spill] sm:$0xff] %v10574_v25  ;;  %5521 = vadd.xlane.f32.xlu0 %v5520_v39  ;;  %v5514_v27 = vsel %vm5249_vm3, %v10574_v25, 0.0 }
0x12d4   : > { %5515 = vadd.xlane.f32.xlu1 %v5514_v27 }
0x12d6   : > { %v5309_v38 = vpop.xlane.xlu0 %5308  ;;  %v5303_v41 = vpop.xlane.xlu1 %5302 }
0x12d7   : > { %v5365_v57 = vsub.f32 %v10420_v7, %v5309_v38  ;;  %v5363_v59 = vsub.f32 %v10422_v46, %v5303_v41 }
0x12d9   : > { %v5416_v34 = vmul.f32 1.442695, %v5365_v57  ;;  %v5412_v52 = vmul.f32 1.442695, %v5363_v59 }
0x12da   : > { %v5321_v29 = vpop.xlane.xlu0 %5320  ;;  %v5315_v21 = vpop.xlane.xlu1 %5314 }
0x12db   : > { %8570 = vpow2.f32 %v5416_v34  ;;  %v5369_v61 = vsub.f32 %v10430_v33, %v5321_v29  ;;  %v5367_v30 = vsub.f32 %v10432_v16, %v5315_v21 }
0x12dc   : > { %8572 = vpow2.f32 %v5412_v52 }
0x12dd   : > { %v5424_v39 = vmul.f32 1.442695, %v5369_v61  ;;  %v5420_v10 = vmul.f32 1.442695, %v5367_v30 }
0x12de   : > { %v5333_v25 = vpop.xlane.xlu0 %5332  ;;  %v5327_v27 = vpop.xlane.xlu1 %5326 }
0x12df   : > { %8574 = vpow2.f32 %v5424_v39  ;;  %v5373_v1 = vsub.f32 %v10443_v35, %v5333_v25  ;;  %v5371_v38 = vsub.f32 %v10445_v36, %v5327_v27 }
0x12e0   : > { %8576 = vpow2.f32 %v5420_v10 }
0x12e1   : > { %v5432_v41 = vmul.f32 1.442695, %v5373_v1  ;;  %v5428_v57 = vmul.f32 1.442695, %v5371_v38 }
0x12e2   : > { %v5345_v59 = vpop.xlane.xlu0 %5344  ;;  %v5339_v46 = vpop.xlane.xlu1 %5338 }
0x12e3   : > { %8578 = vpow2.f32 %v5432_v41  ;;  %v5377_v34 = vsub.f32 %v10455_v2, %v5345_v59  ;;  %v5375_v21 = vsub.f32 %v10457_v24, %v5339_v46  ;;  %v5605_v24 = vmul.f32 2.0, %v10251_v56 }
0x12e4   : > { %8580 = vpow2.f32 %v5428_v57 }
0x12e5   : > { %v10588_v61 = vpop.eup %8570  ;;  %v5440_v30 = vmul.f32 1.442695, %v5377_v34  ;;  %v5436_v52 = vmul.f32 1.442695, %v5375_v21 }
0x12e6   : > { %11703 = vst [vmem:[#allocation20_spill] sm:$0xff] %v10588_v61  ;;  %v10590_v29 = vpop.eup %8572  ;;  %v5342_v25 = vpop.xlane.xlu0 %5341  ;;  %v5499_v10 = vsel %vm5249_vm3, %v10588_v61, 0.0 }
0x12e7   : > { %11704 = vst [vmem:[#allocation21_spill] sm:$0xff] %v10590_v29  ;;  %v5336_v39 = vpop.xlane.xlu1 %5335  ;;  %8582 = vpow2.f32 %v5440_v30  ;;  %v5376_v1 = vsub.f32 %v10464_v0, %v5342_v25  ;;  %5500 = vadd.xlane.f32.xlu0 %v5499_v10  ;;  %v5493_v46 = vsel %vm5249_vm3, %v10590_v29, 0.0 }
0x12e8   : > { %v5374_v27 = vsub.f32 %v10466_v32, %v5336_v39  ;;  %8584 = vpow2.f32 %v5436_v52  ;;  %5494 = vadd.xlane.f32.xlu1 %v5493_v46 }
0x12e9   : > { %v10598_v38 = vpop.eup %8574  ;;  %v5438_v41 = vmul.f32 1.442695, %v5376_v1 }
0x12ea   : > { %11705 = vst [vmem:[#allocation22_spill] sm:$0xff] %v10598_v38  ;;  %v5434_v57 = vmul.f32 1.442695, %v5374_v27  ;;  %v10600_v59 = vpop.eup %8576  ;;  %v5511_v34 = vsel %vm5249_vm3, %v10598_v38, 0.0 }
0x12eb   : > { %11706 = vst [vmem:[#allocation23_spill] sm:$0xff] %v10600_v59  ;;  %8586 = vpow2.f32 %v5438_v41  ;;  %5512 = vadd.xlane.f32.xlu0 %v5511_v34  ;;  %v5505_v21 = vsel %vm5249_vm3, %v10600_v59, 0.0 }
0x12ec   : > { %8588 = vpow2.f32 %v5434_v57  ;;  %5506 = vadd.xlane.f32.xlu1 %v5505_v21 }
0x12ed   : > { %v10606_v30 = vpop.eup %8578 }
0x12ee   : > { %11707 = vst [vmem:[#allocation24_spill] sm:$0xff] %v10606_v30  ;;  %v10608_v52 = vpop.eup %8580  ;;  %v5523_v25 = vsel %vm5249_vm3, %v10606_v30, 0.0 }
0x12ef   : > { %11708 = vst [vmem:[#allocation25_spill] sm:$0xff] %v10608_v52  ;;  %5524 = vadd.xlane.f32.xlu0 %v5523_v25  ;;  %v5517_v39 = vsel %vm5249_vm3, %v10608_v52, 0.0  ;;  %v5447_v25 = vpop.xlane.xlu1 %5446 }
0x12f0   : > { %5518 = vadd.xlane.f32.xlu1 %v5517_v39 }
0x12f1   : > { %v10614_v10 = vpop.eup %8582 }
0x12f2   : > { %11709 = vst [vmem:[#allocation26_spill] sm:$0xff] %v10614_v10  ;;  %v10616_v1 = vpop.eup %8584  ;;  %v5535_v27 = vsel %vm5249_vm3, %v10614_v10, 0.0 }
0x12f3   : > { %11710 = vst [vmem:[#allocation27_spill] sm:$0xff] %v10616_v1  ;;  %5536 = vadd.xlane.f32.xlu0 %v5535_v27  ;;  %v5529_v46 = vsel %vm5249_vm3, %v10616_v1, 0.0  ;;  %v5459_v39 = vpop.xlane.xlu1 %5458 }
0x12f4   : > { %5530 = vadd.xlane.f32.xlu1 %v5529_v46  ;;  %8590 = vrcp.f32 %v5459_v39 }
0x12f5   : > { %v10622_v41 = vpop.eup %8586 }
0x12f6   : > { %11711 = vst [vmem:[#allocation28_spill] sm:$0xff] %v10622_v41  ;;  %v10624_v57 = vpop.eup %8588  ;;  %v5532_v34 = vsel %vm5249_vm3, %v10622_v41, 0.0 }
0x12f7   : > { %11712 = vst [vmem:[#allocation29_spill] sm:$0xff] %v10624_v57  ;;  %5533 = vadd.xlane.f32.xlu0 %v5532_v34  ;;  %v5526_v21 = vsel %vm5249_vm3, %v10624_v57, 0.0 }
0x12f8   : > { %5527 = vadd.xlane.f32.xlu1 %v5526_v21 }
0x12fe   : > { %v8591_v30 = vpop.eup %8590 }
0x131a   : > { %v5453_v10 = vpop.xlane.xlu0 %5452 }
0x131b   : > { %8592 = vrcp.f32 %v5453_v10 }
0x131e   : > { %v5465_v27 = vpop.xlane.xlu0 %5464  ;;  %v5471_v52 = vpop.xlane.xlu1 %5470 }
0x131f   : > { %8594 = vrcp.f32 %v5465_v27 }
0x1320   : > { %8596 = vrcp.f32 %v5471_v52  ;;  %v5607_v52 = vmul.f32 2.0, %v10256_v58 }
0x1322   : > { %v5477_v46 = vpop.xlane.xlu0 %5476  ;;  %v5483_v1 = vpop.xlane.xlu1 %5482 }
0x1323   : > { %8598 = vrcp.f32 %v5477_v46 }
0x1324   : > { %8600 = vrcp.f32 %v5483_v1 }
0x1325   : > { %8602 = vrcp.f32 %v5447_v25  ;;  %v8593_v57 = vpop.eup %8592 }
0x1326   : > { %v5489_v41 = vpop.xlane.xlu0 %5488  ;;  %v5444_v34 = vpop.xlane.xlu1 %5443  ;;  %v5545_v36 = vmul.f32 %v8593_v57, %v10488_v9 }
0x1327   : > { %8604 = vrcp.f32 %v5489_v41 }
0x1329   : > { %v8595_v61 = vpop.eup %8594 }
0x132a   : > { %v5450_v21 = vpop.xlane.xlu0 %5449  ;;  %v5456_v29 = vpop.xlane.xlu1 %5455  ;;  %v5553_v25 = vmul.f32 %v8595_v61, %v10493_v13  ;;  %v5615_v13 = vmul.f32 2.0, %v10261_v48  ;;  %v5617_v61 = vmul.f32 2.0, %v10273_v28 }
0x132b   : > { %v8597_v59 = vpop.eup %8596  ;;  %8606 = vrcp.f32 %v5450_v21  ;;  %v5609_v21 = vmul.f32 2.0, %v10265_v18 }
0x132c   : > { %8608 = vrcp.f32 %v5456_v29  ;;  %v5613_v29 = vmul.f32 2.0, %v10269_v20  ;;  %v5557_v35 = vmul.f32 %v8597_v59, %v10496_v17  ;;  %v5637_v59 = vmul.f32 %v5605_v24, %v5545_v36 }
0x132d   : > { %v8599_v38 = vpop.eup %8598  ;;  %8610 = vrcp.f32 %v5444_v34  ;;  %v5549_v34 = vmul.f32 %v8591_v30, %v10476_v45  ;;  %v5603_v45 = vmul.f32 2.0, %v10248_v5 }
0x132e   : > { %v8601_v10 = vpop.eup %8600  ;;  %v5462_v39 = vpop.xlane.xlu0 %5461  ;;  %v5561_v41 = vmul.f32 %v8599_v38, %v10503_v14 }
0x132f   : > { %v5468_v27 = vpop.xlane.xlu1 %5467  ;;  %v8603_v1 = vpop.eup %8602  ;;  %v5565_v46 = vmul.f32 %v8601_v10, %v10506_v31  ;;  %8612 = vrcp.f32 %v5462_v39  ;;  %v5611_v31 = vmul.f32 2.0, %v10259_v50  ;;  %v5639_v17 = vmul.f32 %v5607_v52, %v5549_v34 }
0x1330   : > { %8614 = vrcp.f32 %v5468_v27  ;;  %v5541_v14 = vmul.f32 %v8603_v1, %v10472_v55  ;;  %v5641_v27 = vmul.f32 %v5609_v21, %v5553_v25  ;;  %v5645_v16 = vmul.f32 %v5613_v29, %v5561_v41 }
0x1331   : > { %v8605_v2 = vpop.eup %8604  ;;  %v5647_v33 = vmul.f32 %v5615_v13, %v5565_v46  ;;  %v5643_v30 = vmul.f32 %v5611_v31, %v5557_v35  ;;  %v10659_v35 = vadd.f32 %v5639_v17, %v10256_v58 }
0x1332   : > { %v5569_v38 = vmul.f32 %v8605_v2, %v10513_v44  ;;  %v5474_v10 = vpop.xlane.xlu0 %5473  ;;  %v5635_v57 = vmul.f32 %v5603_v45, %v5541_v14  ;;  %v10650_v44 = vadd.f32 %v5641_v27, %v10265_v18  ;;  %v10653_v25 = vadd.f32 %v5645_v16, %v10269_v20 }
0x1333   : > { %v5480_v39 = vpop.xlane.xlu1 %5479  ;;  %8616 = vrcp.f32 %v5474_v10  ;;  %v10656_v41 = vadd.f32 %v5647_v33, %v10261_v48  ;;  %v10665_v24 = vadd.f32 %v5643_v30, %v10259_v50  ;;  %v5614_v10 = vmul.f32 2.0, %v10303_v53 }
0x1334   : > { %v5649_v9 = vmul.f32 %v5617_v61, %v5569_v38  ;;  %8618 = vrcp.f32 %v5480_v39  ;;  %v10674_v58 = vadd.f32 %v5635_v57, %v10248_v5  ;;  %v5610_v38 = vmul.f32 2.0, %v10301_v47 }
0x1335   : > { %v8607_v55 = vpop.eup %8606  ;;  %v6002_v46 = vcombine.low %v10665_v24, %v10656_v41 }
0x1336   : > { %v10647_v1 = vadd.f32 %v5649_v9, %v10273_v28  ;;  %v5486_v7 = vpop.xlane.xlu0 %5485  ;;  %v8609_v2 = vpop.eup %8608  ;;  %v10662_v28 = vadd.f32 %v5637_v59, %v10251_v56  ;;  %v5543_v16 = vmul.f32 %v8607_v55, %v10522_v15  ;;  %v5604_v56 = vmul.f32 2.0, %v10295_v12 }
0x1337   : > { %8620 = vrcp.f32 %v5486_v7  ;;  %v8611_v52 = vpop.eup %8610  ;;  %v5547_v48 = vmul.f32 %v8609_v2, %v10524_v19  ;;  %v5608_v7 = vmul.f32 2.0, %v10307_v8  ;;  %v5606_v15 = vmul.f32 2.0, %v10299_v4 }
0x1338   : > { %v6018_v18 = vcombine.low %v10653_v25, %v10647_v1  ;;  %v5986_v50 = vcombine.low %v10662_v28, %v10650_v44  ;;  %v5539_v21 = vmul.f32 %v8611_v52, %v10516_v42  ;;  %v5970_v5 = vcombine.low %v10674_v58, %v10659_v35 }
0x1339   : > { %v8613_v36 = vpop.eup %8612  ;;  %v5636_v31 = vmul.f32 %v5604_v56, %v5543_v16  ;;  %v5638_v61 = vmul.f32 %v5606_v15, %v5547_v48  ;;  %v10698_v27 = vrot.slane %v6002_v46, %v10229_v62  ;;  %v5612_v59 = vmul.f32 2.0, %v10311_v26 }
0x133a   : > { %v8615_v20 = vpop.eup %8614  ;;  %v5551_v33 = vmul.f32 %v8613_v36, %v10530_v22  ;;  %v5602_v22 = vmul.f32 2.0, %v10297_v40  ;;  %v10688_v13 = vrot.slane %v6018_v18, %v10229_v62  ;;  %v10695_v39 = vrot.slane %v5986_v50, %v10229_v62 }
0x133b   : > { %v5555_v29 = vmul.f32 %v8615_v20, %v10532_v51  ;;  %v10706_v57 = vrot.slane %v5970_v5, %v10229_v62  ;;  %v10711_v2 = vadd.f32 %v5636_v31, %v10295_v12  ;;  %v10714_v52 = vadd.f32 %v5638_v61, %v10299_v4 }
0x133c   : > { %v5640_v19 = vmul.f32 %v5608_v7, %v5551_v33  ;;  %v5634_v45 = vmul.f32 %v5602_v22, %v5539_v21  ;;  %v11713_v7 = vld [vmem:[#allocation2_spill] sm:$0xff] }
0x133d   : > { %v8617_v34 = vpop.eup %8616  ;;  %v5642_v17 = vmul.f32 %v5610_v38, %v5555_v29  ;;  %v6034_v20 = vcombine.low %v10706_v57, %v10695_v39 }
0x133e   : > { %v8619_v14 = vpop.eup %8618  ;;  %v5559_v42 = vmul.f32 %v8617_v34, %v10538_v37  ;;  %v10701_v9 = vadd.f32 %v5640_v19, %v10307_v8  ;;  %v5616_v37 = vmul.f32 2.0, %v10315_v6  ;;  %v10723_v16 = vadd.f32 %v5634_v45, %v10297_v40 }
0x133f   : > { %v5563_v51 = vmul.f32 %v8619_v14, %v10540_v49  ;;  %v6066_v49 = vcombine.low %v10698_v27, %v10688_v13  ;;  %v10726_v48 = vadd.f32 %v5642_v17, %v10301_v47  ;;  %v10744_v56 = vrot.slane %v6034_v20, %v11713_v7 }
0x1340   : > { %v5644_v8 = vmul.f32 %v5612_v59, %v5559_v42  ;;  %v5714_v4 = vcombine.low %v10711_v2, %v10701_v9  ;;  %v5698_v40 = vcombine.low %v10723_v16, %v10714_v52  ;;  %v6019_v59 = vcombine.high %v10653_v25, %v10647_v1 }
0x1341   : > { %v8621_v30 = vpop.eup %8620  ;;  %v5646_v55 = vmul.f32 %v5614_v10, %v5563_v51  ;;  %v10731_v33 = vrot.slane %v6066_v49, %v11713_v7  ;;  %11715 = vst [vmem:[#allocation30_spill] sm:$0xff] %v10744_v56  ;;  %v6003_v1 = vcombine.high %v10665_v24, %v10656_v41  ;;  %v10791_v25 = vmul.f32 2.0, %v10398_v43  ;;  %v11719_v24 = vld [vmem:[#allocation4_spill] sm:$0xff] }
0x1342   : > { %v5567_v36 = vmul.f32 %v8621_v30, %v10546_v54  ;;  %v10734_v54 = vadd.f32 %v5644_v8, %v10311_v26  ;;  %v10747_v50 = vrot.slane %v5714_v4, %v10229_v62  ;;  %v10777_v30 = vmul.f32 2.0, %v10380_v23 }
0x1343   : > { %v10718_v18 = vadd.f32 %v5646_v55, %v10303_v53  ;;  %11714 = vst [vmem:[#allocation2_spill] sm:$0xff] %v10731_v33  ;;  %v10780_v55 = vmul.f32 2.0, %v10382_v63  ;;  %v10784_v8 = vmul.f32 2.0, %v10391_v3  ;;  %v10794_v20 = vmul.f32 2.0, %v10400_v11  ;;  %v11729_v33 = vld [vmem:[#allocation16_spill] sm:$0xff]  ;;  %v11730_v11 = vld [vmem:[#allocation11_spill] sm:$0xff] }
0x1344   : > { %v5648_v12 = vmul.f32 %v5616_v37, %v5567_v36  ;;  %v5624_v37 = vmul.f32 2.0, %v10389_v60  ;;  %v5987_v36 = vcombine.high %v10662_v28, %v10650_v44  ;;  %v5971_v44 = vcombine.high %v10674_v58, %v10659_v35 }
0x1345   : > { %v5730_v47 = vcombine.low %v10726_v48, %v10718_v18  ;;  %v10805_v41 = vrot.slane %v6019_v59, %v10229_v62  ;;  %v6035_v35 = vcombine.high %v10706_v57, %v10695_v39  ;;  %v11726_v59 = vld [vmem:[#allocation9_spill] sm:$0xff]  ;;  %v11727_v39 = vld [vmem:[#allocation10_spill] sm:$0xff] }
0x1346   : > { %v10737_v53 = vadd.f32 %v5648_v12, %v10315_v6  ;;  %v10754_v6 = vrot.slane %v5698_v40, %v10229_v62  ;;  %v10797_v12 = vmul.f32 2.0, %v10464_v0  ;;  %v10800_v40 = vmul.f32 2.0, %v10466_v32 }
0x1347   : > { %v10757_v21 = vrot.slane %v5730_v47, %v10229_v62  ;;  %11718 = vst [vmem:[#allocation33_spill] sm:$0xff] %v10805_v41  ;;  %v10808_v47 = vmul.f32 2.0, %v11719_v24  ;;  %v10819_v58 = vrot.slane %v5987_v36, %v10229_v62  ;;  %v10834_v57 = vmul.f32 2.0, %v11727_v39 }
0x1348   : > { %v5746_v46 = vcombine.low %v10734_v54, %v10737_v53  ;;  %v5762_v19 = vcombine.low %v10754_v6, %v10747_v50  ;;  %v10839_v26 = vrot.slane %v5971_v44, %v10229_v62  ;;  %v5715_v44 = vcombine.high %v10711_v2, %v10701_v9 }
0x1349   : > { %11722 = vst [vmem:[#allocation4_spill] sm:$0xff] %v10819_v58 }
0x134a   : > { %v10760_v15 = vrot.slane %v5746_v46, %v10229_v62  ;;  %v10770_v22 = vrot.slane %v5762_v19, %v11713_v7  ;;  %v11720_v46 = vld [vmem:[#allocation5_spill] sm:$0xff] }
0x134b   : > { %v10811_v19 = vmul.f32 2.0, %v11720_v46 }
0x134c   : > { %v5794_v29 = vcombine.low %v10757_v21, %v10760_v15  ;;  %11717 = vst [vmem:[#allocation32_spill] sm:$0xff] %v10770_v22  ;;  %v5795_v9 = vcombine.high %v10757_v21, %v10760_v15  ;;  %v11742_v15 = vld [vmem:[#allocation25_spill] sm:$0xff] }
0x134e   : > { %v10767_v34 = vrot.slane %v5794_v29, %v11713_v7  ;;  %v11721_v29 = vld [vmem:[#allocation6_spill] sm:$0xff] }
0x134f   : > { %11728 = vst [vmem:[#allocation6_spill] sm:$0xff] %v10839_v26 }
0x1350   : > { %11716 = vst [vmem:[#allocation31_spill] sm:$0xff] %v10767_v34 }
0x1358   : > { %v5498_v14 = vpop.xlane.xlu0 %5497 }
0x1359   : > { %v5492_v31 = vpop.xlane.xlu1 %5491  ;;  %8622 = vrcp.f32 %v5498_v14  ;;  %v10814_v14 = vmul.f32 2.0, %v11721_v29 }
0x135c   : > { %v5510_v61 = vpop.xlane.xlu0 %5509 }
0x135d   : > { %v5504_v38 = vpop.xlane.xlu1 %5503  ;;  %8624 = vrcp.f32 %v5510_v61 }
0x135e   : > { %8626 = vrcp.f32 %v5492_v31 }
0x135f   : > { %8628 = vrcp.f32 %v5504_v38  ;;  %v10822_v38 = vrot.slane %v6003_v1, %v10229_v62  ;;  %v5699_v1 = vcombine.high %v10723_v16, %v10714_v52  ;;  %v10849_v52 = vmul.f32 2.0, %v11730_v11 }
0x1360   : > { %v5522_v42 = vpop.xlane.xlu0 %5521  ;;  %v10852_v16 = vrot.slane %v6035_v35, %v11713_v7 }
0x1361   : > { %v5516_v10 = vpop.xlane.xlu1 %5515  ;;  %8630 = vrcp.f32 %v5522_v42  ;;  %11723 = vst [vmem:[#allocation5_spill] sm:$0xff] %v10822_v38  ;;  %v6082_v5 = vcombine.low %v10822_v38, %v10805_v41  ;;  %v11733_v38 = vld [vmem:[#allocation15_spill] sm:$0xff]  ;;  %v10865_v35 = vrot.slane %v5699_v1, %v10229_v62 }
0x1363   : > { %v8623_v28 = vpop.eup %8622 }
0x1367   : > { %v8625_v61 = vpop.eup %8624 }
0x1368   : > { %v8627_v42 = vpop.eup %8626  ;;  %v5583_v22 = vmul.f32 %v8625_v61, %v11729_v33  ;;  %v11732_v61 = vld [vmem:[#allocation14_spill] sm:$0xff] }
0x1369   : > { %v5571_v41 = vmul.f32 %v8627_v42, %v11733_v38 }
0x136a   : > { %v5656_v42 = vmul.f32 %v5624_v37, %v5583_v22  ;;  %v11738_v37 = vld [vmem:[#allocation20_spill] sm:$0xff] }
0x136c   : > { %v10893_v21 = vadd.f32 %v5656_v42, %v10389_v60 }
0x1374   : > { %v5501_v51 = vpop.xlane.xlu0 %5500 }
0x1375   : > { %v5495_v45 = vpop.xlane.xlu1 %5494  ;;  %8632 = vrcp.f32 %v5501_v51 }
0x1378   : > { %v5513_v17 = vpop.xlane.xlu0 %5512 }
0x1379   : > { %8634 = vrcp.f32 %v5513_v17  ;;  %v5507_v49 = vpop.xlane.xlu1 %5506 }
0x137a   : > { %8636 = vrcp.f32 %v5507_v49  ;;  %v10829_v49 = vmul.f32 2.0, %v11726_v59 }
0x137b   : > { %8638 = vrcp.f32 %v5495_v45  ;;  %v11725_v45 = vld [vmem:[#allocation8_spill] sm:$0xff] }
0x137c   : > { %8640 = vrcp.f32 %v5516_v10  ;;  %v5525_v4 = vpop.xlane.xlu0 %5524  ;;  %v11724_v10 = vld [vmem:[#allocation7_spill] sm:$0xff]  ;;  %v10826_v17 = vmul.f32 2.0, %v11725_v45 }
0x137d   : > { %8642 = vrcp.f32 %v5525_v4  ;;  %v5519_v31 = vpop.xlane.xlu1 %5518  ;;  %v5623_v51 = vmul.f32 2.0, %v11724_v10  ;;  %v6067_v4 = vcombine.high %v10698_v27, %v10688_v13  ;;  %v5731_v13 = vcombine.high %v10726_v48, %v10718_v18  ;;  %11731 = vst [vmem:[#allocation7_spill] sm:$0xff] %v10852_v16  ;;  %v11734_v18 = vld [vmem:[#allocation17_spill] sm:$0xff] }
0x137e   : > { %8644 = vrcp.f32 %v5519_v31  ;;  %v8629_v31 = vpop.eup %8628  ;;  %v5747_v27 = vcombine.high %v10734_v54, %v10737_v53  ;;  %v11740_v16 = vld [vmem:[#allocation21_spill] sm:$0xff] }
0x137f   : > { %v8631_v56 = vpop.eup %8630  ;;  %v5579_v48 = vmul.f32 %v8629_v31, %v11734_v18  ;;  %v10860_v54 = vrot.slane %v6067_v4, %v11713_v7  ;;  %v10873_v4 = vrot.slane %v5731_v13, %v10229_v62  ;;  %v11737_v18 = vld [vmem:[#allocation23_spill] sm:$0xff] }
0x1380   : > { %v5537_v36 = vpop.xlane.xlu0 %5536  ;;  %v8633_v32 = vpop.eup %8632 }
0x1381   : > { %8646 = vrcp.f32 %v5537_v36  ;;  %v5531_v34 = vpop.xlane.xlu1 %5530  ;;  %v5575_v36 = vmul.f32 %v8623_v28, %v11732_v61  ;;  %v10870_v28 = vrot.slane %v6082_v5, %v11713_v7  ;;  %v10876_v61 = vrot.slane %v5747_v27, %v10229_v62 }
0x1382   : > { %8648 = vrcp.f32 %v5531_v34  ;;  %v5763_v34 = vcombine.high %v10754_v6, %v10747_v50  ;;  %v11736_v6 = vld [vmem:[#allocation22_spill] sm:$0xff]  ;;  %v5654_v5 = vmul.f32 %v10784_v8, %v5579_v48  ;;  %v5577_v13 = vmul.f32 %v8633_v32, %v11738_v37  ;;  %v11743_v8 = vld [vmem:[#allocation19_spill] sm:$0xff] }
0x1383   : > { %v8635_v33 = vpop.eup %8634  ;;  %11735 = vst [vmem:[#allocation8_spill] sm:$0xff] %v10870_v28  ;;  %v5652_v22 = vmul.f32 %v10777_v30, %v5575_v36  ;;  %v11739_v28 = vld [vmem:[#allocation18_spill] sm:$0xff]  ;;  %v5810_v32 = vcombine.low %v10873_v4, %v10876_v61  ;;  %v10904_v36 = vrot.slane %v5795_v9, %v11713_v7 }
0x1384   : > { %v8637_v53 = vpop.eup %8636  ;;  %v5534_v0 = vpop.xlane.xlu0 %5533  ;;  %v5585_v1 = vmul.f32 %v8635_v33, %v11736_v6  ;;  %v5591_v26 = vmul.f32 %v8631_v56, %v11739_v28  ;;  %v11741_v6 = vld [vmem:[#allocation24_spill] sm:$0xff]  ;;  %v5653_v28 = vmul.f32 %v10808_v47, %v5577_v13  ;;  %v11747_v13 = vld [vmem:[#allocation29_spill] sm:$0xff] }
0x1385   : > { %v8639_v38 = vpop.eup %8638  ;;  %8650 = vrcp.f32 %v5534_v0  ;;  %v5528_v31 = vpop.xlane.xlu1 %5527  ;;  %v5581_v58 = vmul.f32 %v8637_v53, %v11737_v18  ;;  %v5650_v0 = vmul.f32 %v10780_v55, %v5571_v41  ;;  %v10897_v55 = vrot.slane %v5763_v34, %v11713_v7 }
0x1386   : > { %v8641_v50 = vpop.eup %8640  ;;  %8652 = vrcp.f32 %v5528_v31  ;;  %v5573_v33 = vmul.f32 %v8639_v38, %v11740_v16  ;;  %v10890_v31 = vrot.slane %v5715_v44, %v10229_v62  ;;  %v5657_v41 = vmul.f32 %v10814_v14, %v5585_v1  ;;  %v11745_v1 = vld [vmem:[#allocation27_spill] sm:$0xff] }
0x1387   : > { %v8643_v2 = vpop.eup %8642  ;;  %v5587_v56 = vmul.f32 %v8641_v50, %v11743_v8  ;;  %v5655_v16 = vmul.f32 %v5623_v51, %v5581_v58  ;;  %v10907_v60 = vadd.f32 %v5652_v22, %v10380_v23  ;;  %v10910_v48 = vadd.f32 %v5650_v0, %v10382_v63  ;;  %v11744_v51 = vld [vmem:[#allocation26_spill] sm:$0xff] }
0x1388   : > { %v8645_v27 = vpop.eup %8644  ;;  %v5593_v53 = vmul.f32 %v8643_v2, %v11741_v6  ;;  %v10913_v34 = vadd.f32 %v5654_v5, %v10391_v3  ;;  %v5660_v42 = vmul.f32 %v10791_v25, %v5591_v26  ;;  %v5651_v14 = vmul.f32 %v10811_v19, %v5573_v33  ;;  %v11746_v5 = vld [vmem:[#allocation28_spill] sm:$0xff] }
0x1389   : > { %v5589_v30 = vmul.f32 %v8645_v27, %v11742_v15  ;;  %v5850_v63 = vcombine.low %v10907_v60, %v10893_v21  ;;  %v5851_v3 = vcombine.high %v10907_v60, %v10893_v21  ;;  %v5658_v47 = vmul.f32 %v10794_v20, %v5587_v56  ;;  %v11749_v56 = vld [vmem:[#allocation3_spill] sm:$0xff] }
0x138a   : > { %v5661_v58 = vmul.f32 %v10826_v17, %v5593_v53  ;;  %v5689_v26 = vadd.f32 %v5657_v41, %v11721_v29  ;;  %v5687_v25 = vadd.f32 %v5655_v16, %v11724_v10  ;;  %v5685_v9 = vadd.f32 %v5653_v28, %v11719_v24  ;;  %v11750_v16 = vld [vmem:[#allocation13_spill] sm:$0xff] }
0x138b   : > { %v8647_v44 = vpop.eup %8646  ;;  %v5659_v23 = vmul.f32 %v10829_v49, %v5589_v30  ;;  %v5834_v2 = vcombine.low %v10910_v48, %v10913_v34  ;;  %v5835_v22 = vcombine.high %v10910_v48, %v10913_v34  ;;  %v5683_v20 = vadd.f32 %v5651_v14, %v11720_v46  ;;  %v11748_v30 = vld [vmem:[#allocation12_spill] sm:$0xff] }
0x138c   : > { %v8649_v38 = vpop.eup %8648  ;;  %v5601_v50 = vmul.f32 %v8647_v44, %v11744_v51  ;;  %v5693_v29 = vadd.f32 %v5661_v58, %v11725_v45  ;;  %v5692_v37 = vadd.f32 %v5660_v42, %v10398_v43  ;;  %v6122_v53 = vcombine.low %v5685_v9, %v5689_v26 }
0x138d   : > { %v5597_v18 = vmul.f32 %v8649_v38, %v11745_v1  ;;  %v5691_v24 = vadd.f32 %v5659_v23, %v11726_v59  ;;  %v6106_v6 = vcombine.low %v5683_v20, %v5687_v25  ;;  %v5842_v45 = vrot.slane %v5834_v2, %v10229_v62 }
0x138e   : > { %v5665_v19 = vmul.f32 %v10834_v57, %v5601_v50  ;;  %v5690_v41 = vadd.f32 %v5658_v47, %v11749_v56  ;;  %v6123_v60 = vcombine.high %v5685_v9, %v5689_v26  ;;  %v6130_v34 = vrot.slane %v6122_v53, %v10229_v62 }
0x138f   : > { %v8651_v17 = vpop.eup %8650  ;;  %v5663_v49 = vmul.f32 %v10849_v52, %v5597_v18  ;;  %v6107_v58 = vcombine.high %v5683_v20, %v5687_v25  ;;  %v10969_v25 = vrot.slane %v5851_v3, %v10229_v62 }
0x1390   : > { %v8653_v0 = vpop.eup %8652  ;;  %v5697_v10 = vadd.f32 %v5665_v19, %v11727_v39  ;;  %v5599_v57 = vmul.f32 %v8651_v17, %v11746_v5  ;;  %v5858_v39 = vrot.slane %v5850_v63, %v10229_v62  ;;  %v10966_v17 = vrot.slane %v5835_v22, %v10229_v62 }
0x1391   : > { %v5695_v52 = vadd.f32 %v5663_v49, %v11730_v11  ;;  %v5595_v27 = vmul.f32 %v8653_v0, %v11747_v13  ;;  %v10972_v9 = vrot.slane %v6123_v60, %v10229_v62  ;;  %v6121_v0 = vrot.slane %v6107_v58, %v10229_v62  ;;  %v11752_v13 = vld [vmem:[#allocation32_spill] sm:$0xff] }
0x1392   : > { %v5664_v33 = vmul.f32 %v10797_v12, %v5599_v57  ;;  %v6154_v21 = vcombine.low %v5693_v29, %v5697_v10  ;;  %v6155_v11 = vcombine.high %v5693_v29, %v5697_v10  ;;  %v5899_v42 = vcombine.high %v5842_v45, %v5858_v39 }
0x1393   : > { %v5662_v46 = vmul.f32 %v10800_v40, %v5595_v27  ;;  %v6138_v15 = vcombine.low %v5691_v24, %v5695_v52  ;;  %v6139_v8 = vcombine.high %v5691_v24, %v5695_v52  ;;  %v6114_v40 = vrot.slane %v6106_v6, %v10229_v62  ;;  %v11751_v52 = vld [vmem:[#allocation31_spill] sm:$0xff] }
0x1394   : > { %v5696_v43 = vadd.f32 %v5664_v33, %v11748_v30  ;;  %v6162_v59 = vrot.slane %v6154_v21, %v10229_v62  ;;  %v6169_v1 = vrot.slane %v6155_v11, %v10229_v62  ;;  %v5898_v63 = vcombine.low %v5842_v45, %v5858_v39 }
0x1395   : > { %v5694_v12 = vadd.f32 %v5662_v46, %v11750_v16  ;;  %v6146_v44 = vrot.slane %v6138_v15, %v10229_v62  ;;  %v6153_v23 = vrot.slane %v6139_v8, %v10229_v62  ;;  %v6171_v19 = vcombine.high %v6114_v40, %v6130_v34  ;;  %v11753_v16 = vld [vmem:[#allocation7_spill] sm:$0xff] }
0x1396   : > { %v5882_v48 = vcombine.low %v5692_v37, %v5696_v43  ;;  %v5883_v28 = vcombine.high %v5692_v37, %v5696_v43  ;;  %v5913_v29 = vrot.slane %v5899_v42, %v11713_v7  ;;  %v6170_v57 = vcombine.low %v6114_v40, %v6130_v34  ;;  %v11754_v34 = vld [vmem:[#allocation6_spill] sm:$0xff] }
0x1397   : > { %v5866_v38 = vcombine.low %v5690_v41, %v5694_v12  ;;  %v5867_v14 = vcombine.high %v5690_v41, %v5694_v12  ;;  %v6203_v50 = vcombine.high %v6146_v44, %v6162_v59  ;;  %v6202_v20 = vcombine.low %v6146_v44, %v6162_v59 }
0x1398   : > { %v5890_v51 = vrot.slane %v5882_v48, %v10229_v62  ;;  %v10963_v26 = vrot.slane %v5883_v28, %v10229_v62  ;;  %v6218_v5 = vcombine.low %v6153_v23, %v6169_v1  ;;  %v10981_v3 = vrot.slane %v5898_v63, %v11713_v7  ;;  %v11755_v28 = vld [vmem:[#allocation4_spill] sm:$0xff]  ;;  %v11758_v63 = vld [vmem:[#allocation5_spill] sm:$0xff] }
0x1399   : > { %v5874_v18 = vrot.slane %v5866_v38, %v10229_v62  ;;  %v10960_v47 = vrot.slane %v5867_v14, %v10229_v62  ;;  %v10977_v10 = vrot.slane %v6203_v50, %v11713_v7  ;;  %v5828_v62 = vcombine.low %v10897_v55, %v10904_v36 }
0x139a   : > { %v5827_v27 = vcombine.high %v11752_v13, %v11751_v52  ;;  %v10993_v33 = vrot.slane %v6171_v19, %v11713_v7  ;;  %v5914_v6 = vcombine.low %v10966_v17, %v10969_v25  ;;  %v6186_v46 = vcombine.low %v6121_v0, %v10972_v9 }
0x139b   : > { %v5931_v49 = vcombine.high %v5874_v18, %v5890_v51  ;;  %v5930_v2 = vcombine.low %v5874_v18, %v5890_v51  ;;  %v5946_v24 = vcombine.low %v10960_v47, %v10963_v26  ;;  %v11001_v45 = vrot.slane %v6202_v20, %v11713_v7  ;;  %v11757_v18 = vld [vmem:[#allocation33_spill] sm:$0xff] }
0x139c   : > { %v6237_v39 = vcombine.high %v10993_v33, %v10977_v10  ;;  %v5778_v15 = vcombine.low %v10865_v35, %v10890_v31  ;;  %v6226_v30 = vrot.slane %v6218_v5, %v11713_v7  ;;  %v11009_v43 = vrot.slane %v6170_v57, %v11713_v7 }
0x139d   : > { %v5945_v22 = vrot.slane %v5931_v49, %v11713_v7  ;;  %v10984_v37 = vrot.slane %v5930_v2, %v11713_v7  ;;  %v5954_v56 = vrot.slane %v5946_v24, %v11713_v7  ;;  %v5829_v41 = vcombine.high %v10897_v55, %v10904_v36  ;;  %v11759_v2 = vld [vmem:[#allocation8_spill] sm:$0xff] }
0x139e   : > { %v6101_v12 = vcombine.high %v11753_v16, %v10860_v54  ;;  %v5818_v44 = vrot.slane %v5810_v32, %v11713_v7  ;;  %v5922_v60 = vrot.slane %v5914_v6, %v11713_v7  ;;  %v6194_v48 = vrot.slane %v6186_v46, %v11713_v7 }
0x139f   : > { %v5964_v53 = vcombine.low %v5913_v29, %v5945_v22  ;;  %v5963_v21 = vcombine.high %v10981_v3, %v10984_v37  ;;  %v5965_v11 = vcombine.high %v5913_v29, %v5945_v22  ;;  %v5962_v40 = vcombine.low %v10981_v3, %v10984_v37 }
0x13a0   : > { %v6234_v55 = vcombine.low %v11009_v43, %v11001_v45  ;;  %v5786_v36 = vrot.slane %v5778_v15, %v11713_v7  ;;  %v11756_v32 = vcombine.low %v11754_v34, %v11755_v28  ;;  %v6219_v42 = vcombine.high %v6153_v23, %v6169_v1 }
0x13a1   : > { %v7982_v59 = vpack.i.bf16 %v5964_v53, %v5828_v62  ;;  %v7977_v8 = vpack.i.bf16 %v5963_v21, %v5827_v27  ;;  %v7987_v14 = vpack.i.bf16 %v5965_v11, %v5829_v41  ;;  %v8017_v58 = vpack.i.bf16 %v6237_v39, %v6101_v12 }
0x13a2   : > { %v6058_v38 = vrot.slane %v11756_v32, %v11713_v7  ;;  %v5966_v51 = vcombine.low %v5922_v60, %v5954_v56  ;;  %v6238_v50 = vcombine.low %v6194_v48, %v6226_v30  ;;  %v6083_v19 = vcombine.high %v11758_v63, %v11757_v18  ;;  %v11115_v18 = vld [vmem:[%s11620_s11 + $0xa0] sm:$0xff] }
0x13a3   : > { %7983 = vrot.lane.b32.xlu1 %v7982_v59, %s8691_s24  ;;  %7978 = vrot.lane.b32.xlu0 %v7977_v8, %s8692_s26  ;;  %v5830_v49 = vcombine.low %v5786_v36, %v5818_v44  ;;  %v6187_v29 = vcombine.high %v6121_v0, %v10972_v9  ;;  %v6051_v5 = vcombine.high %v11754_v34, %v11755_v28  ;;  %v11761_v59 = vld [vmem:[#allocation30_spill] sm:$0xff]  ;;  %v11085_v34 = vld [vmem:[%s11620_s11 + $0x88] sm:$0xff]  ;;  %v11120_v63 = vsub.f32 1.0, %v11115_v18 }
0x13a4   : > { %v6102_v20 = vcombine.low %v6058_v38, %v11759_v2  ;;  %v6233_v23 = vrot.slane %v6219_v42, %v11713_v7  ;;  %v5967_v22 = vcombine.high %v5922_v60, %v5954_v56  ;;  %v6239_v24 = vcombine.high %v6194_v48, %v6226_v30  ;;  %v11760_v30 = vld [vmem:[#allocation2_spill] sm:$0xff]  ;;  %v11095_v42 = vld [vmem:[%s11620_s11 + $0x90] sm:$0xff] }
0x13a5   : > { %v7992_v1 = vpack.i.bf16 %v5966_v51, %v5830_v49  ;;  %v6103_v62 = vcombine.high %v6058_v38, %v11759_v2  ;;  %v5831_v27 = vcombine.high %v5786_v36, %v5818_v44  ;;  %v6097_v6 = vrot.slane %v6083_v19, %v11713_v7  ;;  %v11105_v51 = vld [vmem:[%s11620_s11 + $0x98] sm:$0xff]  ;;  %v11125_v19 = vld [vmem:[%s11620_s11 + $0xa8] sm:$0xff]  ;;  %v11135_v2 = vld [vmem:[%s11620_s11 + $0xb0] sm:$0xff] }
0x13a6   : > { %v8022_v57 = vpack.i.bf16 %v6238_v50, %v6102_v20  ;;  %v6201_v9 = vrot.slane %v6187_v29, %v11713_v7  ;;  %v6235_v0 = vcombine.high %v11009_v43, %v11001_v45  ;;  %v6065_v53 = vrot.slane %v6051_v5, %v11713_v7  ;;  %v11145_v29 = vld [vmem:[%s11620_s11 + $0xb8] sm:$0xff] }
0x13a7   : > { %7988 = vrot.lane.b32.xlu1 %v7987_v14, %s8690_s23  ;;  %8018 = vrot.lane.b32.xlu0 %v8017_v58, %s8690_s23  ;;  %v7997_v21 = vpack.i.bf16 %v5967_v22, %v5831_v27  ;;  %v8027_v46 = vpack.i.bf16 %v6239_v24, %v6103_v62  ;;  %v5947_v15 = vcombine.high %v10960_v47, %v10963_v26  ;;  %v11090_v38 = vsub.f32 1.0, %v11085_v34 }
0x13a8   : > { %v6240_v39 = vcombine.low %v6201_v9, %v6233_v23  ;;  %v6099_v8 = vcombine.high %v11761_v59, %v11760_v30  ;;  %v6104_v11 = vcombine.low %v6065_v53, %v6097_v6  ;;  %v5811_v56 = vcombine.high %v10873_v4, %v10876_v61 }
0x13a9   : > { %v5915_v41 = vcombine.high %v10966_v17, %v10969_v25  ;;  %v5779_v44 = vcombine.high %v10865_v35, %v10890_v31  ;;  %v6236_v47 = vcombine.low %v10993_v33, %v10977_v10  ;;  %v6241_v26 = vcombine.high %v6201_v9, %v6233_v23  ;;  %v11074_v35 = vld [vmem:[%s11620_s11 + $0x80] sm:$0xff] }
0x13aa   : > { %v8002_v12 = vpack.i.bf16 %v6235_v0, %v6099_v8  ;;  %v8032_v60 = vpack.i.bf16 %v6240_v39, %v6104_v11  ;;  %v5961_v48 = vrot.slane %v5947_v15, %v11713_v7  ;;  %v6100_v36 = vcombine.low %v11753_v16, %v10860_v54 }
0x13ab   : > { %7993 = vrot.lane.b32.xlu1 %v7992_v1, %s8689_s20  ;;  %8023 = vrot.lane.b32.xlu0 %v8022_v57, %s8689_s20  ;;  %v6105_v4 = vcombine.high %v6065_v53, %v6097_v6  ;;  %v5825_v61 = vrot.slane %v5811_v56, %v11713_v7  ;;  %v5929_v17 = vrot.slane %v5915_v41, %v11713_v7  ;;  %v11080_v16 = vsub.f32 1.0, %v11074_v35 }
0x13ac   : > { %v8007_v31 = vpack.i.bf16 %v6236_v47, %v6100_v36  ;;  %v5793_v10 = vrot.slane %v5779_v44, %v11713_v7  ;;  %v11100_v58 = vsub.f32 1.0, %v11095_v42  ;;  %v11110_v50 = vsub.f32 1.0, %v11105_v51 }
0x13ad   : > { %v8037_v25 = vpack.i.bf16 %v6241_v26, %v6105_v4  ;;  %v5968_v33 = vcombine.low %v5929_v17, %v5961_v48  ;;  %v5969_v32 = vcombine.high %v5929_v17, %v5961_v48  ;;  %v11130_v49 = vsub.f32 1.0, %v11125_v19 }
0x13ae   : > { %v5832_v54 = vcombine.low %v5793_v10, %v5825_v61  ;;  %v5833_v7 = vcombine.high %v5793_v10, %v5825_v61  ;;  %v11140_v20 = vsub.f32 1.0, %v11135_v2  ;;  %v11150_v5 = vsub.f32 1.0, %v11145_v29 }
0x13af   : > { %7998 = vrot.lane.b32.xlu1 %v7997_v21, %s8688_s19  ;;  %8028 = vrot.lane.b32.xlu0 %v8027_v46, %s8688_s19  ;;  %v11762_v46 = vcombine.low %v11752_v13, %v11751_v52  ;;  %v11763_v10 = vcombine.low %v11761_v59, %v11760_v30 }
0x13b0   : > { %v8012_v28 = vpack.i.bf16 %v5968_v33, %v5832_v54  ;;  %v8042_v14 = vpack.i.bf16 %v5969_v32, %v5833_v7 }
0x13b3   : > { %8003 = vrot.lane.b32.xlu1 %v8002_v12, %s8692_s26  ;;  %8033 = vrot.lane.b32.xlu0 %v8032_v60, %s8687_s18 }
0x13b7   : > { %8008 = vrot.lane.b32.xlu1 %v8007_v31, %s8691_s24  ;;  %8038 = vrot.lane.b32.xlu0 %v8037_v25, %s8686_s17 }
0x13bb   : > { %8013 = vrot.lane.b32.xlu1 %v8012_v28, %s8687_s18  ;;  %6538 = vperm.xlu0 %7975, %v11080_v16  }
0x13bf   : > { %8043 = vrot.lane.b32.xlu1 %v8042_v14, %s8686_s17  ;;  %6543 = vperm.xlu0 %7975, %v11090_v38  }
0x13c3   : > { %6621 = vperm.xlu1 %7976, %v11074_v35   ;;  %6548 = vperm.xlu0 %7975, %v11100_v58  }
0x13c7   : > { %6626 = vperm.xlu1 %7976, %v11085_v34   ;;  %6553 = vperm.xlu0 %7975, %v11110_v50  }
0x13cb   : > { %6631 = vperm.xlu1 %7976, %v11095_v42   ;;  %6558 = vperm.xlu0 %7975, %v11120_v63  }
0x13cf   : > { %6636 = vperm.xlu1 %7976, %v11105_v51   ;;  %6563 = vperm.xlu0 %7975, %v11130_v49  }
0x13d3   : > { %6641 = vperm.xlu1 %7976, %v11115_v18   ;;  %6568 = vperm.xlu0 %7975, %v11140_v20  }
0x13d7   : > { %6646 = vperm.xlu1 %7976, %v11125_v19   ;;  %6573 = vperm.xlu0 %7975, %v11150_v5  }
0x13db   : > { %6651 = vperm.xlu1 %7976, %v11135_v2  }
0x13df   : > { %6656 = vperm.xlu1 %7976, %v11145_v29  }
0x1415   : > { %v7984_v23 = vpop.permute.xlu1 %7983  ;;  %v7979_v1 = vpop.permute.xlu0 %7978 }
0x1416   : > { %v7981_v27 = vunpack.i.h.bf16 %v7979_v1  ;;  %v7980_v6 = vunpack.i.l.bf16 %v7979_v1  ;;  %v7986_v53 = vunpack.i.h.bf16 %v7984_v23  ;;  %v7985_v21 = vunpack.i.l.bf16 %v7984_v23 }
0x1418   : > { %v6354_v39 = vsel %vm5249_vm3, %v11762_v46, %v7980_v6  ;;  %v6355_v15 = vsel %vm5249_vm3, %v5962_v40, %v7981_v27 }
0x1419   : > { %v7989_v57 = vpop.permute.xlu1 %7988  ;;  %v8019_v22 = vpop.permute.xlu0 %8018  ;;  %v6357_v52 = vsel %vm6356_vm4, %v6354_v39, %v7985_v21  ;;  %v6358_v13 = vsel %vm6356_vm4, %v6355_v15, %v7986_v53 }
0x141a   : > { %v7990_v8 = vunpack.i.l.bf16 %v7989_v57  ;;  %v7991_v44 = vunpack.i.h.bf16 %v7989_v57  ;;  %v8021_v60 = vunpack.i.h.bf16 %v8019_v22  ;;  %v8020_v37 = vunpack.i.l.bf16 %v8019_v22 }
0x141c   : > { %v6360_v3 = vsel %vm6359_vm5, %v6357_v52, %v7990_v8 }
0x141d   : > { %v7994_v24 = vpop.permute.xlu1 %7993  ;;  %v8024_v62 = vpop.permute.xlu0 %8023 }
0x141e   : > { %v7996_v40 = vunpack.i.h.bf16 %v7994_v24  ;;  %v7995_v47 = vunpack.i.l.bf16 %v7994_v24  ;;  %v8026_v48 = vunpack.i.h.bf16 %v8024_v62  ;;  %v8025_v36 = vunpack.i.l.bf16 %v8024_v62 }
0x1421   : > { %v7999_v9 = vpop.permute.xlu1 %7998  ;;  %v8029_v0 = vpop.permute.xlu0 %8028 }
0x1422   : > { %v8001_v17 = vunpack.i.h.bf16 %v7999_v9  ;;  %v8000_v31 = vunpack.i.l.bf16 %v7999_v9  ;;  %v8031_v28 = vunpack.i.h.bf16 %v8029_v0  ;;  %v8030_v32 = vunpack.i.l.bf16 %v8029_v0 }
0x1423   : > { %v6361_v9 = vsel %vm6359_vm5, %v6358_v13, %v7991_v44  ;;  %v6362_v0 = vsel %vm440_vm0, %v6360_v3, %v7995_v47  ;;  %v11764_v47 = vmov 0  }
0x1424   : > { %v6363_v46 = vsel %vm440_vm0, %v6361_v9, %v7996_v40  ;;  %v6365_v39 = vsel %vm6364_vm6, %v6362_v0, %v8000_v31  ;;  %v8498_v40 = vld [vmem:[%s11614_s5] sm:$0xff]  }
0x1425   : > { %v8004_v11 = vpop.permute.xlu1 %8003  ;;  %v8034_v56 = vpop.permute.xlu0 %8033 }
0x1426   : > { %v8006_v41 = vunpack.i.h.bf16 %v8004_v11  ;;  %v8005_v12 = vunpack.i.l.bf16 %v8004_v11  ;;  %v8036_v23 = vunpack.i.h.bf16 %v8034_v56  ;;  %v8035_v1 = vunpack.i.l.bf16 %v8034_v56 }
0x1427   : > { %v6366_v56 = vsel %vm6364_vm6, %v6363_v46, %v8001_v17 }
0x1428   : > { %v6374_v25 = vsel %vm5249_vm3, %v6234_v55, %v8006_v41  ;;  %v6373_v33 = vsel %vm5249_vm3, %v11763_v10, %v8005_v12 }
0x1429   : > { %v8009_v26 = vpop.permute.xlu1 %8008  ;;  %v8039_v54 = vpop.permute.xlu0 %8038 }
0x142a   : > { %v8011_v4 = vunpack.i.h.bf16 %v8009_v26  ;;  %v8010_v61 = vunpack.i.l.bf16 %v8009_v26  ;;  %v8041_v59 = vunpack.i.h.bf16 %v8039_v54  ;;  %v8040_v22 = vunpack.i.l.bf16 %v8039_v54  ;;  %v8499_v26 = vld [vmem:[%s11614_s5 + $0x8] sm:$0xff]  }
0x142c   : > { %v6375_v7 = vsel %vm6356_vm4, %v6373_v33, %v8010_v61  ;;  %v6376_v14 = vsel %vm6356_vm4, %v6374_v25, %v8011_v4 }
0x142d   : > { %v6377_v57 = vsel %vm6359_vm5, %v6375_v7, %v8020_v37  ;;  %v6378_v45 = vsel %vm6359_vm5, %v6376_v14, %v8021_v60  ;;  %v8014_v43 = vpop.permute.xlu1 %8013 }
0x142e   : > { %v6379_v55 = vsel %vm440_vm0, %v6377_v57, %v8025_v36  ;;  %v6380_v30 = vsel %vm440_vm0, %v6378_v45, %v8026_v48  ;;  %v8016_v24 = vunpack.i.h.bf16 %v8014_v43  ;;  %v8015_v62 = vunpack.i.l.bf16 %v8014_v43  ;;  %v8500_v48 = vld [vmem:[%s11614_s5 + $0x10] sm:$0xff]   ;;  %v8501_v36 = vld [vmem:[%s11614_s5 + $0x18] sm:$0xff]  }
0x142f   : > { %v6381_v27 = vsel %vm6364_vm6, %v6379_v55, %v8030_v32  ;;  %v6382_v6 = vsel %vm6364_vm6, %v6380_v30, %v8031_v28 }
0x1430   : > { %v6383_v53 = vsel %vm6367_vm7, %v6381_v27, %v8035_v1  ;;  %v6384_v21 = vsel %vm6367_vm7, %v6382_v6, %v8036_v23  ;;  %v6368_v52 = vsel %vm6367_vm7, %v6365_v39, %v8015_v62  ;;  %v6369_v13 = vsel %vm6367_vm7, %v6366_v56, %v8016_v24 }
0x1431   : > { %v8044_v15 = vpop.permute.xlu1 %8043  ;;  %v6385_v8 = vsel %vm6370_vm8, %v6383_v53, %v8040_v22  ;;  %v6386_v11 = vsel %vm6370_vm8, %v6384_v21, %v8041_v59 }
0x1432   : > { %v8046_v41 = vunpack.i.h.bf16 %v8044_v15  ;;  %v8045_v12 = vunpack.i.l.bf16 %v8044_v15  ;;  %v6396_v44 = vpack.c.bf16 %v6386_v11, %v6385_v8 }
0x1434   : > { %v6371_v60 = vsel %vm6370_vm8, %v6368_v52, %v8045_v12  ;;  %v6372_v3 = vsel %vm6370_vm8, %v6369_v13, %v8046_v41  ;;  %6429 = vmatprep.subr.bf16.mxu0 %v6396_v44 }
0x1435   : > { %v6395_v37 = vpack.c.bf16 %v6372_v3, %v6371_v60 }
0x1437   : > { %6430 = vmatpush1.bf16.msra.mxu0 %v6395_v37 }
0x143a   : > { %7829 = vmatmul.mubr.msk.bf16.vlgmr.msra.gmra.mrb[40].mxu0 %vm5249_vm3, %v8498_v40  ;;  %v11215_v4 = vpop.permute.xlu0 %6538 }
0x143b   : > { %6471 = vmatprep.mubr.bf16.mxu0 %v11764_v47 }
0x143e   : > { %v11219_v17 = vpop.permute.xlu0 %6543 }
0x1442   : > { %7830 = vmatmul.mubr.msk.bf16.gmra.mrb[44].mxu0 %vm5249_vm3, %v8499_v26  ;;  %v11217_v61 = vpop.permute.xlu1 %6621  ;;  %v11223_v25 = vpop.permute.xlu0 %6548 }
0x1443   : > { %6481 = vmatprep.mubr.bf16.mxu0 %v11764_v47 }
0x1446   : > { %v11221_v31 = vpop.permute.xlu1 %6626  ;;  %v11241_v1 = vpop.permute.xlu0 %6553 }
0x144a   : > { %7831 = vmatmul.mubr.msk.bf16.gmra.mrb[48].mxu0 %vm5249_vm3, %v8500_v48  ;;  %v11225_v10 = vpop.permute.xlu1 %6631  ;;  %v11257_v53 = vpop.permute.xlu0 %6558 }
0x144b   : > { %6491 = vmatprep.mubr.bf16.mxu0 %v11764_v47 }
0x144e   : > { %v11249_v55 = vpop.permute.xlu1 %6636  ;;  %v11279_v37 = vpop.permute.xlu0 %6563 }
0x1452   : > { %7832 = vmatmul.mubr.msk.bf16.gmra.mrb[52].mxu0 %vm5249_vm3, %v8501_v36  ;;  %v11265_v15 = vpop.permute.xlu1 %6641 }
0x1456   : > { %v11285_v36 = vpop.permute.xlu1 %6646 }
0x1457   : > { %11765 = vst [vmem:[#allocation9_spill] sm:$0xff] %v11285_v36 }
0x150d   : > { %v11227_v33 = vpop.f32.mrb[40].mxu0 }
0x150e   : > { %v6576_v54 = vmul.f32 %v11215_v4, %v11227_v33  ;;  %v6659_v28 = vmul.f32 %v11217_v61, %v11227_v33  ;;  %v11233_v32 = vpop.f32.mrb[41].mxu0 }
0x150f   : > { %v6577_v7 = vmul.f32 %v11215_v4, %v11233_v32  ;;  %v6660_v14 = vmul.f32 %v11217_v61, %v11233_v32  ;;  %v11239_v23 = vpop.f32.mrb[42].mxu0 }
0x1510   : > { %v6578_v57 = vmul.f32 %v11219_v17, %v11239_v23  ;;  %v6661_v45 = vmul.f32 %v11221_v31, %v11239_v23  ;;  %v11247_v43 = vpop.f32.mrb[43].mxu0 }
0x1511   : > { %v6592_v30 = vadd.f32 %v6577_v7, %v6576_v54  ;;  %v6675_v59 = vadd.f32 %v6660_v14, %v6659_v28  ;;  %v6579_v62 = vmul.f32 %v11219_v17, %v11247_v43  ;;  %v6662_v27 = vmul.f32 %v11221_v31, %v11247_v43 }
0x1513   : > { %v6593_v22 = vadd.f32 %v6592_v30, %v6578_v57  ;;  %v6676_v24 = vadd.f32 %v6675_v59, %v6661_v45 }
0x1515   : > { %v6594_v6 = vadd.f32 %v6593_v22, %v6579_v62  ;;  %v6677_v9 = vadd.f32 %v6676_v24, %v6662_v27  ;;  %v11255_v0 = vpop.f32.mrb[44].mxu0 }
0x1516   : > { %v6580_v21 = vmul.f32 %v11223_v25, %v11255_v0  ;;  %v6663_v46 = vmul.f32 %v11225_v10, %v11255_v0  ;;  %v11263_v39 = vpop.f32.mrb[45].mxu0 }
0x1517   : > { %v6581_v8 = vmul.f32 %v11223_v25, %v11263_v39  ;;  %v6664_v11 = vmul.f32 %v11225_v10, %v11263_v39  ;;  %v11271_v56 = vpop.f32.mrb[46].mxu0 }
0x1518   : > { %v6595_v41 = vadd.f32 %v6594_v6, %v6580_v21  ;;  %v6678_v12 = vadd.f32 %v6677_v9, %v6663_v46  ;;  %v11273_v44 = vpop.f32.mrb[47].mxu0  ;;  %v6582_v60 = vmul.f32 %v11241_v1, %v11271_v56  ;;  %v6665_v3 = vmul.f32 %v11249_v55, %v11271_v56 }
0x1519   : > { %v6583_v26 = vmul.f32 %v11241_v1, %v11273_v44  ;;  %v6666_v48 = vmul.f32 %v11249_v55, %v11273_v44 }
0x151a   : > { %v6596_v52 = vadd.f32 %v6595_v41, %v6581_v8  ;;  %v6679_v13 = vadd.f32 %v6678_v12, %v6664_v11  ;;  %v11307_v8 = vpop.permute.xlu0 %6568  ;;  %v11309_v11 = vpop.permute.xlu1 %6651 }
0x151b   : > { %11766 = vst [vmem:[#allocation10_spill] sm:$0xff] %v11307_v8  ;;  %11767 = vst [vmem:[#allocation16_spill] sm:$0xff] %v11309_v11 }
0x151c   : > { %v6597_v40 = vadd.f32 %v6596_v52, %v6582_v60  ;;  %v6680_v47 = vadd.f32 %v6679_v13, %v6665_v3 }
0x151d   : > { %v11287_v54 = vpop.f32.mrb[48].mxu0 }
0x151e   : > { %v6598_v28 = vadd.f32 %v6597_v40, %v6583_v26  ;;  %v6681_v7 = vadd.f32 %v6680_v47, %v6666_v48  ;;  %v6584_v14 = vmul.f32 %v11257_v53, %v11287_v54  ;;  %v6667_v57 = vmul.f32 %v11265_v15, %v11287_v54  ;;  %v11293_v45 = vpop.f32.mrb[49].mxu0 }
0x151f   : > { %v6585_v30 = vmul.f32 %v11257_v53, %v11293_v45  ;;  %v6668_v59 = vmul.f32 %v11265_v15, %v11293_v45  ;;  %v11299_v22 = vpop.f32.mrb[50].mxu0 }
0x1520   : > { %v6599_v24 = vadd.f32 %v6598_v28, %v6584_v14  ;;  %v6682_v62 = vadd.f32 %v6681_v7, %v6667_v57  ;;  %v11301_v27 = vpop.f32.mrb[51].mxu0  ;;  %v6586_v21 = vmul.f32 %v11279_v37, %v11299_v22  ;;  %v6669_v46 = vmul.f32 %v11285_v36, %v11299_v22 }
0x1521   : > { %v6587_v52 = vmul.f32 %v11279_v37, %v11301_v27  ;;  %v6670_v13 = vmul.f32 %v11285_v36, %v11301_v27 }
0x1522   : > { %v6600_v6 = vadd.f32 %v6599_v24, %v6585_v30  ;;  %v6683_v9 = vadd.f32 %v6682_v62, %v6668_v59  ;;  %v11331_v24 = vpop.permute.xlu0 %6573  ;;  %v11333_v62 = vpop.permute.xlu1 %6656 }
0x1523   : > { %11768 = vst [vmem:[#allocation11_spill] sm:$0xff] %v11331_v24 }
0x1524   : > { %v6601_v41 = vadd.f32 %v6600_v6, %v6586_v21  ;;  %v6684_v12 = vadd.f32 %v6683_v9, %v6669_v46 }
0x1525   : > { %v11315_v60 = vpop.f32.mrb[52].mxu0 }
0x1526   : > { %v6602_v3 = vadd.f32 %v6601_v41, %v6587_v52  ;;  %v6685_v40 = vadd.f32 %v6684_v12, %v6670_v13  ;;  %v6588_v47 = vmul.f32 %v11307_v8, %v11315_v60  ;;  %v6671_v26 = vmul.f32 %v11309_v11, %v11315_v60  ;;  %v11321_v48 = vpop.f32.mrb[53].mxu0 }
0x1527   : > { %v6589_v28 = vmul.f32 %v11307_v8, %v11321_v48  ;;  %v6672_v7 = vmul.f32 %v11309_v11, %v11321_v48  ;;  %v11327_v14 = vpop.f32.mrb[54].mxu0 }
0x1528   : > { %v6603_v57 = vadd.f32 %v6602_v3, %v6588_v47  ;;  %v6686_v30 = vadd.f32 %v6685_v40, %v6671_v26  ;;  %v11329_v59 = vpop.f32.mrb[55].mxu0  ;;  %v6590_v21 = vmul.f32 %v11331_v24, %v11327_v14  ;;  %v6673_v46 = vmul.f32 %v11333_v62, %v11327_v14 }
0x1529   : > { %v6591_v52 = vmul.f32 %v11331_v24, %v11329_v59  ;;  %v6674_v13 = vmul.f32 %v11333_v62, %v11329_v59 }
0x152a   : > { %v6604_v6 = vadd.f32 %v6603_v57, %v6589_v28  ;;  %v6687_v9 = vadd.f32 %v6686_v30, %v6672_v7 }
0x152c   : > { %v6605_v41 = vadd.f32 %v6604_v6, %v6590_v21  ;;  %v6688_v12 = vadd.f32 %v6687_v9, %v6673_v46 }
0x152e   : > { %v6606_v3 = vadd.f32 %v6605_v41, %v6591_v52  ;;  %v6689_v40 = vadd.f32 %v6688_v12, %v6674_v13 }
0x1530   : > { %6690 = vadd.xlane.f32.xlu1 %v6689_v40  ;;  %6607 = vadd.xlane.f32.xlu0 %v6606_v3 }
0x15bd   : > { %v6691_v47 = vpop.xlane.xlu1 %6690  ;;  %v6608_v26 = vpop.xlane.xlu0 %6607 }
0x15be   : > { %v6692_v28 = vrot.slane %v6691_v47, 4  ;;  %v6609_v7 = vrot.slane %v6608_v26, 4 }
0x15c0   : > { %v6693_v57 = vadd.f32 %v6692_v28, %v6691_v47  ;;  %v6610_v30 = vadd.f32 %v6609_v7, %v6608_v26 }
0x15c2   : > { %v6694_v11 = vrot.slane %v6693_v57, 2  ;;  %v6611_v8 = vrot.slane %v6610_v30, 2 }
0x15c4   : > { %v6612_v6 = vadd.f32 %v6611_v8, %v6610_v30  ;;  %v6695_v9 = vadd.f32 %v6694_v11, %v6693_v57 }
0x15c6   : > { %v6613_v21 = vrot.slane %v6612_v6, 1  ;;  %v6696_v46 = vrot.slane %v6695_v9, 1 }
0x15c8   : > { %v6614_v24 = vadd.f32 %v6613_v21, %v6612_v6  ;;  %v6697_v36 = vadd.f32 %v6696_v46, %v6695_v9 }
0x15ca   : > { %7949 = vpush %v6614_v24 }
0x15cb   : > { %7951 = vpush %v6697_v36 }
0x15fb   : > { %s7950_s17 = spop %7949 }
0x15fc   : > { %v6616_v41 = vstv %s7950_s17  ;;  %s7952_s23 = spop %7951 }
0x15fd   : > { %v6618_v12 = vmul.f32 0.00012207031, %v6616_v41  ;;  %v6699_v52 = vstv %s7952_s23 }
0x15fe   : > { %v6700_v13 = vmul.f32 0.00012207031, %v6699_v52 }
0x15ff   : > { %v6702_v3 = vmul.f32 %v6618_v12, %v11090_v38  ;;  %v6701_v40 = vmul.f32 %v6618_v12, %v11080_v16  ;;  %v6704_v11 = vmul.f32 %v6618_v12, %v11110_v50  ;;  %v6703_v26 = vmul.f32 %v6618_v12, %v11100_v58 }
0x1600   : > { %v6710_v47 = vmul.f32 %v11085_v34, %v6700_v13  ;;  %v6709_v8 = vmul.f32 %v11074_v35, %v6700_v13  ;;  %v6712_v28 = vmul.f32 %v11105_v51, %v6700_v13  ;;  %v6711_v7 = vmul.f32 %v11095_v42, %v6700_v13 }
0x1601   : > { %v6706_v57 = vmul.f32 %v6618_v12, %v11130_v49  ;;  %v6714_v30 = vmul.f32 %v11125_v19, %v6700_v13  ;;  %v6705_v6 = vmul.f32 %v6618_v12, %v11120_v63  ;;  %v6713_v9 = vmul.f32 %v11115_v18, %v6700_v13 }
0x1602   : > { %v6718_v24 = vadd.f32 %v6710_v47, %v6702_v3  ;;  %v6717_v36 = vadd.f32 %v6709_v8, %v6701_v40  ;;  %v6720_v21 = vadd.f32 %v6712_v28, %v6704_v11  ;;  %v6719_v46 = vadd.f32 %v6711_v7, %v6703_v26 }
0x1603   : > { %v6722_v41 = vadd.f32 %v6714_v30, %v6706_v57  ;;  %v6721_v52 = vadd.f32 %v6713_v9, %v6705_v6  ;;  %v6708_v3 = vmul.f32 %v6618_v12, %v11150_v5  ;;  %v6716_v40 = vmul.f32 %v11145_v29, %v6700_v13 }
0x1604   : > { %6732 = vperm.xlu1 %7976, %v6718_v24   ;;  %6727 = vperm.xlu0 %7975, %v6717_v36   ;;  %v6707_v47 = vmul.f32 %v6618_v12, %v11140_v20  ;;  %v6715_v8 = vmul.f32 %v11135_v2, %v6700_v13 }
0x1605   : > { %v6724_v24 = vadd.f32 %v6716_v40, %v6708_v3 }
0x1606   : > { %v6723_v36 = vadd.f32 %v6715_v8, %v6707_v47 }
0x1608   : > { %6742 = vperm.xlu1 %7976, %v6720_v21   ;;  %6737 = vperm.xlu0 %7975, %v6719_v46  }
0x160c   : > { %6752 = vperm.xlu1 %7976, %v6722_v41   ;;  %6747 = vperm.xlu0 %7975, %v6721_v52  }
0x1610   : > { %6762 = vperm.xlu1 %7976, %v6724_v24   ;;  %6757 = vperm.xlu0 %7975, %v6723_v36  }
0x1683   : > { %v6733_v11 = vpop.permute.xlu1 %6732  ;;  %v6728_v26 = vpop.permute.xlu0 %6727 }
0x1684   : > { %v11360_v28 = vsub.f32 %v11239_v23, %v6733_v11  ;;  %v11363_v7 = vsub.f32 %v11247_v43, %v6733_v11  ;;  %v11366_v57 = vsub.f32 %v11227_v33, %v6728_v26  ;;  %v11369_v12 = vsub.f32 %v11233_v32, %v6728_v26 }
0x1686   : > { %v6783_v13 = vmul.f32 %v11360_v28, %v11360_v28  ;;  %v6781_v30 = vmul.f32 %v11366_v57, %v11366_v57  ;;  %v6782_v6 = vmul.f32 %v11369_v12, %v11369_v12  ;;  %v6784_v43 = vmul.f32 %v11363_v7, %v11363_v7 }
0x1687   : > { %v6738_v23 = vpop.permute.xlu0 %6737  ;;  %v6743_v9 = vpop.permute.xlu1 %6742 }
0x1688   : > { %v6797_v33 = vmul.f32 %v6781_v30, %v11215_v4  ;;  %v6798_v21 = vmul.f32 %v6782_v6, %v11215_v4  ;;  %v6839_v32 = vmul.f32 %v6781_v30, %v11217_v61  ;;  %v6840_v46 = vmul.f32 %v6782_v6, %v11217_v61 }
0x1689   : > { %v6799_v41 = vmul.f32 %v6783_v13, %v11219_v17  ;;  %v11385_v52 = vsub.f32 %v11255_v0, %v6738_v23  ;;  %v11388_v3 = vsub.f32 %v11263_v39, %v6738_v23  ;;  %v6841_v40 = vmul.f32 %v6783_v13, %v11221_v31 }
0x168a   : > { %v6813_v47 = vadd.f32 %v6798_v21, %v6797_v33  ;;  %v6855_v8 = vadd.f32 %v6840_v46, %v6839_v32  ;;  %v11392_v24 = vsub.f32 %v11271_v56, %v6743_v9  ;;  %v6800_v4 = vmul.f32 %v6784_v43, %v11219_v17 }
0x168b   : > { %v11396_v36 = vsub.f32 %v11273_v44, %v6743_v9  ;;  %v6785_v61 = vmul.f32 %v11385_v52, %v11385_v52  ;;  %v6842_v0 = vmul.f32 %v6784_v43, %v11221_v31  ;;  %v6786_v26 = vmul.f32 %v11388_v3, %v11388_v3  ;;  %v6748_v13 = vpop.permute.xlu0 %6747  ;;  %v6753_v9 = vpop.permute.xlu1 %6752 }
0x168c   : > { %v6814_v11 = vadd.f32 %v6813_v47, %v6799_v41  ;;  %v6856_v39 = vadd.f32 %v6855_v8, %v6841_v40  ;;  %v6787_v56 = vmul.f32 %v11392_v24, %v11392_v24  ;;  %v11411_v33 = vsub.f32 %v11287_v54, %v6748_v13 }
0x168d   : > { %v6801_v17 = vmul.f32 %v6785_v61, %v11223_v25  ;;  %v6788_v44 = vmul.f32 %v11396_v36, %v11396_v36  ;;  %v6843_v23 = vmul.f32 %v6785_v61, %v11225_v10  ;;  %v6802_v31 = vmul.f32 %v6786_v26, %v11223_v25 }
0x168e   : > { %v6815_v30 = vadd.f32 %v6814_v11, %v6800_v4  ;;  %v6857_v6 = vadd.f32 %v6856_v39, %v6842_v0  ;;  %v11414_v21 = vsub.f32 %v11293_v45, %v6748_v13  ;;  %v6844_v32 = vmul.f32 %v6786_v26, %v11225_v10 }
0x168f   : > { %v6803_v41 = vmul.f32 %v6787_v56, %v11241_v1  ;;  %v11419_v47 = vsub.f32 %v11299_v22, %v6753_v9  ;;  %v6789_v8 = vmul.f32 %v11411_v33, %v11411_v33  ;;  %v6845_v25 = vmul.f32 %v6787_v56, %v11249_v55  ;;  %v6758_v54 = vpop.permute.xlu0 %6757 }
0x1690   : > { %v6816_v43 = vadd.f32 %v6815_v30, %v6801_v17  ;;  %v6858_v46 = vadd.f32 %v6857_v6, %v6843_v23  ;;  %v6804_v61 = vmul.f32 %v6788_v44, %v11241_v1  ;;  %v11426_v0 = vsub.f32 %v11301_v27, %v6753_v9  ;;  %v6763_v27 = vpop.permute.xlu1 %6762 }
0x1691   : > { %v6790_v10 = vmul.f32 %v11414_v21, %v11414_v21  ;;  %v6846_v11 = vmul.f32 %v6788_v44, %v11249_v55  ;;  %v6791_v39 = vmul.f32 %v11419_v47, %v11419_v47  ;;  %v6805_v13 = vmul.f32 %v6789_v8, %v11257_v53 }
0x1692   : > { %v6817_v40 = vadd.f32 %v6816_v43, %v6802_v31  ;;  %v6859_v4 = vadd.f32 %v6858_v46, %v6844_v32  ;;  %v11435_v56 = vsub.f32 %v11315_v60, %v6758_v54  ;;  %v6847_v30 = vmul.f32 %v6789_v8, %v11265_v15  ;;  %v11769_v46 = vld [vmem:[#allocation9_spill] sm:$0xff] }
0x1693   : > { %v6792_v6 = vmul.f32 %v11426_v0, %v11426_v0  ;;  %v6806_v17 = vmul.f32 %v6790_v10, %v11257_v53  ;;  %v11442_v44 = vsub.f32 %v11321_v48, %v6758_v54  ;;  %v6848_v23 = vmul.f32 %v6790_v10, %v11265_v15 }
0x1694   : > { %v6818_v45 = vadd.f32 %v6817_v40, %v6803_v41  ;;  %v6860_v22 = vadd.f32 %v6859_v4, %v6845_v25  ;;  %v6807_v31 = vmul.f32 %v6791_v39, %v11279_v37  ;;  %v11447_v43 = vsub.f32 %v11327_v14, %v6763_v27 }
0x1695   : > { %v6793_v32 = vmul.f32 %v11435_v56, %v11435_v56  ;;  %v6849_v41 = vmul.f32 %v6791_v39, %v11769_v46  ;;  %v6808_v53 = vmul.f32 %v6792_v6, %v11279_v37  ;;  %v11454_v48 = vsub.f32 %v11329_v59, %v6763_v27 }
0x1696   : > { %v6819_v26 = vadd.f32 %v6818_v45, %v6804_v61  ;;  %v6861_v1 = vadd.f32 %v6860_v22, %v6846_v11  ;;  %v6794_v15 = vmul.f32 %v11442_v44, %v11442_v44  ;;  %v6850_v25 = vmul.f32 %v6792_v6, %v11769_v46  ;;  %v11770_v61 = vld [vmem:[#allocation10_spill] sm:$0xff]  ;;  %v11771_v11 = vld [vmem:[#allocation16_spill] sm:$0xff]  ;;  %v6503_v46 = vld [vmem:[%s11620_s11 + $0x8] sm:$0xff] }
0x1697   : > { %v6795_v14 = vmul.f32 %v11447_v43, %v11447_v43  ;;  %v6809_v45 = vmul.f32 %v6793_v32, %v11770_v61  ;;  %v6851_v22 = vmul.f32 %v6793_v32, %v11771_v11  ;;  %v6796_v37 = vmul.f32 %v11454_v48, %v11454_v48 }
0x1698   : > { %v6820_v55 = vadd.f32 %v6819_v26, %v6805_v13  ;;  %v6862_v9 = vadd.f32 %v6861_v1, %v6847_v30  ;;  %v6810_v59 = vmul.f32 %v6794_v15, %v11770_v61  ;;  %v6852_v26 = vmul.f32 %v6794_v15, %v11771_v11  ;;  %v11772_v1 = vld [vmem:[#allocation11_spill] sm:$0xff]  ;;  %v6506_v15 = vld [vmem:[%s11620_s11 + $0x20] sm:$0xff] }
0x1699   : > { %v6811_v30 = vmul.f32 %v6795_v14, %v11772_v1  ;;  %v6853_v6 = vmul.f32 %v6795_v14, %v11333_v62  ;;  %v7836_v14 = vld [vmem:[%s11620_s11 + $0x58] sm:$0xff]  ;;  %v7838_v61 = vld [vmem:[%s11620_s11 + $0x68] sm:$0xff] }
0x169a   : > { %v6821_v60 = vadd.f32 %v6820_v55, %v6806_v17  ;;  %v6863_v40 = vadd.f32 %v6862_v9, %v6848_v23  ;;  %v6812_v55 = vmul.f32 %v6796_v37, %v11772_v1  ;;  %v6854_v9 = vmul.f32 %v6796_v37, %v11333_v62  ;;  %v6507_v62 = vld [vmem:[%s11620_s11 + $0x28] sm:$0xff] }
0x169c   : > { %v6822_v8 = vadd.f32 %v6821_v60, %v6807_v31  ;;  %v6864_v4 = vadd.f32 %v6863_v40, %v6849_v41  ;;  %v6505_v41 = vld [vmem:[%s11620_s11 + $0x18] sm:$0xff]  ;;  %v6502_v40 = vld [vmem:[%s11620_s11] sm:$0xff] }
0x169e   : > { %v6823_v54 = vadd.f32 %v6822_v8, %v6808_v53  ;;  %v6865_v10 = vadd.f32 %v6864_v4, %v6850_v25  ;;  %v6504_v53 = vld [vmem:[%s11620_s11 + $0x10] sm:$0xff]  ;;  %v6509_v8 = vld [vmem:[%s11620_s11 + $0x38] sm:$0xff]  ;;  %v7834_v25 = vld [vmem:[%s11620_s11 + $0x48] sm:$0xff] }
0x169f   : > { %v6508_v4 = vld [vmem:[%s11620_s11 + $0x30] sm:$0xff] }
0x16a0   : > { %v6824_v39 = vadd.f32 %v6823_v54, %v6809_v45  ;;  %v6866_v13 = vadd.f32 %v6865_v10, %v6851_v22  ;;  %v7833_v54 = vld [vmem:[%s11620_s11 + $0x40] sm:$0xff]  ;;  %v7835_v45 = vld [vmem:[%s11620_s11 + $0x50] sm:$0xff] }
0x16a1   : > { %v7837_v10 = vld [vmem:[%s11620_s11 + $0x60] sm:$0xff] }
0x16a2   : > { %v6825_v27 = vadd.f32 %v6824_v39, %v6810_v59  ;;  %v6867_v17 = vadd.f32 %v6866_v13, %v6852_v26 }
0x16a4   : > { %v6826_v23 = vadd.f32 %v6825_v27, %v6811_v30  ;;  %v6868_v31 = vadd.f32 %v6867_v17, %v6853_v6 }
0x16a6   : > { %v6827_v60 = vadd.f32 %v6826_v23, %v6812_v55  ;;  %v6869_v32 = vadd.f32 %v6868_v31, %v6854_v9 }
0x16a8   : > { %6828 = vadd.xlane.f32.xlu0 %v6827_v60  ;;  %6870 = vadd.xlane.f32.xlu1 %v6869_v32 }
0x16b9   : > { %6972 = vperm.xlu1 %7976, %v6503_v46  }
0x16bd   : > { %6982 = vperm.xlu1 %7976, %v6505_v41  }
0x16be   : > { %6967 = vperm.xlu0 %7975, %v6502_v40  }
0x16c1   : > { %6992 = vperm.xlu1 %7976, %v6507_v62  }
0x16c2   : > { %6977 = vperm.xlu0 %7975, %v6504_v53  }
0x16c5   : > { %7002 = vperm.xlu1 %7976, %v6509_v8  }
0x16c6   : > { %6987 = vperm.xlu0 %7975, %v6506_v15  }
0x16c9   : > { %7028 = vperm.xlu1 %7976, %v7834_v25  }
0x16ca   : > { %6997 = vperm.xlu0 %7975, %v6508_v4  }
0x16cd   : > { %7038 = vperm.xlu1 %7976, %v7836_v14  }
0x16ce   : > { %7023 = vperm.xlu0 %7975, %v7833_v54  }
0x16d1   : > { %7048 = vperm.xlu1 %7976, %v7838_v61  }
0x16d2   : > { %7033 = vperm.xlu0 %7975, %v7835_v45  }
0x16d6   : > { %7043 = vperm.xlu0 %7975, %v7837_v10  }
0x1735   : > { %v6829_v11 = vpop.xlane.xlu0 %6828  ;;  %v6871_v22 = vpop.xlane.xlu1 %6870 }
0x1736   : > { %v6830_v37 = vrot.slane %v6829_v11, 4  ;;  %v6872_v59 = vrot.slane %v6871_v22, 4 }
0x1738   : > { %v6831_v39 = vadd.f32 %v6830_v37, %v6829_v11  ;;  %v6873_v26 = vadd.f32 %v6872_v59, %v6871_v22 }
0x173a   : > { %v6832_v13 = vrot.slane %v6831_v39, 2  ;;  %v6874_v1 = vrot.slane %v6873_v26, 2 }
0x173c   : > { %v6833_v30 = vadd.f32 %v6832_v13, %v6831_v39  ;;  %v6875_v27 = vadd.f32 %v6874_v1, %v6873_v26 }
0x173e   : > { %v6834_v6 = vrot.slane %v6833_v30, 1  ;;  %v6876_v17 = vrot.slane %v6875_v27, 1 }
0x1740   : > { %v6835_v55 = vadd.f32 %v6834_v6, %v6833_v30  ;;  %v6877_v23 = vadd.f32 %v6876_v17, %v6875_v27 }
0x1742   : > { %7953 = vpush %v6835_v55 }
0x1743   : > { %7955 = vpush %v6877_v23 }
0x1773   : > { %s7954_s24 = spop %7953 }
0x1774   : > { %v6837_v9 = vstv %s7954_s24  ;;  %s7956_s26 = spop %7955 }
0x1775   : > { %v6838_v31 = vmul.f32 0.00012207031, %v6837_v9  ;;  %v6879_v60 = vstv %s7956_s26 }
0x1776   : > { %v6880_v32 = vmul.f32 0.00012207031, %v6879_v60 }
0x1777   : > { %v6881_v46 = vadd.f32 1e-05, %v6838_v31 }
0x1778   : > { %v6891_v41 = vadd.f32 1e-05, %v6880_v32 }
0x1779   : > { %8654 = vrsqrt.f32 %v6881_v46 }
0x177a   : > { %8656 = vrsqrt.f32 %v6891_v41 }
0x1783   : > { %v8655_v40 = vpop.eup %8654 }
0x1784   : > { %v8657_v62 = vpop.eup %8656  ;;  %v6884_v53 = vmul.f32 %v8655_v40, %v11090_v38  ;;  %v6883_v8 = vmul.f32 %v8655_v40, %v11080_v16  ;;  %v6886_v4 = vmul.f32 %v8655_v40, %v11110_v50  ;;  %v6885_v14 = vmul.f32 %v8655_v40, %v11100_v58 }
0x1785   : > { %v6894_v15 = vmul.f32 %v8657_v62, %v11085_v34  ;;  %v6893_v25 = vmul.f32 %v8657_v62, %v11074_v35  ;;  %v6896_v45 = vmul.f32 %v8657_v62, %v11105_v51  ;;  %v6895_v10 = vmul.f32 %v8657_v62, %v11095_v42 }
0x1786   : > { %v6888_v38 = vmul.f32 %v8655_v40, %v11130_v49  ;;  %v6898_v16 = vmul.f32 %v8657_v62, %v11125_v19  ;;  %v6887_v34 = vmul.f32 %v8655_v40, %v11120_v63  ;;  %v6897_v35 = vmul.f32 %v8657_v62, %v11115_v18  ;;  %v7840_v18 = vld [vmem:[%s11620_s11 + $0x78] sm:$0xff] }
0x1787   : > { %v6902_v54 = vadd.f32 %v6894_v15, %v6884_v53  ;;  %v6901_v61 = vadd.f32 %v6893_v25, %v6883_v8  ;;  %v6904_v11 = vadd.f32 %v6896_v45, %v6886_v4  ;;  %v6903_v50 = vadd.f32 %v6895_v10, %v6885_v14  ;;  %v8661_v45 = vld [vmem:[%s8789_s28 + $0x10] sm:$0xff] }
0x1788   : > { %v6906_v58 = vadd.f32 %v6898_v16, %v6888_v38  ;;  %v6905_v22 = vadd.f32 %v6897_v35, %v6887_v34  ;;  %v6890_v51 = vmul.f32 %v8655_v40, %v11150_v5  ;;  %v6900_v42 = vmul.f32 %v8657_v62, %v11145_v29  ;;  %v7839_v5 = vld [vmem:[%s11620_s11 + $0x70] sm:$0xff]  ;;  %v6973_v29 = vpop.permute.xlu1 %6972  ;;  %v8662_v38 = vld [vmem:[%s8789_s28 + $0x18] sm:$0xff]  ;;  %v8663_v34 = vld [vmem:[%s8789_s28] sm:$0xff] }
0x1789   : > { %6916 = vperm.xlu1 %7976, %v6902_v54   ;;  %6911 = vperm.xlu0 %7975, %v6901_v61   ;;  %v6889_v37 = vmul.f32 %v8655_v40, %v11140_v20  ;;  %v6899_v49 = vmul.f32 %v8657_v62, %v11135_v2  ;;  %v6968_v20 = vpop.permute.xlu0 %6967 }
0x178a   : > { %v6908_v19 = vadd.f32 %v6900_v42, %v6890_v51 }
0x178b   : > { %v6907_v63 = vadd.f32 %v6899_v49, %v6889_v37 }
0x178c   : > { %v6983_v59 = vpop.permute.xlu1 %6982 }
0x178d   : > { %6926 = vperm.xlu1 %7976, %v6904_v11   ;;  %6921 = vperm.xlu0 %7975, %v6903_v50   ;;  %v6978_v2 = vpop.permute.xlu0 %6977  ;;  %v8664_v11 = vld [vmem:[%s8789_s28 + $0x8] sm:$0xff] }
0x1790   : > { %v6993_v39 = vpop.permute.xlu1 %6992 }
0x1791   : > { %6936 = vperm.xlu1 %7976, %v6906_v58   ;;  %6931 = vperm.xlu0 %7975, %v6905_v22   ;;  %v6988_v26 = vpop.permute.xlu0 %6987 }
0x1794   : > { %v11535_v13 = vpop.permute.xlu1 %7002 }
0x1795   : > { %6946 = vperm.xlu1 %7976, %v6908_v19   ;;  %6941 = vperm.xlu0 %7975, %v6907_v63   ;;  %v11537_v1 = vpop.permute.xlu0 %6997 }
0x1798   : > { %v7029_v30 = vpop.permute.xlu1 %7028 }
0x1799   : > { %7058 = vperm.xlu1 %7976, %v7840_v18   ;;  %7053 = vperm.xlu0 %7975, %v7839_v5   ;;  %v7024_v27 = vpop.permute.xlu0 %7023 }
0x179c   : > { %v7039_v6 = vpop.permute.xlu1 %7038 }
0x179d   : > { %v7034_v17 = vpop.permute.xlu0 %7033 }
0x17a0   : > { %v11539_v55 = vpop.permute.xlu1 %7048 }
0x17a1   : > { %v11541_v23 = vpop.permute.xlu0 %7043 }
0x1808   : > { %v6917_v9 = vpop.permute.xlu1 %6916  ;;  %v6912_v31 = vpop.permute.xlu0 %6911 }
0x1809   : > { %v6951_v60 = vmul.f32 %v6917_v9, %v11360_v28  ;;  %v6952_v32 = vmul.f32 %v6917_v9, %v11363_v7  ;;  %v6949_v46 = vmul.f32 %v6912_v31, %v11366_v57  ;;  %v6950_v41 = vmul.f32 %v6912_v31, %v11369_v12  ;;  %v8668_v31 = vld [vmem:[%s8789_s28 + $0x28] sm:$0xff] }
0x180b   : > { %v7007_v40 = vmul.f32 %v6973_v29, %v6951_v60  ;;  %v7008_v62 = vmul.f32 %v6973_v29, %v6952_v32  ;;  %v7005_v53 = vmul.f32 %v6968_v20, %v6949_v46  ;;  %v7006_v8 = vmul.f32 %v6968_v20, %v6950_v41 }
0x180c   : > { %v6927_v15 = vpop.permute.xlu1 %6926  ;;  %v6922_v25 = vpop.permute.xlu0 %6921 }
0x180d   : > { %v7063_v4 = vadd.f32 %v7029_v30, %v7007_v40  ;;  %v7064_v14 = vadd.f32 %v7029_v30, %v7008_v62  ;;  %v7061_v54 = vadd.f32 %v7024_v27, %v7005_v53  ;;  %v7062_v28 = vadd.f32 %v7024_v27, %v7006_v8  ;;  %v8665_v30 = vld [vmem:[%s8789_s28 + $0x30] sm:$0xff]  ;;  %v8670_v8 = vld [vmem:[%s8789_s28 + $0x58] sm:$0xff] }
0x180e   : > { %v6955_v7 = vmul.f32 %v6927_v15, %v11392_v24  ;;  %v6956_v57 = vmul.f32 %v6927_v15, %v11396_v36  ;;  %v6953_v12 = vmul.f32 %v6922_v25, %v11385_v52  ;;  %v6954_v61 = vmul.f32 %v6922_v25, %v11388_v3  ;;  %v8671_v15 = vld [vmem:[%s8789_s28 + $0x40] sm:$0xff] }
0x180f   : > { %v7079_v10 = vmul.f32 %v8661_v45, %v7063_v4  ;;  %v7080_v16 = vmul.f32 %v8662_v38, %v7064_v14  ;;  %v7077_v35 = vmul.f32 %v8663_v34, %v7061_v54  ;;  %v7078_v50 = vmul.f32 %v8664_v11, %v7062_v28  ;;  %v8672_v4 = vld [vmem:[%s8789_s28 + $0x48] sm:$0xff] }
0x1810   : > { %v7011_v58 = vmul.f32 %v6983_v59, %v6955_v7  ;;  %v7012_v24 = vmul.f32 %v6983_v59, %v6956_v57  ;;  %v7009_v22 = vmul.f32 %v6978_v2, %v6953_v12  ;;  %v7010_v36 = vmul.f32 %v6978_v2, %v6954_v61  ;;  %v6937_v51 = vpop.permute.xlu1 %6936  ;;  %v6932_v52 = vpop.permute.xlu0 %6931  ;;  %v8673_v61 = vld [vmem:[%s8789_s28 + $0x70] sm:$0xff]  ;;  %v8676_v34 = vld [vmem:[%s8789_s28 + $0x68] sm:$0xff] }
0x1811   : > { %7095 = vst [vmem:[%s11552_s16 + $0x10] sm:$0xff] %v7079_v10  ;;  %7096 = vst [vmem:[%s11552_s16 + $0x18] sm:$0xff] %v7080_v16  ;;  %v6959_v3 = vmul.f32 %v6937_v51, %v11419_v47  ;;  %v6960_v42 = vmul.f32 %v6937_v51, %v11426_v0  ;;  %v6957_v37 = vmul.f32 %v6932_v52, %v11411_v33  ;;  %v8666_v0 = vld [vmem:[%s8789_s28 + $0x38] sm:$0xff]  ;;  %v8667_v33 = vld [vmem:[%s8789_s28 + $0x20] sm:$0xff] }
0x1812   : > { %7093 = vst [vmem:[%s11552_s16] sm:$0xff] %v7077_v35  ;;  %7094 = vst [vmem:[%s11552_s16 + $0x8] sm:$0xff] %v7078_v50  ;;  %v6958_v49 = vmul.f32 %v6932_v52, %v11414_v21  ;;  %v7067_v19 = vadd.f32 %v7039_v6, %v7011_v58  ;;  %v7068_v63 = vadd.f32 %v7039_v6, %v7012_v24  ;;  %v8674_v10 = vld [vmem:[%s8789_s28 + $0x78] sm:$0xff]  ;;  %v8675_v16 = vld [vmem:[%s8789_s28 + $0x60] sm:$0xff] }
0x1813   : > { %v7065_v18 = vadd.f32 %v7034_v17, %v7009_v22  ;;  %v7066_v5 = vadd.f32 %v7034_v17, %v7010_v36  ;;  %v7015_v29 = vmul.f32 %v6993_v39, %v6959_v3  ;;  %v7016_v20 = vmul.f32 %v6993_v39, %v6960_v42 }
0x1814   : > { %v7013_v59 = vmul.f32 %v6988_v26, %v6957_v37  ;;  %v7014_v2 = vmul.f32 %v6988_v26, %v6958_v49  ;;  %v7083_v47 = vmul.f32 %v8665_v30, %v7067_v19  ;;  %v7084_v27 = vmul.f32 %v8666_v0, %v7068_v63  ;;  %v6947_v6 = vpop.permute.xlu1 %6946  ;;  %v6942_v17 = vpop.permute.xlu0 %6941 }
0x1815   : > { %v7081_v9 = vmul.f32 %v8667_v33, %v7065_v18  ;;  %v7082_v21 = vmul.f32 %v8668_v31, %v7066_v5  ;;  %v7071_v39 = vadd.f32 %v11539_v55, %v7015_v29  ;;  %v7072_v26 = vadd.f32 %v11539_v55, %v7016_v20  ;;  %v8669_v55 = vld [vmem:[%s8789_s28 + $0x50] sm:$0xff] }
0x1816   : > { %v7069_v60 = vadd.f32 %v11541_v23, %v7013_v59  ;;  %v7070_v32 = vadd.f32 %v11541_v23, %v7014_v2  ;;  %7099 = vst [vmem:[%s11552_s16 + $0x30] sm:$0xff] %v7083_v47  ;;  %7100 = vst [vmem:[%s11552_s16 + $0x38] sm:$0xff] %v7084_v27  ;;  %v6963_v46 = vmul.f32 %v6947_v6, %v11447_v43 }
0x1817   : > { %7097 = vst [vmem:[%s11552_s16 + $0x20] sm:$0xff] %v7081_v9  ;;  %7098 = vst [vmem:[%s11552_s16 + $0x28] sm:$0xff] %v7082_v21  ;;  %v6964_v41 = vmul.f32 %v6947_v6, %v11454_v48  ;;  %v6961_v40 = vmul.f32 %v6942_v17, %v11435_v56  ;;  %v6962_v62 = vmul.f32 %v6942_v17, %v11442_v44 }
0x1818   : > { %v7087_v53 = vmul.f32 %v8669_v55, %v7071_v39  ;;  %v7088_v23 = vmul.f32 %v8670_v8, %v7072_v26  ;;  %v7085_v25 = vmul.f32 %v8671_v15, %v7069_v60  ;;  %v7086_v14 = vmul.f32 %v8672_v4, %v7070_v32  ;;  %v7059_v48 = vpop.permute.xlu1 %7058  ;;  %v7054_v28 = vpop.permute.xlu0 %7053 }
0x1819   : > { %v7019_v43 = vmul.f32 %v11535_v13, %v6963_v46  ;;  %v7020_v56 = vmul.f32 %v11535_v13, %v6964_v41  ;;  %v7017_v44 = vmul.f32 %v11537_v1, %v6961_v40  ;;  %v7018_v54 = vmul.f32 %v11537_v1, %v6962_v62 }
0x181a   : > { %7103 = vst [vmem:[%s11552_s16 + $0x50] sm:$0xff] %v7087_v53  ;;  %7104 = vst [vmem:[%s11552_s16 + $0x58] sm:$0xff] %v7088_v23 }
0x181b   : > { %7101 = vst [vmem:[%s11552_s16 + $0x40] sm:$0xff] %v7085_v25  ;;  %7102 = vst [vmem:[%s11552_s16 + $0x48] sm:$0xff] %v7086_v14  ;;  %v7075_v7 = vadd.f32 %v7059_v48, %v7019_v43  ;;  %v7076_v57 = vadd.f32 %v7059_v48, %v7020_v56  ;;  %v7073_v12 = vadd.f32 %v7054_v28, %v7017_v44 }
0x181c   : > { %v7074_v13 = vadd.f32 %v7054_v28, %v7018_v54 }
0x181d   : > { %v7091_v45 = vmul.f32 %v8673_v61, %v7075_v7  ;;  %v7092_v38 = vmul.f32 %v8674_v10, %v7076_v57  ;;  %v7089_v1 = vmul.f32 %v8675_v16, %v7073_v12 }
0x181e   : > { %v7090_v35 = vmul.f32 %v8676_v34, %v7074_v13 }
0x181f   : > { %7107 = vst [vmem:[%s11552_s16 + $0x70] sm:$0xff] %v7091_v45  ;;  %7108 = vst [vmem:[%s11552_s16 + $0x78] sm:$0xff] %v7092_v38 }
0x1820   : > { %7105 = vst [vmem:[%s11552_s16 + $0x60] sm:$0xff] %v7089_v1  ;;  %7106 = vst [vmem:[%s11552_s16 + $0x68] sm:$0xff] %v7090_v35 }
0x1821 PF: > { %s22_s21 = sadd.s32 1, %s8683_s21  }
0x1822   : > { %p19_p4 = scmp.ge.s32.totalorder %s22_s21, 4  }
0x1824   :  { %21 = sbr.rel (!%p19_p4) target bundleno = 1 (0x1), region = 132 }

</bundles_post_ra>
